<compile_context>
chip_gen: v7x
topology: tpu7x:2x2x1
jax: 0.10.0
libtpu: 0.0.40
codegen_flags: <defaults>
</compile_context>

<pallas_src>
import functools

import jax
import jax.numpy as jnp
from jax import lax
from jax.experimental import pallas as pl
from jax.experimental.pallas import tpu as pltpu


def _leaky_relu(x, slope=0.01):          # nn.LeakyReLU default slope
    return jnp.where(x > 0, x, slope * x)


def seb_attn_kernel(x_pad_ref, wc_ref, scale_ref, shift_ref,
                    wq_ref, bq_ref, wk_ref, bk_ref, wv_ref, bv_ref,
                    gamma_ref, o_ref, *, ks, hout, wout):
    # x_pad_ref : (1, H+2p, W+2p, Cin)  zero-padded input, one batch element
    # wc_ref    : (ks*ks*Cin, C)        3x3 conv weight, im2col layout
    # scale/shift: (1, C)               folded inference BatchNorm affine
    # wq/wk     : (C, C8), bq/bk: (1, C8);  wv: (C, C), bv: (1, C)
    # gamma_ref : (1,) scalar in SMEM
    # o_ref     : (1, H*W, C)
    cin = x_pad_ref.shape[-1]
    hw = hout * wout
    x_pad = x_pad_ref[0]                                   # (Hp, Wp, Cin)

    # ---- im2col: one (HW, ks*ks*Cin) slab -> single MXU matmul for the conv
    taps = []
    for kh in range(ks):
        for kw in range(ks):
            taps.append(x_pad[kh:kh + hout, kw:kw + wout, :])
    slab = jnp.concatenate(taps, axis=-1).reshape(hw, ks * ks * cin)

    pre = jnp.dot(slab, wc_ref[...], preferred_element_type=jnp.float32)
    x = _leaky_relu(pre * scale_ref[...] + shift_ref[...])  # (HW, C) f32

    # ---- 1x1 Q / K / V convs: plain channel matmuls
    q = jnp.dot(x, wq_ref[...], preferred_element_type=jnp.float32) + bq_ref[...]
    k = jnp.dot(x, wk_ref[...], preferred_element_type=jnp.float32) + bk_ref[...]
    v = jnp.dot(x, wv_ref[...], preferred_element_type=jnp.float32) + bv_ref[...]

    # ---- attention = softmax_j(Q K^T), (HW, HW) lane-dense
    logits = jnp.dot(q, k.T, preferred_element_type=jnp.float32)
    m = jnp.max(logits, axis=-1, keepdims=True)
    p = jnp.exp(logits - m)
    denom = jnp.sum(p, axis=-1, keepdims=True)
    attn = p * pl.reciprocal(denom, approx=False)

    out_attn = jnp.dot(attn, v, preferred_element_type=jnp.float32)  # (HW, C)

    # ---- gamma-scaled residual
    y = gamma_ref[0] * out_attn + x
    o_ref[...] = y[None].astype(o_ref.dtype)


def seb_with_attn_pallas(feat, params, *, kernel_size=3, stride=1, padding=1,
                         eps=1e-5):
    """feat: (N, Cin, H, W) f32; params: PyTorch-layout weights (see __main__)."""
    if stride != 1:
        # TODO(synk): strided first conv is not implemented in the Pallas kernel.
        raise NotImplementedError("stride must be 1")
    # TODO(synk): BatchNorm2d is applied in inference mode (running stats folded
    # into a per-channel affine); training-mode batch statistics not implemented.

    conv_w = jnp.asarray(params["conv_w"], jnp.float32)      # (C, Cin, ks, ks)
    conv_b = params.get("conv_b", None)
    bn_w = jnp.asarray(params["bn_weight"], jnp.float32)
    bn_b = jnp.asarray(params["bn_bias"], jnp.float32)
    bn_mean = jnp.asarray(params["bn_mean"], jnp.float32)
    bn_var = jnp.asarray(params["bn_var"], jnp.float32)
    wq = jnp.asarray(params["q_w"], jnp.float32)             # (C8, C, 1, 1)
    bq = jnp.asarray(params["q_b"], jnp.float32)
    wk = jnp.asarray(params["k_w"], jnp.float32)
    bk = jnp.asarray(params["k_b"], jnp.float32)
    wv = jnp.asarray(params["v_w"], jnp.float32)             # (C, C, 1, 1)
    bv = jnp.asarray(params["v_b"], jnp.float32)
    gamma = jnp.asarray(params["gamma"], jnp.float32).reshape(1)

    N, cin, H, W = feat.shape
    C = conv_w.shape[0]
    C8 = wq.shape[0]
    ks = kernel_size
    hout = H + 2 * padding - (ks - 1)
    wout = W + 2 * padding - (ks - 1)
    hw = hout * wout
    hp, wp = H + 2 * padding, W + 2 * padding

    # ---- free glue: layout + parameter folding (no compute on activations) ----
    x_nhwc = jnp.transpose(feat.astype(jnp.float32), (0, 2, 3, 1))
    x_pad = jnp.pad(x_nhwc, ((0, 0), (padding, padding), (padding, padding), (0, 0)))

    # OIHW -> (kh, kw, ci, co) -> (ks*ks*Cin, C), matching the kernel's slab order.
    wc = jnp.transpose(conv_w, (2, 3, 1, 0)).reshape(ks * ks * cin, C)

    # Fold inference BatchNorm (+ optional conv bias) into per-channel scale/shift.
    bn_scale = bn_w / jnp.sqrt(bn_var + eps)
    shift = bn_b - bn_mean * bn_scale
    if conv_b is not None:
        shift = shift + jnp.asarray(conv_b, jnp.float32) * bn_scale
    scale = bn_scale.reshape(1, C)
    shift = shift.reshape(1, C)

    # 1x1 conv weights (Cout, Cin, 1, 1) -> (Cin, Cout); biases -> (1, Cout).
    wq2 = jnp.transpose(wq.reshape(C8, C))
    wk2 = jnp.transpose(wk.reshape(C8, C))
    wv2 = jnp.transpose(wv.reshape(C, C))
    bq2 = bq.reshape(1, C8)
    bk2 = bk.reshape(1, C8)
    bv2 = bv.reshape(1, C)

    kern = functools.partial(seb_attn_kernel, ks=ks, hout=hout, wout=wout)
    const2d = lambda n: (0, 0)   # parameters: same block every grid step

    out_flat = pl.pallas_call(
        kern,
        out_shape=jax.ShapeDtypeStruct((N, hw, C), jnp.float32),
        grid_spec=pltpu.PrefetchScalarGridSpec(
            num_scalar_prefetch=0,
            grid=(N,),
            in_specs=[
                pl.BlockSpec((1, hp, wp, cin), lambda n: (n, 0, 0, 0)),
                pl.BlockSpec((ks * ks * cin, C), const2d),
                pl.BlockSpec((1, C), const2d),
                pl.BlockSpec((1, C), const2d),
                pl.BlockSpec((C, C8), const2d),
                pl.BlockSpec((1, C8), const2d),
                pl.BlockSpec((C, C8), const2d),
                pl.BlockSpec((1, C8), const2d),
                pl.BlockSpec((C, C), const2d),
                pl.BlockSpec((1, C), const2d),
                pl.BlockSpec(memory_space=pltpu.MemorySpace.SMEM),
            ],
            out_specs=pl.BlockSpec((1, hw, C), lambda n: (n, 0, 0)),
        ),
        compiler_params=pltpu.CompilerParams(
            dimension_semantics=("parallel",)),
    )(x_pad, wc, scale, shift, wq2, bq2, wk2, bk2, wv2, bv2, gamma)

    # (N, HW, C) -> (N, C, Hout, Wout)
    return jnp.transpose(out_flat.reshape(N, hout, wout, C), (0, 3, 1, 2))


def seb_with_attn_ref(feat, params, *, stride=1, padding=1, eps=1e-5):
    """Pure-JAX reference matching the PyTorch forward (NCHW / OIHW)."""
    hi = lax.Precision.HIGHEST
    x = lax.conv_general_dilated(
        feat, params["conv_w"], window_strides=(stride, stride),
        padding=[(padding, padding), (padding, padding)],
        dimension_numbers=("NCHW", "OIHW", "NCHW"), precision=hi)
    if params.get("conv_b", None) is not None:
        x = x + params["conv_b"][None, :, None, None]
    x = (x - params["bn_mean"][None, :, None, None]) / jnp.sqrt(
        params["bn_var"][None, :, None, None] + eps)
    x = x * params["bn_weight"][None, :, None, None] + params["bn_bias"][None, :, None, None]
    x = jnp.where(x > 0, x, 0.01 * x)

    B, C, H, W = x.shape
    HW = H * W

    def conv1x1(a, w, b):
        o = jnp.einsum("bchw,oc->bohw", a, w.reshape(w.shape[0], w.shape[1]),
                       precision=hi)
        return o + b[None, :, None, None]

    q = conv1x1(x, params["q_w"], params["q_b"]).reshape(B, -1, HW)
    q = jnp.transpose(q, (0, 2, 1))                                    # (B, HW, C8)
    k = conv1x1(x, params["k_w"], params["k_b"]).reshape(B, -1, HW)    # (B, C8, HW)
    attn = jax.nn.softmax(jnp.einsum("bic,bcj->bij", q, k, precision=hi), axis=-1)
    v = conv1x1(x, params["v_w"], params["v_b"]).reshape(B, -1, HW)    # (B, C, HW)
    out = jnp.einsum("bcj,bij->bci", v, attn, precision=hi)            # (B, C, HW)
    out = out.reshape(B, C, H, W)
    return params["gamma"].reshape(()) * out + x


if __name__ == "__main__":
    N, Cin, H, W = 2, 4, 16, 16
    C = 32                      # out_channels (needs C // 8 >= 1)
    C8 = C // 8

    key = jax.random.PRNGKey(0)
    keys = jax.random.split(key, 12)

    feat = jax.random.normal(keys[0], (N, Cin, H, W), jnp.float32)

    def uinit(k, shape, fan_in):
        b = 1.0 / jnp.sqrt(fan_in)
        return jax.random.uniform(k, shape, jnp.float32, -b, b)

    params = {
        # seq: Conv2d(Cin, C, 3, stride=1, padding=1, bias=False) + BN + LeakyReLU
        "conv_w": uinit(keys[1], (C, Cin, 3, 3), Cin * 9),
        "conv_b": None,
        "bn_weight": jax.random.uniform(keys[2], (C,), jnp.float32, 0.5, 1.5),
        "bn_bias": 0.1 * jax.random.normal(keys[3], (C,), jnp.float32),
        "bn_mean": 0.1 * jax.random.normal(keys[4], (C,), jnp.float32),
        "bn_var": jax.random.uniform(keys[5], (C,), jnp.float32, 0.5, 1.5),
        # attention branch: 1x1 convs (bias=True, PyTorch default), gamma = 0.25
        "q_w": uinit(keys[6], (C8, C, 1, 1), C),
        "q_b": uinit(keys[7], (C8,), C),
        "k_w": uinit(keys[8], (C8, C, 1, 1), C),
        "k_b": uinit(keys[9], (C8,), C),
        "v_w": uinit(keys[10], (C, C, 1, 1), C),
        "v_b": uinit(keys[11], (C,), C),
        "gamma": jnp.array([0.25], jnp.float32),
    }

    out = seb_with_attn_pallas(feat, params)
    jax.block_until_ready(out)

    ref = seb_with_attn_ref(feat, params)
    assert out.shape == ref.shape == (N, C, H, W), (out.shape, ref.shape)
    max_err = float(jnp.max(jnp.abs(out - ref)))
    assert jnp.allclose(out, ref, atol=1e-3, rtol=1e-3), max_err

    print("KERNEL_OK")
</pallas_src>

<mosaic_0001>
module attributes {stable_mosaic.version = 11 : i64} {
  func.func @seb_attn_kernel(%arg0: i32, %arg1: memref<1x18x18x4xf32, #tpu.memory_space<vmem>>, %arg2: memref<36x32xf32, #tpu.memory_space<vmem>>, %arg3: memref<1x32xf32, #tpu.memory_space<vmem>>, %arg4: memref<1x32xf32, #tpu.memory_space<vmem>>, %arg5: memref<32x4xf32, #tpu.memory_space<vmem>>, %arg6: memref<1x4xf32, #tpu.memory_space<vmem>>, %arg7: memref<32x4xf32, #tpu.memory_space<vmem>>, %arg8: memref<1x4xf32, #tpu.memory_space<vmem>>, %arg9: memref<32x32xf32, #tpu.memory_space<vmem>>, %arg10: memref<1x32xf32, #tpu.memory_space<vmem>>, %arg11: memref<1xf32, #tpu.memory_space<smem>>, %arg12: memref<1x256x32xf32, #tpu.memory_space<vmem>>) attributes {dimension_semantics = [#tpu.dimension_semantics<parallel>], iteration_bounds = array<i64: 2>, scalar_prefetch = 0 : i64, scratch_operands = 0 : i64, tpu.core_type = #tpu.core_type<tc>, window_params = [{transform_indices = @transform_0, window_bounds = array<i64: 1, 18, 18, 4>}, {pipeline_mode = #tpu.pipeline_mode<synchronous>, transform_indices = @transform_1, window_bounds = array<i64: 36, 32>}, {pipeline_mode = #tpu.pipeline_mode<synchronous>, transform_indices = @transform_2, window_bounds = array<i64: 1, 32>}, {pipeline_mode = #tpu.pipeline_mode<synchronous>, transform_indices = @transform_3, window_bounds = array<i64: 1, 32>}, {pipeline_mode = #tpu.pipeline_mode<synchronous>, transform_indices = @transform_4, window_bounds = array<i64: 32, 4>}, {pipeline_mode = #tpu.pipeline_mode<synchronous>, transform_indices = @transform_5, window_bounds = array<i64: 1, 4>}, {pipeline_mode = #tpu.pipeline_mode<synchronous>, transform_indices = @transform_6, window_bounds = array<i64: 32, 4>}, {pipeline_mode = #tpu.pipeline_mode<synchronous>, transform_indices = @transform_7, window_bounds = array<i64: 1, 4>}, {pipeline_mode = #tpu.pipeline_mode<synchronous>, transform_indices = @transform_8, window_bounds = array<i64: 32, 32>}, {pipeline_mode = #tpu.pipeline_mode<synchronous>, transform_indices = @transform_9, window_bounds = array<i64: 1, 32>}, {transform_indices = @transform_10, window_bounds = array<i64: 1>}, {transform_indices = @transform_11, window_bounds = array<i64: 1, 256, 32>}]} {
    %c0 = arith.constant 0 : index
    %c0_0 = arith.constant 0 : index
    %c0_1 = arith.constant 0 : index
    %c0_2 = arith.constant 0 : index
    %0 = vector.load %arg1[%c0, %c0_0, %c0_1, %c0_2] : memref<1x18x18x4xf32, #tpu.memory_space<vmem>>, vector<1x18x18x4xf32>
    %1 = vector.shape_cast %0 : vector<1x18x18x4xf32> to vector<18x18x4xf32>
    %2 = vector.extract_strided_slice %1 {offsets = [0, 0, 0], sizes = [16, 16, 4], strides = [1, 1, 1]} : vector<18x18x4xf32> to vector<16x16x4xf32>
    %3 = vector.extract_strided_slice %1 {offsets = [0, 1, 0], sizes = [16, 16, 4], strides = [1, 1, 1]} : vector<18x18x4xf32> to vector<16x16x4xf32>
    %4 = vector.extract_strided_slice %1 {offsets = [0, 2, 0], sizes = [16, 16, 4], strides = [1, 1, 1]} : vector<18x18x4xf32> to vector<16x16x4xf32>
    %5 = vector.extract_strided_slice %1 {offsets = [1, 0, 0], sizes = [16, 16, 4], strides = [1, 1, 1]} : vector<18x18x4xf32> to vector<16x16x4xf32>
    %6 = vector.extract_strided_slice %1 {offsets = [1, 1, 0], sizes = [16, 16, 4], strides = [1, 1, 1]} : vector<18x18x4xf32> to vector<16x16x4xf32>
    %7 = vector.extract_strided_slice %1 {offsets = [1, 2, 0], sizes = [16, 16, 4], strides = [1, 1, 1]} : vector<18x18x4xf32> to vector<16x16x4xf32>
    %8 = vector.extract_strided_slice %1 {offsets = [2, 0, 0], sizes = [16, 16, 4], strides = [1, 1, 1]} : vector<18x18x4xf32> to vector<16x16x4xf32>
    %9 = vector.extract_strided_slice %1 {offsets = [2, 1, 0], sizes = [16, 16, 4], strides = [1, 1, 1]} : vector<18x18x4xf32> to vector<16x16x4xf32>
    %10 = vector.extract_strided_slice %1 {offsets = [2, 2, 0], sizes = [16, 16, 4], strides = [1, 1, 1]} : vector<18x18x4xf32> to vector<16x16x4xf32>
    %11 = tpu.concatenate %2, %3, %4, %5, %6, %7, %8, %9, %10 in 2 : vector<16x16x4xf32>, vector<16x16x4xf32>, vector<16x16x4xf32>, vector<16x16x4xf32>, vector<16x16x4xf32>, vector<16x16x4xf32>, vector<16x16x4xf32>, vector<16x16x4xf32>, vector<16x16x4xf32> -> vector<16x16x36xf32>
    %12 = vector.shape_cast %11 : vector<16x16x36xf32> to vector<256x36xf32>
    %c0_3 = arith.constant 0 : index
    %c0_4 = arith.constant 0 : index
    %13 = vector.load %arg2[%c0_3, %c0_4] : memref<36x32xf32, #tpu.memory_space<vmem>>, vector<36x32xf32>
    %cst = arith.constant dense<0.000000e+00> : vector<256x32xf32>
    %14 = tpu.matmul %12, %13, %cst {dimension_numbers = #tpu.dot_dimension_numbers<[1], [0], [0], [1], [0, 0, 1, 1], [], []>} : vector<256x36xf32>, vector<36x32xf32>, vector<256x32xf32> -> vector<256x32xf32>
    %c0_5 = arith.constant 0 : index
    %c0_6 = arith.constant 0 : index
    %15 = vector.load %arg3[%c0_5, %c0_6] : memref<1x32xf32, #tpu.memory_space<vmem>>, vector<1x32xf32>
    %16 = vector.broadcast %15 : vector<1x32xf32> to vector<256x32xf32>
    %17 = arith.mulf %14, %16 : vector<256x32xf32>
    %c0_7 = arith.constant 0 : index
    %c0_8 = arith.constant 0 : index
    %18 = vector.load %arg4[%c0_7, %c0_8] : memref<1x32xf32, #tpu.memory_space<vmem>>, vector<1x32xf32>
    %19 = vector.broadcast %18 : vector<1x32xf32> to vector<256x32xf32>
    %20 = arith.addf %17, %19 : vector<256x32xf32>
    %cst_9 = arith.constant 0.000000e+00 : f32
    %21 = vector.broadcast %cst_9 : f32 to vector<256x32xf32>
    %22 = arith.cmpf ogt, %20, %21 : vector<256x32xf32>
    %cst_10 = arith.constant 0.00999999977 : f32
    %23 = vector.broadcast %cst_10 : f32 to vector<256x32xf32>
    %24 = arith.mulf %23, %20 : vector<256x32xf32>
    %25 = arith.select %22, %20, %24 : vector<256x32xi1>, vector<256x32xf32>
    %c0_11 = arith.constant 0 : index
    %c0_12 = arith.constant 0 : index
    %26 = vector.load %arg5[%c0_11, %c0_12] : memref<32x4xf32, #tpu.memory_space<vmem>>, vector<32x4xf32>
    %cst_13 = arith.constant dense<0.000000e+00> : vector<256x4xf32>
    %27 = tpu.matmul %25, %26, %cst_13 {dimension_numbers = #tpu.dot_dimension_numbers<[1], [0], [0], [1], [0, 0, 1, 1], [], []>} : vector<256x32xf32>, vector<32x4xf32>, vector<256x4xf32> -> vector<256x4xf32>
    %c0_14 = arith.constant 0 : index
    %c0_15 = arith.constant 0 : index
    %28 = vector.load %arg6[%c0_14, %c0_15] : memref<1x4xf32, #tpu.memory_space<vmem>>, vector<1x4xf32>
    %29 = vector.broadcast %28 : vector<1x4xf32> to vector<256x4xf32>
    %30 = arith.addf %27, %29 : vector<256x4xf32>
    %c0_16 = arith.constant 0 : index
    %c0_17 = arith.constant 0 : index
    %31 = vector.load %arg7[%c0_16, %c0_17] : memref<32x4xf32, #tpu.memory_space<vmem>>, vector<32x4xf32>
    %cst_18 = arith.constant dense<0.000000e+00> : vector<256x4xf32>
    %32 = tpu.matmul %25, %31, %cst_18 {dimension_numbers = #tpu.dot_dimension_numbers<[1], [0], [0], [1], [0, 0, 1, 1], [], []>} : vector<256x32xf32>, vector<32x4xf32>, vector<256x4xf32> -> vector<256x4xf32>
    %c0_19 = arith.constant 0 : index
    %c0_20 = arith.constant 0 : index
    %33 = vector.load %arg8[%c0_19, %c0_20] : memref<1x4xf32, #tpu.memory_space<vmem>>, vector<1x4xf32>
    %34 = vector.broadcast %33 : vector<1x4xf32> to vector<256x4xf32>
    %35 = arith.addf %32, %34 : vector<256x4xf32>
    %c0_21 = arith.constant 0 : index
    %c0_22 = arith.constant 0 : index
    %36 = vector.load %arg9[%c0_21, %c0_22] : memref<32x32xf32, #tpu.memory_space<vmem>>, vector<32x32xf32>
    %cst_23 = arith.constant dense<0.000000e+00> : vector<256x32xf32>
    %37 = tpu.matmul %25, %36, %cst_23 {dimension_numbers = #tpu.dot_dimension_numbers<[1], [0], [0], [1], [0, 0, 1, 1], [], []>} : vector<256x32xf32>, vector<32x32xf32>, vector<256x32xf32> -> vector<256x32xf32>
    %c0_24 = arith.constant 0 : index
    %c0_25 = arith.constant 0 : index
    %38 = vector.load %arg10[%c0_24, %c0_25] : memref<1x32xf32, #tpu.memory_space<vmem>>, vector<1x32xf32>
    %39 = vector.broadcast %38 : vector<1x32xf32> to vector<256x32xf32>
    %40 = arith.addf %37, %39 : vector<256x32xf32>
    %41 = tpu.transpose %35, [1, 0] : vector<256x4xf32> -> vector<4x256xf32>
    %cst_26 = arith.constant dense<0.000000e+00> : vector<256x256xf32>
    %42 = tpu.matmul %30, %41, %cst_26 {dimension_numbers = #tpu.dot_dimension_numbers<[1], [0], [0], [1], [0, 0, 1, 1], [], []>} : vector<256x4xf32>, vector<4x256xf32>, vector<256x256xf32> -> vector<256x256xf32>
    %cst_27 = arith.constant dense<0xFF800000> : vector<256xf32>
    %43 = vector.multi_reduction <maximumf>, %42, %cst_27 [1] : vector<256x256xf32> to vector<256xf32>
    %44 = vector.shape_cast %43 : vector<256xf32> to vector<256x1xf32>
    %45 = vector.broadcast %44 : vector<256x1xf32> to vector<256x256xf32>
    %46 = arith.subf %42, %45 : vector<256x256xf32>
    %47 = math.exp %46 : vector<256x256xf32>
    %cst_28 = arith.constant dense<0.000000e+00> : vector<256xf32>
    %48 = vector.multi_reduction <add>, %47, %cst_28 [1] : vector<256x256xf32> to vector<256xf32>
    %49 = vector.shape_cast %48 : vector<256xf32> to vector<256x1xf32>
    %50 = tpu.reciprocal %49 : vector<256x1xf32> -> vector<256x1xf32>
    %51 = vector.broadcast %50 : vector<256x1xf32> to vector<256x256xf32>
    %52 = arith.mulf %47, %51 : vector<256x256xf32>
    %cst_29 = arith.constant dense<0.000000e+00> : vector<256x32xf32>
    %53 = tpu.matmul %52, %40, %cst_29 {dimension_numbers = #tpu.dot_dimension_numbers<[1], [0], [0], [1], [0, 0, 1, 1], [], []>} : vector<256x256xf32>, vector<256x32xf32>, vector<256x32xf32> -> vector<256x32xf32>
    %c0_30 = arith.constant 0 : index
    %54 = memref.load %arg11[%c0_30] : memref<1xf32, #tpu.memory_space<smem>>
    %55 = vector.broadcast %54 : f32 to vector<256x32xf32>
    %56 = arith.mulf %55, %53 : vector<256x32xf32>
    %57 = arith.addf %56, %25 : vector<256x32xf32>
    %58 = vector.shape_cast %57 : vector<256x32xf32> to vector<1x256x32xf32>
    %c0_31 = arith.constant 0 : index
    %c0_32 = arith.constant 0 : index
    %c0_33 = arith.constant 0 : index
    %59 = vector.load %arg12[%c0_31, %c0_32, %c0_33] : memref<1x256x32xf32, #tpu.memory_space<vmem>>, vector<1x256x32xf32>
    tpu.vector_store %arg12[%c0_31, %c0_32, %c0_33], %58 {strides = array<i32>} : memref<1x256x32xf32, #tpu.memory_space<vmem>>, vector<1x256x32xf32>,
    return
  }
  func.func @transform_0(%arg0: i32) -> (i32, i32, i32, i32) {
    %c0_i32 = arith.constant 0 : i32
    %c0_i32_0 = arith.constant 0 : i32
    %c0_i32_1 = arith.constant 0 : i32
    %c0_i32_2 = arith.constant 0 : i32
    return %arg0, %c0_i32, %c0_i32_0, %c0_i32_1 : i32, i32, i32, i32
  }
  func.func @transform_1(%arg0: i32) -> (i32, i32) {
    %c0_i32 = arith.constant 0 : i32
    %c0_i32_0 = arith.constant 0 : i32
    %c0_i32_1 = arith.constant 0 : i32
    return %c0_i32, %c0_i32_0 : i32, i32
  }
  func.func @transform_2(%arg0: i32) -> (i32, i32) {
    %c0_i32 = arith.constant 0 : i32
    %c0_i32_0 = arith.constant 0 : i32
    %c0_i32_1 = arith.constant 0 : i32
    return %c0_i32, %c0_i32_0 : i32, i32
  }
  func.func @transform_3(%arg0: i32) -> (i32, i32) {
    %c0_i32 = arith.constant 0 : i32
    %c0_i32_0 = arith.constant 0 : i32
    %c0_i32_1 = arith.constant 0 : i32
    return %c0_i32, %c0_i32_0 : i32, i32
  }
  func.func @transform_4(%arg0: i32) -> (i32, i32) {
    %c0_i32 = arith.constant 0 : i32
    %c0_i32_0 = arith.constant 0 : i32
    %c0_i32_1 = arith.constant 0 : i32
    return %c0_i32, %c0_i32_0 : i32, i32
  }
  func.func @transform_5(%arg0: i32) -> (i32, i32) {
    %c0_i32 = arith.constant 0 : i32
    %c0_i32_0 = arith.constant 0 : i32
    %c0_i32_1 = arith.constant 0 : i32
    return %c0_i32, %c0_i32_0 : i32, i32
  }
  func.func @transform_6(%arg0: i32) -> (i32, i32) {
    %c0_i32 = arith.constant 0 : i32
    %c0_i32_0 = arith.constant 0 : i32
    %c0_i32_1 = arith.constant 0 : i32
    return %c0_i32, %c0_i32_0 : i32, i32
  }
  func.func @transform_7(%arg0: i32) -> (i32, i32) {
    %c0_i32 = arith.constant 0 : i32
    %c0_i32_0 = arith.constant 0 : i32
    %c0_i32_1 = arith.constant 0 : i32
    return %c0_i32, %c0_i32_0 : i32, i32
  }
  func.func @transform_8(%arg0: i32) -> (i32, i32) {
    %c0_i32 = arith.constant 0 : i32
    %c0_i32_0 = arith.constant 0 : i32
    %c0_i32_1 = arith.constant 0 : i32
    return %c0_i32, %c0_i32_0 : i32, i32
  }
  func.func @transform_9(%arg0: i32) -> (i32, i32) {
    %c0_i32 = arith.constant 0 : i32
    %c0_i32_0 = arith.constant 0 : i32
    %c0_i32_1 = arith.constant 0 : i32
    return %c0_i32, %c0_i32_0 : i32, i32
  }
  func.func @transform_10(%arg0: i32) -> i32 {
    %c0_i32 = arith.constant 0 : i32
    %c0_i32_0 = arith.constant 0 : i32
    return %c0_i32 : i32
  }
  func.func @transform_11(%arg0: i32) -> (i32, i32, i32) {
    %c0_i32 = arith.constant 0 : i32
    %c0_i32_0 = arith.constant 0 : i32
    %c0_i32_1 = arith.constant 0 : i32
    return %arg0, %c0_i32, %c0_i32_0 : i32, i32, i32
  }
}

</mosaic_0001>

<bundles_post_ra>
// kernel: tpu_custom_call.1
= control target key start
LH: loop header
LB: loop body
LE: loop exit
PB: predicated region body
PF: predicated region fallthrough
CT: control target
= control target key end

     0   :  { %s5422_s19 = smov 0   ;;  %s8057_s0 = inlined_call_operand.vmem [shape: f32[2,18,18,4], index: 0, kind: input, shape index: {}]   ;;  %s8058_s1 = inlined_call_operand.vmem [shape: f32[36,32], index: 1, kind: input, shape index: {}]   ;;  %s8059_s2 = inlined_call_operand.vmem [shape: f32[1,32], index: 2, kind: input, shape index: {}]   ;;  %s8060_s3 = inlined_call_operand.vmem [shape: f32[1,32], index: 3, kind: input, shape index: {}]   ;;  %s8061_s4 = inlined_call_operand.vmem [shape: f32[32,4], index: 4, kind: input, shape index: {}]   ;;  %s8062_s5 = inlined_call_operand.vmem [shape: f32[1,4], index: 5, kind: input, shape index: {}]   ;;  %s8063_s6 = inlined_call_operand.vmem [shape: f32[32,4], index: 6, kind: input, shape index: {}]   ;;  %s8064_s7 = inlined_call_operand.vmem [shape: f32[1,4], index: 7, kind: input, shape index: {}]   ;;  %s8065_s8 = inlined_call_operand.vmem [shape: f32[32,32], index: 8, kind: input, shape index: {}]   ;;  %s8066_s9 = inlined_call_operand.vmem [shape: f32[1,32], index: 9, kind: input, shape index: {}]   ;;  %s8067_s10 = inlined_call_operand.<no memory space> [shape: f32[1], index: 10, kind: input, shape index: {}]   ;;  %s8068_s11 = inlined_call_operand.vmem [shape: f32[2,256,32], index: 11, kind: output, shape index: {}]  }
   0x1   :  { %16 = sst [smem:[#allocation2]] %s8067_s10 }
   0x2 LB: > { %s4326_s20 = sadd.s32 4294967295, %s5348_s19   ;;  %p4330_p0 = scmp.ge.s32.totalorder %s5348_s19, 1  ;;  %s5348_s19 = sphi %s5422_s19, %s22_s19  }
   0x3   : > { %p338_p1 = scmp.lt.s32.totalorder %s5348_s19, 3 }
   0x5   : > { %p339_p2 = pnand %p4330_p0, %p338_p1 }
   0x7   : > { %342 = sbr.rel (%p339_p2) target bundleno = 2057 (0x809), region = 64 }
   0xe   : > { %p378_p3 = scmp.lt.s32.totalorder %s4326_s20, 1  ;;  %vm667_vm0 = vcmask 1045504   ;;  %s5350_s24 = smov 12   ;;  %vm490_vm1 = vcmask 1046528   ;;  %v1710_v28 = vld [vmem:[%s8058_s1] sm:$0xff]  ;;  %v1711_v29 = vld [vmem:[%s8058_s1 + $0x8] sm:$0xff] }
   0xf   : > { %s5351_s25 = smov 8   ;;  %s5352_s26 = smov 4   ;;  %v5002_v30 = vpack.c.bf16 %v1711_v29, %v1710_v28  ;;  %v1712_v33 = vld [vmem:[%s8058_s1 + $0x10] sm:$0xff]  ;;  %v1713_v34 = vld [vmem:[%s8058_s1 + $0x18] sm:$0xff]  ;;  %v1714_v38 = vld [vmem:[%s8058_s1 + $0x20] sm:$0xf] }
  0x10   : > { %s8243_s20 = smov (!%p378_p3, %s4326_s20), 1  ;;  %s5353_s27 = smov 16   ;;  %v5006_v36 = vpack.c.bf16 %v1713_v34, %v1712_v33  ;;  %vm1812_vm2 = vcmask 1043456   ;;  %vm1446_vm3 = vcmask 31744   ;;  %vm1479_vm4 = vcmask 64512  }
  0x11   : > { %s5130_s10 = smul.u32 432, %s8243_s20  ;;  %s5354_s28 = smov 20   ;;  %5003 = vmatprep.subr.bf16.mxu0 %v5002_v30  ;;  %vm1512_vm5 = vcmask 97280   ;;  %vm1545_vm6 = vcmask 130048   ;;  %vm1578_vm7 = vcmask 162816   ;;  %vm1611_vm8 = vcmask 195584  }
  0x12   : > { %s5355_s14 = smov 24   ;;  %5005 = vmatpush3.bf16.msra.mxu0 %v5002_v30  ;;  %s5357_s29 = smov 32   ;;  %vm1644_vm9 = vcmask 228352   ;;  %vm1677_vm10 = vcmask 261120   ;;  %vm1715_vm11 = vcmask 293888  }
  0x13   : > { %s5436_s23 = scalar_lea.vmem %s8057_s0, %s5130_s10  ;;  %5007 = vmatprep.subr.bf16.mxu0 %v5006_v36  ;;  %s5356_s10 = smov 28  }
  0x14   : > { %v5439_v0 = vld [vmem:[%s5436_s23 + $0x20] sm:$0xff]  ;;  %v5442_v1 = vld [vmem:[%s5436_s23 + $0x18] sm:$0xff]  ;;  %v5452_v3 = vld [vmem:[%s5436_s23 + $0x8] sm:$0xff] }
  0x15   : > { %v5445_v2 = vld [vmem:[%s5436_s23] sm:$0xff]  ;;  %848 = vrot.lane.b32.xlu1 %v5439_v0, %s5350_s24  ;;  %846 = vrot.lane.b32.xlu0 %v5442_v1, %s5350_s24  ;;  %v390_v6 = vld [vmem:[%s5436_s23 + $0x10] sm:$0x3]  ;;  %v669_v7 = vrot.slane %v5452_v3, 2  ;;  %v492_v8 = vrot.slane %v5452_v3, 1  ;;  %v496_v15 = vrot.slane %v5442_v1, 1 }
  0x16   : > { %v668_v4 = vrot.slane %v5445_v2, 2  ;;  %v491_v5 = vrot.slane %v5445_v2, 1  ;;  %v671_v9 = vrot.slane %v390_v6, 2  ;;  %v494_v10 = vrot.slane %v390_v6, 1  ;;  %v393_v17 = vld [vmem:[%s5436_s23 + $0x28] sm:$0x3]  ;;  %5009 = vmatpush3.bf16.msra.mxu0 %v5006_v36 }
  0x17   : > { %v497_v16 = vrot.slane %v5439_v0, 1  ;;  %v673_v19 = vrot.slane %v5442_v1, 2  ;;  %v674_v20 = vrot.slane %v5439_v0, 2  ;;  %v499_v21 = vrot.slane %v393_v17, 1  ;;  %v5482_v25 = vld [vmem:[%s5436_s23 + $0x30] sm:$0xff]  ;;  %v5486_v27 = vld [vmem:[%s5436_s23 + $0x38] sm:$0xff]  ;;  %4784 = vmatprep.subr.msk.mxu0 %vm1812_vm2, %v1714_v38 }
  0x18   : > { %v670_v11 = vsel %vm667_vm0, %v668_v4, %v669_v7  ;;  %v493_v12 = vsel %vm490_vm1, %v491_v5, %v492_v8  ;;  %v672_v13 = vsel %vm667_vm0, %v669_v7, %v671_v9  ;;  %v495_v14 = vsel %vm490_vm1, %v492_v8, %v494_v10  ;;  %v396_v37 = vld [vmem:[%s5436_s23 + $0x40] sm:$0x3]  ;;  %v5533_v46 = vld [vmem:[%s5436_s23 + $0x48] sm:$0xff]  ;;  %v5536_v47 = vld [vmem:[%s5436_s23 + $0x50] sm:$0xff] }
  0x19   : > { %748 = vrot.lane.b32.xlu1 %v670_v11, %s5351_s25  ;;  %571 = vrot.lane.b32.xlu0 %v493_v12, %s5352_s26  ;;  %v498_v18 = vsel %vm490_vm1, %v496_v15, %v497_v16  ;;  %v675_v22 = vsel %vm667_vm0, %v673_v19, %v674_v20  ;;  %v500_v23 = vsel %vm490_vm1, %v497_v16, %v499_v21  ;;  %v676_v24 = vrot.slane %v393_v17, 2  ;;  %v399_v51 = vld [vmem:[%s5436_s23 + $0x58] sm:$0x3]  ;;  %v5568_v59 = vld [vmem:[%s5436_s23 + $0x60] sm:$0xff] }
  0x1a   : > { %v501_v31 = vrot.slane %v5482_v25, 1  ;;  %v502_v32 = vrot.slane %v5486_v27, 1  ;;  %v678_v39 = vrot.slane %v5482_v25, 2  ;;  %v679_v40 = vrot.slane %v5486_v27, 2  ;;  %4785 = vmatpush3.msk.msra.mxu0 %vm1812_vm2, %v1714_v38  ;;  %v5571_v60 = vld [vmem:[%s5436_s23 + $0x68] sm:$0xff]  ;;  %v5608_v17 = vld [vmem:[%s5436_s23 + $0x80] sm:$0xff] }
  0x1b   : > { %v677_v26 = vsel %vm667_vm0, %v674_v20, %v676_v24  ;;  %v504_v41 = vrot.slane %v396_v37, 1  ;;  %v681_v44 = vrot.slane %v396_v37, 2  ;;  %v506_v48 = vrot.slane %v5533_v46, 1  ;;  %v402_v4 = vld [vmem:[%s5436_s23 + $0x70] sm:$0x3] }
  0x1c   : > { %v503_v35 = vsel %vm490_vm1, %v501_v31, %v502_v32  ;;  %v680_v42 = vsel %vm667_vm0, %v678_v39, %v679_v40  ;;  %v507_v49 = vrot.slane %v5536_v47, 1  ;;  %v683_v52 = vrot.slane %v5533_v46, 2 }
  0x1d   : > { %750 = vrot.lane.b32.xlu1 %v672_v13, %s5351_s25  ;;  %573 = vrot.lane.b32.xlu0 %v495_v14, %s5352_s26  ;;  %v505_v43 = vsel %vm490_vm1, %v502_v32, %v504_v41  ;;  %v682_v45 = vsel %vm667_vm0, %v679_v40, %v681_v44  ;;  %v684_v53 = vrot.slane %v5536_v47, 2  ;;  %v509_v54 = vrot.slane %v399_v51, 1  ;;  %v5605_v14 = vld [vmem:[%s5436_s23 + $0x78] sm:$0xff] }
  0x1e   : > { %v508_v50 = vsel %vm490_vm1, %v506_v48, %v507_v49  ;;  %v686_v57 = vrot.slane %v399_v51, 2  ;;  %v511_v61 = vrot.slane %v5568_v59, 1  ;;  %v512_v62 = vrot.slane %v5571_v60, 1 }
  0x1f   : > { %v685_v55 = vsel %vm667_vm0, %v683_v52, %v684_v53  ;;  %v510_v56 = vsel %vm490_vm1, %v507_v49, %v509_v54  ;;  %v688_v5 = vrot.slane %v5568_v59, 2  ;;  %v689_v6 = vrot.slane %v5571_v60, 2  ;;  %v5655_v49 = vld [vmem:[%s5436_s23 + $0x90] sm:$0xff]  ;;  %v5663_v52 = vld [vmem:[%s5436_s23 + $0x98] sm:$0xff] }
  0x20   : > { %v687_v58 = vsel %vm667_vm0, %v684_v53, %v686_v57  ;;  %v513_v63 = vsel %vm490_vm1, %v511_v61, %v512_v62  ;;  %v514_v7 = vrot.slane %v402_v4, 1  ;;  %v691_v10 = vrot.slane %v402_v4, 2 }
  0x21   : > { %575 = vrot.lane.b32.xlu1 %v498_v18, %s5352_s26  ;;  %948 = vrot.lane.b32.xlu0 %v498_v18, %s5353_s27  ;;  %v690_v8 = vsel %vm667_vm0, %v688_v5, %v689_v6  ;;  %v516_v18 = vrot.slane %v5605_v14, 1  ;;  %v517_v19 = vrot.slane %v5608_v17, 1  ;;  %v693_v28 = vrot.slane %v5605_v14, 2 }
  0x22   : > { %v515_v9 = vsel %vm490_vm1, %v512_v62, %v514_v7  ;;  %v692_v11 = vsel %vm667_vm0, %v689_v6, %v691_v10  ;;  %v694_v29 = vrot.slane %v5608_v17, 2  ;;  %v521_v57 = vrot.slane %v5655_v49, 1 }
  0x24   : > { %v695_v33 = vsel %vm667_vm0, %v693_v28, %v694_v29 }
  0x25   : > { %1049 = vrot.lane.b32.xlu1 %v675_v22, %s5354_s28  ;;  %950 = vrot.lane.b32.xlu0 %v500_v23, %s5353_s27 }
  0x29   : > { %752 = vrot.lane.b32.xlu1 %v675_v22, %s5351_s25  ;;  %577 = vrot.lane.b32.xlu0 %v500_v23, %s5352_s26  ;;  %v518_v22 = vsel %vm490_vm1, %v516_v18, %v517_v19 }
  0x2d   : > { %1147 = vrot.lane.b32.xlu1 %v5482_v25, %s5355_s14  ;;  %1051 = vrot.lane.b32.xlu0 %v677_v26, %s5354_s28 }
  0x31   : > { %850 = vrot.lane.b32.xlu1 %v5482_v25, %s5350_s24  ;;  %754 = vrot.lane.b32.xlu0 %v677_v26, %s5351_s25  ;;  %v405_v26 = vld [vmem:[%s5436_s23 + $0x88] sm:$0x3] }
  0x32   : > { %v519_v30 = vrot.slane %v405_v26, 1  ;;  %v696_v37 = vrot.slane %v405_v26, 2 }
  0x34   : > { %v520_v34 = vsel %vm490_vm1, %v517_v19, %v519_v30  ;;  %v697_v40 = vsel %vm667_vm0, %v694_v29, %v696_v37 }
  0x35   : > { %1249 = vrot.lane.b32.xlu1 %v503_v35, %s5356_s10  ;;  %1149 = vrot.lane.b32.xlu0 %v5486_v27, %s5355_s14 }
  0x39   : > { %952 = vrot.lane.b32.xlu1 %v503_v35, %s5353_s27  ;;  %852 = vrot.lane.b32.xlu0 %v5486_v27, %s5350_s24 }
  0x3d   : > { %1350 = vrot.lane.b32.xlu1 %v680_v42, %s5357_s29  ;;  %1251 = vrot.lane.b32.xlu0 %v505_v43, %s5356_s10 }
  0x41   : > { %954 = vrot.lane.b32.xlu1 %v505_v43, %s5353_s27  ;;  %579 = vrot.lane.b32.xlu0 %v503_v35, %s5352_s26 }
  0x45   : > { %1352 = vrot.lane.b32.xlu1 %v682_v45, %s5357_s29  ;;  %1053 = vrot.lane.b32.xlu0 %v680_v42, %s5354_s28 }
  0x49   : > { %756 = vrot.lane.b32.xlu1 %v680_v42, %s5351_s25  ;;  %581 = vrot.lane.b32.xlu0 %v505_v43, %s5352_s26 }
  0x4d   : > { %1151 = vrot.lane.b32.xlu1 %v5533_v46, %s5355_s14  ;;  %1055 = vrot.lane.b32.xlu0 %v682_v45, %s5354_s28 }
  0x51   : > { %854 = vrot.lane.b32.xlu1 %v5533_v46, %s5350_s24  ;;  %758 = vrot.lane.b32.xlu0 %v682_v45, %s5351_s25 }
  0x55   : > { %1253 = vrot.lane.b32.xlu1 %v508_v50, %s5356_s10  ;;  %1153 = vrot.lane.b32.xlu0 %v5536_v47, %s5355_s14 }
  0x59   : > { %956 = vrot.lane.b32.xlu1 %v508_v50, %s5353_s27  ;;  %856 = vrot.lane.b32.xlu0 %v5536_v47, %s5350_s24 }
  0x5d   : > { %1354 = vrot.lane.b32.xlu1 %v685_v55, %s5357_s29  ;;  %1255 = vrot.lane.b32.xlu0 %v510_v56, %s5356_s10 }
  0x61   : > { %958 = vrot.lane.b32.xlu1 %v510_v56, %s5353_s27  ;;  %583 = vrot.lane.b32.xlu0 %v508_v50, %s5352_s26 }
  0x65   : > { %1356 = vrot.lane.b32.xlu1 %v687_v58, %s5357_s29  ;;  %1057 = vrot.lane.b32.xlu0 %v685_v55, %s5354_s28 }
  0x69   : > { %760 = vrot.lane.b32.xlu1 %v685_v55, %s5351_s25  ;;  %585 = vrot.lane.b32.xlu0 %v510_v56, %s5352_s26 }
  0x6d   : > { %1155 = vrot.lane.b32.xlu1 %v5568_v59, %s5355_s14  ;;  %1059 = vrot.lane.b32.xlu0 %v687_v58, %s5354_s28 }
  0x71   : > { %858 = vrot.lane.b32.xlu1 %v5568_v59, %s5350_s24  ;;  %762 = vrot.lane.b32.xlu0 %v687_v58, %s5351_s25  ;;  %v522_v58 = vrot.slane %v5663_v52, 1 }
  0x73   : > { %v523_v5 = vsel %vm490_vm1, %v521_v57, %v522_v58 }
  0x75   : > { %1257 = vrot.lane.b32.xlu1 %v513_v63, %s5356_s10  ;;  %1157 = vrot.lane.b32.xlu0 %v5571_v60, %s5355_s14 }
  0x79   : > { %960 = vrot.lane.b32.xlu1 %v513_v63, %s5353_s27  ;;  %860 = vrot.lane.b32.xlu0 %v5571_v60, %s5350_s24 }
  0x7d   : > { %1358 = vrot.lane.b32.xlu1 %v690_v8, %s5357_s29  ;;  %1259 = vrot.lane.b32.xlu0 %v515_v9, %s5356_s10 }
  0x81   : > { %962 = vrot.lane.b32.xlu1 %v515_v9, %s5353_s27  ;;  %587 = vrot.lane.b32.xlu0 %v513_v63, %s5352_s26 }
  0x85   : > { %1360 = vrot.lane.b32.xlu1 %v692_v11, %s5357_s29  ;;  %1061 = vrot.lane.b32.xlu0 %v690_v8, %s5354_s28 }
  0x87   : > { %v5600_v12 = vpop.permute.xlu1 %848  ;;  %v847_v13 = vpop.permute.xlu0 %846 }
  0x89   : > { %764 = vrot.lane.b32.xlu1 %v690_v8, %s5351_s25  ;;  %589 = vrot.lane.b32.xlu0 %v515_v9, %s5352_s26  ;;  %v408_v9 = vld [vmem:[%s5436_s23 + $0xa0] sm:$0x3] }
  0x8a   : > { %v701_v29 = vrot.slane %v408_v9, 2 }
  0x8b   : > { %v749_v15 = vpop.permute.xlu1 %748  ;;  %v572_v16 = vpop.permute.xlu0 %571 }
  0x8c   : > { %v1447_v43 = vsel %vm1446_vm3, %v5445_v2, %v572_v16  ;;  %v524_v16 = vrot.slane %v408_v9, 1 }
  0x8d   : > { %1159 = vrot.lane.b32.xlu1 %v5605_v14, %s5355_s14  ;;  %1063 = vrot.lane.b32.xlu0 %v692_v11, %s5354_s28  ;;  %v1480_v48 = vsel %vm1479_vm4, %v1447_v43, %v749_v15  ;;  %v698_v15 = vrot.slane %v5655_v49, 2  ;;  %v5730_v43 = vld [vmem:[%s5436_s23 + $0xa8] sm:$0xff] }
  0x8e   : > { %v1513_v2 = vsel %vm1512_vm5, %v1480_v48, %v847_v13 }
  0x8f   : > { %v5615_v20 = vpop.permute.xlu1 %750  ;;  %v574_v21 = vpop.permute.xlu0 %573 }
  0x90   : > { %v1448_v54 = vsel %vm1446_vm3, %v5452_v3, %v574_v21 }
  0x91   : > { %862 = vrot.lane.b32.xlu1 %v5605_v14, %s5350_s24  ;;  %766 = vrot.lane.b32.xlu0 %v692_v11, %s5351_s25  ;;  %v1481_v3 = vsel %vm1479_vm4, %v1448_v54, %v5615_v20 }
  0x92   : > { %v1514_v6 = vsel %vm1512_vm5, %v1481_v3, %v5600_v12  ;;  %v699_v12 = vrot.slane %v5663_v52, 2 }
  0x93   : > { %v5621_v23 = vpop.permute.xlu1 %575  ;;  %v949_v24 = vpop.permute.xlu0 %948 }
  0x94   : > { %v1546_v53 = vsel %vm1545_vm6, %v1513_v2, %v949_v24  ;;  %v525_v24 = vsel %vm490_vm1, %v522_v58, %v524_v16  ;;  %v5739_v2 = vld [vmem:[%s5436_s23 + $0xb0] sm:$0xff] }
  0x95   : > { %1261 = vrot.lane.b32.xlu1 %v518_v22, %s5356_s10  ;;  %1161 = vrot.lane.b32.xlu0 %v5608_v17, %s5355_s14 }
  0x97   : > { %v1050_v31 = vpop.permute.xlu1 %1049  ;;  %v951_v32 = vpop.permute.xlu0 %950 }
  0x98   : > { %v1579_v55 = vsel %vm1578_vm7, %v1546_v53, %v1050_v31  ;;  %v1547_v10 = vsel %vm1545_vm6, %v1514_v6, %v951_v32  ;;  %v702_v32 = vsel %vm667_vm0, %v699_v12, %v701_v29  ;;  %v527_v53 = vrot.slane %v5739_v2, 1 }
  0x99   : > { %964 = vrot.lane.b32.xlu1 %v518_v22, %s5353_s27  ;;  %864 = vrot.lane.b32.xlu0 %v5608_v17, %s5350_s24 }
  0x9b   : > { %v5634_v35 = vpop.permute.xlu1 %752  ;;  %v5636_v36 = vpop.permute.xlu0 %577 }
  0x9c   : > { %v1450_v57 = vsel %vm1446_vm3, %v5439_v0, %v5636_v36  ;;  %v411_v0 = vld [vmem:[%s5436_s23 + $0xb8] sm:$0x3] }
  0x9d   : > { %1362 = vrot.lane.b32.xlu1 %v695_v33, %s5357_s29  ;;  %1263 = vrot.lane.b32.xlu0 %v520_v34, %s5356_s10  ;;  %v529_v6 = vrot.slane %v411_v0, 1 }
  0x9f   : > { %v1148_v38 = vpop.permute.xlu1 %1147  ;;  %v1052_v39 = vpop.permute.xlu0 %1051 }
  0xa0   : > { %v1612_v56 = vsel %vm1611_vm8, %v1579_v55, %v1148_v38  ;;  %v1580_v11 = vsel %vm1578_vm7, %v1547_v10, %v1052_v39  ;;  %v1449_v39 = vsel %vm1446_vm3, %v5442_v1, %v5621_v23 }
  0xa1   : > { %966 = vrot.lane.b32.xlu1 %v520_v34, %s5353_s27  ;;  %591 = vrot.lane.b32.xlu0 %v518_v22, %s5352_s26  ;;  %v700_v22 = vsel %vm667_vm0, %v698_v15, %v699_v12  ;;  %v530_v15 = vsel %vm490_vm1, %v527_v53, %v529_v6 }
  0xa3   : > { %v5643_v41 = vpop.permute.xlu1 %850  ;;  %v5645_v42 = vpop.permute.xlu0 %754 }
  0xa4   : > { %v1483_v58 = vsel %vm1479_vm4, %v1450_v57, %v5645_v42 }
  0xa5   : > { %1364 = vrot.lane.b32.xlu1 %v697_v40, %s5357_s29  ;;  %1065 = vrot.lane.b32.xlu0 %v695_v33, %s5354_s28 }
  0xa7   : > { %v1250_v44 = vpop.permute.xlu1 %1249  ;;  %v1150_v45 = vpop.permute.xlu0 %1149 }
  0xa8   : > { %v1645_v61 = vsel %vm1644_vm9, %v1612_v56, %v1250_v44  ;;  %v1613_v13 = vsel %vm1611_vm8, %v1580_v11, %v1150_v45 }
  0xa9   : > { %768 = vrot.lane.b32.xlu1 %v695_v33, %s5351_s25  ;;  %593 = vrot.lane.b32.xlu0 %v520_v34, %s5352_s26 }
  0xab   : > { %v5658_v50 = vpop.permute.xlu1 %952  ;;  %v5660_v51 = vpop.permute.xlu0 %852 }
  0xad   : > { %1163 = vrot.lane.b32.xlu1 %v5655_v49, %s5355_s14  ;;  %1067 = vrot.lane.b32.xlu0 %v697_v40, %s5354_s28 }
  0xaf   : > { %v1351_v62 = vpop.permute.xlu1 %1350  ;;  %v1252_v63 = vpop.permute.xlu0 %1251 }
  0xb0   : > { %v1678_v4 = vsel %vm1677_vm10, %v1645_v61, %v1351_v62  ;;  %v1646_v18 = vsel %vm1644_vm9, %v1613_v13, %v1252_v63  ;;  %v1516_v62 = vsel %vm1512_vm5, %v1483_v58, %v5660_v51  ;;  %v704_v51 = vrot.slane %v5739_v2, 2 }
  0xb1   : > { %866 = vrot.lane.b32.xlu1 %v5655_v49, %s5350_s24  ;;  %770 = vrot.lane.b32.xlu0 %v697_v40, %s5351_s25  ;;  %v1482_v40 = vsel %vm1479_vm4, %v1449_v39, %v5634_v35 }
  0xb2   : > { %4786 = vmatprep.mubr.msk.f32.mxu0 %vm1715_vm11, %v1678_v4  ;;  %v1515_v44 = vsel %vm1512_vm5, %v1482_v40, %v5643_v41  ;;  %v526_v41 = vrot.slane %v5730_v43, 1 }
  0xb3   : > { %v5686_v7 = vpop.permute.xlu1 %954  ;;  %v5688_v8 = vpop.permute.xlu0 %579  ;;  %v1548_v1 = vsel %vm1545_vm6, %v1515_v44, %v5658_v50  ;;  %v5818_v44 = vld [vmem:[%s5436_s23 + $0xc8] sm:$0xff] }
  0xb4   : > { %v528_v61 = vsel %vm490_vm1, %v526_v41, %v527_v53  ;;  %v1549_v36 = vsel %vm1545_vm6, %v1516_v62, %v5686_v7 }
  0xb5   : > { %1265 = vrot.lane.b32.xlu1 %v523_v5, %s5356_s10  ;;  %1165 = vrot.lane.b32.xlu0 %v5663_v52, %s5355_s14 }
  0xb7   : > { %v1353_v19 = vpop.permute.xlu1 %1352  ;;  %v1054_v20 = vpop.permute.xlu0 %1053 }
  0xb8   : > { %v1679_v21 = vsel %vm1677_vm10, %v1646_v18, %v1353_v19  ;;  %v1581_v23 = vsel %vm1578_vm7, %v1548_v1, %v1054_v20  ;;  %v706_v18 = vrot.slane %v411_v0, 2  ;;  %v532_v1 = vrot.slane %v5818_v44, 1 }
  0xb9   : > { %968 = vrot.lane.b32.xlu1 %v523_v5, %s5353_s27  ;;  %868 = vrot.lane.b32.xlu0 %v5663_v52, %s5350_s24 }
  0xba   : > { %4787 = vmatmul.mubr.msk.f32.vlgmr.msra.gmra.mrb[0].mxu0 %vm1715_vm11, %v1679_v21  ;;  %v707_v21 = vsel %vm667_vm0, %v704_v51, %v706_v18 }
  0xbb   : > { %v5707_v26 = vpop.permute.xlu1 %756  ;;  %v5709_v28 = vpop.permute.xlu0 %581 }
  0xbc   : > { %v1452_v53 = vsel %vm1446_vm3, %v5486_v27, %v5709_v28  ;;  %v414_v27 = vld [vmem:[%s5436_s23 + $0xd0] sm:$0x3] }
  0xbd   : > { %1366 = vrot.lane.b32.xlu1 %v700_v22, %s5357_s29  ;;  %1267 = vrot.lane.b32.xlu0 %v525_v24, %s5356_s10  ;;  %v534_v62 = vrot.slane %v414_v27, 1 }
  0xbf   : > { %v1152_v30 = vpop.permute.xlu1 %1151  ;;  %v1056_v31 = vpop.permute.xlu0 %1055 }
  0xc0   : > { %v1614_v35 = vsel %vm1611_vm8, %v1581_v23, %v1152_v30  ;;  %v1582_v4 = vsel %vm1578_vm7, %v1549_v36, %v1056_v31  ;;  %v1451_v31 = vsel %vm1446_vm3, %v5482_v25, %v5688_v8 }
  0xc1   : > { %970 = vrot.lane.b32.xlu1 %v525_v24, %s5353_s27  ;;  %595 = vrot.lane.b32.xlu0 %v523_v5, %s5352_s26  ;;  %v703_v5 = vrot.slane %v5730_v43, 2 }
  0xc3   : > { %v5716_v33 = vpop.permute.xlu1 %854  ;;  %v5718_v34 = vpop.permute.xlu0 %758  ;;  %v705_v13 = vsel %vm667_vm0, %v703_v5, %v704_v51  ;;  %v535_v5 = vsel %vm490_vm1, %v532_v1, %v534_v62 }
  0xc5   : > { %1368 = vrot.lane.b32.xlu1 %v702_v32, %s5357_s29  ;;  %1069 = vrot.lane.b32.xlu0 %v700_v22, %s5354_s28 }
  0xc7   : > { %v1254_v37 = vpop.permute.xlu1 %1253  ;;  %v1154_v38 = vpop.permute.xlu0 %1153 }
  0xc8   : > { %v1647_v54 = vsel %vm1644_vm9, %v1614_v35, %v1254_v37  ;;  %v1615_v42 = vsel %vm1611_vm8, %v1582_v4, %v1154_v38  ;;  %v5809_v37 = vld [vmem:[%s5436_s23 + $0xc0] sm:$0xff] }
  0xc9   : > { %772 = vrot.lane.b32.xlu1 %v700_v22, %s5351_s25  ;;  %597 = vrot.lane.b32.xlu0 %v525_v24, %s5352_s26 }
  0xcb   : > { %v5734_v45 = vpop.permute.xlu1 %956  ;;  %v5736_v48 = vpop.permute.xlu0 %856 }
  0xcd   : > { %1167 = vrot.lane.b32.xlu1 %v5730_v43, %s5355_s14  ;;  %1071 = vrot.lane.b32.xlu0 %v702_v32, %s5354_s28 }
  0xcf   : > { %v1355_v55 = vpop.permute.xlu1 %1354  ;;  %v1256_v56 = vpop.permute.xlu0 %1255 }
  0xd0   : > { %v1680_v50 = vsel %vm1677_vm10, %v1647_v54, %v1355_v55  ;;  %v1648_v9 = vsel %vm1644_vm9, %v1615_v42, %v1256_v56  ;;  %v1485_v54 = vsel %vm1479_vm4, %v1452_v53, %v5718_v34 }
  0xd1   : > { %870 = vrot.lane.b32.xlu1 %v5730_v43, %s5350_s24  ;;  %774 = vrot.lane.b32.xlu0 %v702_v32, %s5351_s25  ;;  %v1484_v32 = vsel %vm1479_vm4, %v1451_v31, %v5707_v26  ;;  %v1518_v56 = vsel %vm1512_vm5, %v1485_v54, %v5736_v48  ;;  %v709_v48 = vrot.slane %v5818_v44, 2 }
  0xd2   : > { %4789 = vmatprep.mubr.msk.f32.mxu0 %vm1715_vm11, %v1680_v50  ;;  %v1517_v38 = vsel %vm1512_vm5, %v1484_v32, %v5716_v33  ;;  %v531_v33 = vrot.slane %v5809_v37, 1 }
  0xd3   : > { %v5764_v63 = vpop.permute.xlu1 %958  ;;  %v5766_v3 = vpop.permute.xlu0 %583  ;;  %v1550_v25 = vsel %vm1545_vm6, %v1517_v38, %v5734_v45  ;;  %v5897_v38 = vld [vmem:[%s5436_s23 + $0xe0] sm:$0xff] }
  0xd4   : > { %v533_v55 = vsel %vm490_vm1, %v531_v33, %v532_v1  ;;  %v1551_v28 = vsel %vm1545_vm6, %v1518_v56, %v5764_v63 }
  0xd5   : > { %1269 = vrot.lane.b32.xlu1 %v528_v61, %s5356_s10  ;;  %1169 = vrot.lane.b32.xlu0 %v5739_v2, %s5355_s14 }
  0xd7   : > { %v1357_v10 = vpop.permute.xlu1 %1356  ;;  %v1058_v11 = vpop.permute.xlu0 %1057 }
  0xd8   : > { %v1681_v7 = vsel %vm1677_vm10, %v1648_v9, %v1357_v10  ;;  %v1583_v8 = vsel %vm1578_vm7, %v1550_v25, %v1058_v11  ;;  %v711_v9 = vrot.slane %v414_v27, 2 }
  0xd9   : > { %972 = vrot.lane.b32.xlu1 %v528_v61, %s5353_s27  ;;  %872 = vrot.lane.b32.xlu0 %v5739_v2, %s5350_s24 }
  0xda   : > { %4790 = vmatmul.mubr.msk.f32.gmra.mrb[2].mxu0 %vm1715_vm11, %v1681_v7  ;;  %v712_v7 = vsel %vm667_vm0, %v709_v48, %v711_v9 }
  0xdb   : > { %v5786_v12 = vpop.permute.xlu1 %760  ;;  %v5788_v16 = vpop.permute.xlu0 %585 }
  0xdc   : > { %v1454_v53 = vsel %vm1446_vm3, %v5536_v47, %v5788_v16  ;;  %v417_v47 = vld [vmem:[%s5436_s23 + $0xe8] sm:$0x3] }
  0xdd   : > { %1370 = vrot.lane.b32.xlu1 %v705_v13, %s5357_s29  ;;  %1271 = vrot.lane.b32.xlu0 %v530_v15, %s5356_s10  ;;  %v716_v9 = vrot.slane %v417_v47, 2 }
  0xdf   : > { %v1156_v19 = vpop.permute.xlu1 %1155  ;;  %v1060_v20 = vpop.permute.xlu0 %1059 }
  0xe0   : > { %v1616_v26 = vsel %vm1611_vm8, %v1583_v8, %v1156_v19  ;;  %v1584_v58 = vsel %vm1578_vm7, %v1551_v28, %v1060_v20  ;;  %v1453_v20 = vsel %vm1446_vm3, %v5533_v46, %v5766_v3  ;;  %v2215_v3 = vld [vmem:[%s8061_s4] sm:$0xff] }
  0xe1   : > { %974 = vrot.lane.b32.xlu1 %v530_v15, %s5353_s27  ;;  %599 = vrot.lane.b32.xlu0 %v528_v61, %s5352_s26  ;;  %v708_v61 = vrot.slane %v5809_v37, 2 }
  0xe3   : > { %v5795_v22 = vpop.permute.xlu1 %858  ;;  %v5797_v24 = vpop.permute.xlu0 %762  ;;  %v710_v42 = vsel %vm667_vm0, %v708_v61, %v709_v48  ;;  %v714_v61 = vrot.slane %v5897_v38, 2  ;;  %v539_v48 = vrot.slane %v417_v47, 1 }
  0xe5   : > { %1372 = vrot.lane.b32.xlu1 %v707_v21, %s5357_s29  ;;  %1073 = vrot.lane.b32.xlu0 %v705_v13, %s5354_s28 }
  0xe7   : > { %v1258_v29 = vpop.permute.xlu1 %1257  ;;  %v1158_v30 = vpop.permute.xlu0 %1157 }
  0xe8   : > { %v1649_v23 = vsel %vm1644_vm9, %v1616_v26, %v1258_v29  ;;  %v1617_v34 = vsel %vm1611_vm8, %v1584_v58, %v1158_v30  ;;  %v5888_v29 = vld [vmem:[%s5436_s23 + $0xd8] sm:$0xff]  ;;  %v537_v26 = vrot.slane %v5897_v38, 1 }
  0xe9   : > { %776 = vrot.lane.b32.xlu1 %v705_v13, %s5351_s25  ;;  %601 = vrot.lane.b32.xlu0 %v530_v15, %s5352_s26 }
  0xeb   : > { %v5813_v39 = vpop.permute.xlu1 %960  ;;  %v5815_v40 = vpop.permute.xlu0 %860 }
  0xed   : > { %1171 = vrot.lane.b32.xlu1 %v5809_v37, %s5355_s14  ;;  %1075 = vrot.lane.b32.xlu0 %v707_v21, %s5354_s28 }
  0xef   : > { %v1359_v35 = vpop.permute.xlu1 %1358  ;;  %v1260_v41 = vpop.permute.xlu0 %1259 }
  0xf0   : > { %v1682_v45 = vsel %vm1677_vm10, %v1649_v23, %v1359_v35  ;;  %v1650_v0 = vsel %vm1644_vm9, %v1617_v34, %v1260_v41  ;;  %v2217_v41 = vld [vmem:[%s8061_s4 + $0x10] sm:$0xff] }
  0xf1   : > { %874 = vrot.lane.b32.xlu1 %v5809_v37, %s5350_s24  ;;  %778 = vrot.lane.b32.xlu0 %v707_v21, %s5351_s25  ;;  %v1486_v21 = vsel %vm1479_vm4, %v1453_v20, %v5786_v12  ;;  %v2216_v12 = vld [vmem:[%s8061_s4 + $0x8] sm:$0xff] }
  0xf2   : > { %4792 = vmatprep.mubr.msk.f32.mxu0 %vm1715_vm11, %v1682_v45  ;;  %v1519_v30 = vsel %vm1512_vm5, %v1486_v21, %v5795_v22  ;;  %v5010_v22 = vpack.c.bf16 %v2216_v12, %v2215_v3  ;;  %v2218_v45 = vld [vmem:[%s8061_s4 + $0x18] sm:$0xff]  ;;  %v5979_v3 = vld [vmem:[%s5436_s23 + $0xf0] sm:$0xff] }
  0xf3   : > { %v5843_v50 = vpop.permute.xlu1 %962  ;;  %v5845_v57 = vpop.permute.xlu0 %587  ;;  %v1552_v46 = vsel %vm1545_vm6, %v1519_v30, %v5813_v39  ;;  %v536_v39 = vrot.slane %v5888_v29, 1  ;;  %v5014_v54 = vpack.c.bf16 %v2218_v45, %v2217_v41 }
  0xf4   : > { %5011 = vmatprep.subr.bf16.mxu1 %v5010_v22  ;;  %v1455_v30 = vsel %vm1446_vm3, %v5568_v59, %v5845_v57 }
  0xf5   : > { %1273 = vrot.lane.b32.xlu1 %v533_v55, %s5356_s10  ;;  %1173 = vrot.lane.b32.xlu0 %v5818_v44, %s5355_s14  ;;  %v538_v56 = vsel %vm490_vm1, %v536_v39, %v537_v26 }
  0xf6   : > { %5013 = vmatpush3.bf16.msra.mxu1 %v5010_v22 }
  0xf7   : > { %v1361_v36 = vpop.permute.xlu1 %1360  ;;  %v1062_v4 = vpop.permute.xlu0 %1061  ;;  %5015 = vmatprep.subr.bf16.mxu1 %v5014_v54 }
  0xf8   : > { %v1683_v63 = vsel %vm1677_vm10, %v1650_v0, %v1361_v36  ;;  %v1585_v25 = vsel %vm1578_vm7, %v1552_v46, %v1062_v4 }
  0xf9   : > { %976 = vrot.lane.b32.xlu1 %v533_v55, %s5353_s27  ;;  %876 = vrot.lane.b32.xlu0 %v5818_v44, %s5350_s24 }
  0xfa   : > { %4793 = vmatmul.mubr.msk.f32.gmra.mrb[4].mxu0 %vm1715_vm11, %v1683_v63  ;;  %5017 = vmatpush3.bf16.msra.mxu1 %v5014_v54  ;;  %v540_v63 = vsel %vm490_vm1, %v537_v26, %v539_v48 }
  0xfb   : > { %v5865_v51 = vpop.permute.xlu1 %764  ;;  %v5867_v6 = vpop.permute.xlu0 %589 }
  0xfc   : > { %v1488_v46 = vsel %vm1479_vm4, %v1455_v30, %v5865_v51 }
  0xfd   : > { %1374 = vrot.lane.b32.xlu1 %v710_v42, %s5357_s29  ;;  %1275 = vrot.lane.b32.xlu0 %v535_v5, %s5356_s10 }
  0xff   : > { %v1160_v10 = vpop.permute.xlu1 %1159  ;;  %v1064_v11 = vpop.permute.xlu0 %1063 }
 0x100   : > { %v1618_v8 = vsel %vm1611_vm8, %v1585_v25, %v1160_v10 }
 0x101   : > { %978 = vrot.lane.b32.xlu1 %v535_v5, %s5353_s27  ;;  %603 = vrot.lane.b32.xlu0 %v533_v55, %s5352_s26  ;;  %v1487_v55 = vsel %vm1479_vm4, %v1454_v53, %v5797_v24 }
 0x102   : > { %v1520_v27 = vsel %vm1512_vm5, %v1487_v55, %v5815_v40  ;;  %v713_v40 = vrot.slane %v5888_v29, 2 }
 0x103   : > { %v5874_v13 = vpop.permute.xlu1 %862  ;;  %v5876_v15 = vpop.permute.xlu0 %766  ;;  %v1553_v16 = vsel %vm1545_vm6, %v1520_v27, %v5843_v50 }
 0x104   : > { %v1586_v34 = vsel %vm1578_vm7, %v1553_v16, %v1064_v11  ;;  %v715_v4 = vsel %vm667_vm0, %v713_v40, %v714_v61  ;;  %v1521_v12 = vsel %vm1512_vm5, %v1488_v46, %v5874_v13  ;;  %v541_v13 = vrot.slane %v5979_v3, 1 }
 0x105   : > { %1376 = vrot.lane.b32.xlu1 %v712_v7, %s5357_s29  ;;  %1077 = vrot.lane.b32.xlu0 %v710_v42, %s5354_s28 }
 0x107   : > { %v1262_v18 = vpop.permute.xlu1 %1261  ;;  %v1162_v19 = vpop.permute.xlu0 %1161 }
 0x108   : > { %v1651_v33 = vsel %vm1644_vm9, %v1618_v8, %v1262_v18  ;;  %v1619_v24 = vsel %vm1611_vm8, %v1586_v34, %v1162_v19  ;;  %v5988_v8 = vld [vmem:[%s5436_s23 + $0xf8] sm:$0xff] }
 0x109   : > { %780 = vrot.lane.b32.xlu1 %v710_v42, %s5351_s25  ;;  %605 = vrot.lane.b32.xlu0 %v535_v5, %s5352_s26  ;;  %v542_v39 = vrot.slane %v5988_v8, 1 }
 0x10b   : > { %v5892_v31 = vpop.permute.xlu1 %964  ;;  %v5894_v32 = vpop.permute.xlu0 %864  ;;  %v543_v41 = vsel %vm490_vm1, %v541_v13, %v542_v39 }
 0x10c   : > { %v1554_v59 = vsel %vm1545_vm6, %v1521_v12, %v5892_v31  ;;  %v6067_v12 = vld [vmem:[%s5436_s23 + $0x110] sm:$0xff] }
 0x10d   : > { %1175 = vrot.lane.b32.xlu1 %v5888_v29, %s5355_s14  ;;  %1079 = vrot.lane.b32.xlu0 %v712_v7, %s5354_s28 }
 0x10f   : > { %v1363_v1 = vpop.permute.xlu1 %1362  ;;  %v1264_v23 = vpop.permute.xlu0 %1263 }
 0x110   : > { %v1684_v35 = vsel %vm1677_vm10, %v1651_v33, %v1363_v1  ;;  %v1652_v62 = vsel %vm1644_vm9, %v1619_v24, %v1264_v23  ;;  %v1456_v23 = vsel %vm1446_vm3, %v5571_v60, %v5867_v6  ;;  %v420_v60 = vld [vmem:[%s5436_s23 + $0x100] sm:$0x3] }
 0x111   : > { %878 = vrot.lane.b32.xlu1 %v5888_v29, %s5350_s24  ;;  %782 = vrot.lane.b32.xlu0 %v712_v7, %s5351_s25  ;;  %v717_v7 = vsel %vm667_vm0, %v714_v61, %v716_v9  ;;  %v544_v27 = vrot.slane %v420_v60, 1 }
 0x112   : > { %4795 = vmatprep.mubr.msk.f32.mxu0 %vm1715_vm11, %v1684_v35  ;;  %v1489_v35 = vsel %vm1479_vm4, %v1456_v23, %v5876_v15 }
 0x113   : > { %v5934_v28 = vpop.permute.xlu1 %966  ;;  %v5936_v58 = vpop.permute.xlu0 %591  ;;  %v1522_v45 = vsel %vm1512_vm5, %v1489_v35, %v5894_v32  ;;  %v719_v32 = vrot.slane %v5988_v8, 2  ;;  %v545_v40 = vsel %vm490_vm1, %v542_v39, %v544_v27 }
 0x114   : > { %v1555_v6 = vsel %vm1545_vm6, %v1522_v45, %v5934_v28 }
 0x115   : > { %1277 = vrot.lane.b32.xlu1 %v538_v56, %s5356_s10  ;;  %1177 = vrot.lane.b32.xlu0 %v5897_v38, %s5355_s14 }
 0x117   : > { %v1365_v0 = vpop.permute.xlu1 %1364  ;;  %v1066_v36 = vpop.permute.xlu0 %1065 }
 0x118   : > { %v1685_v50 = vsel %vm1677_vm10, %v1652_v62, %v1365_v0  ;;  %v1587_v57 = vsel %vm1578_vm7, %v1554_v59, %v1066_v36  ;;  %v721_v62 = vrot.slane %v420_v60, 2  ;;  %v547_v59 = vrot.slane %v6067_v12, 1 }
 0x119   : > { %980 = vrot.lane.b32.xlu1 %v538_v56, %s5353_s27  ;;  %880 = vrot.lane.b32.xlu0 %v5897_v38, %s5350_s24 }
 0x11a   : > { %4796 = vmatmul.mubr.msk.f32.gmra.mrb[6].mxu0 %vm1715_vm11, %v1685_v50  ;;  %v722_v50 = vsel %vm667_vm0, %v719_v32, %v721_v62 }
 0x11b   : > { %v5956_v42 = vpop.permute.xlu1 %768  ;;  %v5958_v5 = vpop.permute.xlu0 %593 }
 0x11c   : > { %v1458_v39 = vsel %vm1446_vm3, %v5608_v17, %v5958_v5  ;;  %v423_v17 = vld [vmem:[%s5436_s23 + $0x118] sm:$0x3] }
 0x11d   : > { %1378 = vrot.lane.b32.xlu1 %v715_v4, %s5357_s29  ;;  %1279 = vrot.lane.b32.xlu0 %v540_v63, %s5356_s10  ;;  %v549_v45 = vrot.slane %v423_v17, 1 }
 0x11f   : > { %v1164_v10 = vpop.permute.xlu1 %1163  ;;  %v1068_v11 = vpop.permute.xlu0 %1067 }
 0x120   : > { %v1620_v51 = vsel %vm1611_vm8, %v1587_v57, %v1164_v10  ;;  %v1588_v55 = vsel %vm1578_vm7, %v1555_v6, %v1068_v11  ;;  %v1457_v11 = vsel %vm1446_vm3, %v5605_v14, %v5936_v58 }
 0x121   : > { %982 = vrot.lane.b32.xlu1 %v540_v63, %s5353_s27  ;;  %607 = vrot.lane.b32.xlu0 %v538_v56, %s5352_s26  ;;  %v718_v56 = vrot.slane %v5979_v3, 2 }
 0x123   : > { %v5965_v18 = vpop.permute.xlu1 %866  ;;  %v5967_v19 = vpop.permute.xlu0 %770  ;;  %v720_v24 = vsel %vm667_vm0, %v718_v56, %v719_v32  ;;  %v550_v56 = vsel %vm490_vm1, %v547_v59, %v549_v45 }
 0x125   : > { %1380 = vrot.lane.b32.xlu1 %v717_v7, %s5357_s29  ;;  %1081 = vrot.lane.b32.xlu0 %v715_v4, %s5354_s28 }
 0x127   : > { %v1266_v20 = vpop.permute.xlu1 %1265  ;;  %v1166_v21 = vpop.permute.xlu0 %1165 }
 0x128   : > { %v1653_v26 = vsel %vm1644_vm9, %v1620_v51, %v1266_v20  ;;  %v1621_v15 = vsel %vm1611_vm8, %v1588_v55, %v1166_v21  ;;  %v6058_v20 = vld [vmem:[%s5436_s23 + $0x108] sm:$0xff] }
 0x129   : > { %784 = vrot.lane.b32.xlu1 %v715_v4, %s5351_s25  ;;  %609 = vrot.lane.b32.xlu0 %v540_v63, %s5352_s26 }
 0x12b   : > { %v5983_v25 = vpop.permute.xlu1 %968  ;;  %v5985_v22 = vpop.permute.xlu0 %868 }
 0x12d   : > { %1179 = vrot.lane.b32.xlu1 %v5979_v3, %s5355_s14  ;;  %1083 = vrot.lane.b32.xlu0 %v717_v7, %s5354_s28 }
 0x12f   : > { %v1367_v33 = vpop.permute.xlu1 %1366  ;;  %v1268_v1 = vpop.permute.xlu0 %1267 }
 0x130   : > { %v1686_v31 = vsel %vm1677_vm10, %v1653_v26, %v1367_v33  ;;  %v1654_v47 = vsel %vm1644_vm9, %v1621_v15, %v1268_v1  ;;  %v1491_v26 = vsel %vm1479_vm4, %v1458_v39, %v5967_v19 }
 0x131   : > { %882 = vrot.lane.b32.xlu1 %v5979_v3, %s5350_s24  ;;  %786 = vrot.lane.b32.xlu0 %v717_v7, %s5351_s25  ;;  %v1490_v7 = vsel %vm1479_vm4, %v1457_v11, %v5956_v42  ;;  %v1524_v1 = vsel %vm1512_vm5, %v1491_v26, %v5985_v22  ;;  %v724_v22 = vrot.slane %v6067_v12, 2 }
 0x132   : > { %4798 = vmatprep.mubr.msk.f32.mxu0 %vm1715_vm11, %v1686_v31  ;;  %v1523_v21 = vsel %vm1512_vm5, %v1490_v7, %v5965_v18  ;;  %v546_v18 = vrot.slane %v6058_v20, 1 }
 0x133   : > { %v6013_v53 = vpop.permute.xlu1 %970  ;;  %v6015_v54 = vpop.permute.xlu0 %595  ;;  %v1556_v14 = vsel %vm1545_vm6, %v1523_v21, %v5983_v25  ;;  %v6146_v21 = vld [vmem:[%s5436_s23 + $0x128] sm:$0xff] }
 0x134   : > { %v548_v33 = vsel %vm490_vm1, %v546_v18, %v547_v59  ;;  %v1557_v5 = vsel %vm1545_vm6, %v1524_v1, %v6013_v53 }
 0x135   : > { %1281 = vrot.lane.b32.xlu1 %v543_v41, %s5356_s10  ;;  %1181 = vrot.lane.b32.xlu0 %v5988_v8, %s5355_s14 }
 0x137   : > { %v1369_v16 = vpop.permute.xlu1 %1368  ;;  %v1070_v34 = vpop.permute.xlu0 %1069 }
 0x138   : > { %v1687_v28 = vsel %vm1677_vm10, %v1654_v47, %v1369_v16  ;;  %v1589_v58 = vsel %vm1578_vm7, %v1556_v14, %v1070_v34  ;;  %v726_v47 = vrot.slane %v423_v17, 2  ;;  %v552_v14 = vrot.slane %v6146_v21, 1 }
 0x139   : > { %984 = vrot.lane.b32.xlu1 %v543_v41, %s5353_s27  ;;  %884 = vrot.lane.b32.xlu0 %v5988_v8, %s5350_s24 }
 0x13a   : > { %4799 = vmatmul.mubr.msk.f32.gmra.mrb[8].mxu0 %vm1715_vm11, %v1687_v28  ;;  %v727_v28 = vsel %vm667_vm0, %v724_v22, %v726_v47 }
 0x13b   : > { %v6035_v61 = vpop.permute.xlu1 %772  ;;  %v6037_v48 = vpop.permute.xlu0 %597 }
 0x13c   : > { %v1460_v59 = vsel %vm1446_vm3, %v5663_v52, %v6037_v48  ;;  %v426_v52 = vld [vmem:[%s5436_s23 + $0x130] sm:$0x3] }
 0x13d   : > { %1382 = vrot.lane.b32.xlu1 %v720_v24, %s5357_s29  ;;  %1283 = vrot.lane.b32.xlu0 %v545_v40, %s5356_s10  ;;  %v554_v1 = vrot.slane %v426_v52, 1 }
 0x13f   : > { %v1168_v0 = vpop.permute.xlu1 %1167  ;;  %v1072_v36 = vpop.permute.xlu0 %1071 }
 0x140   : > { %v1622_v42 = vsel %vm1611_vm8, %v1589_v58, %v1168_v0  ;;  %v1590_v35 = vsel %vm1578_vm7, %v1557_v5, %v1072_v36  ;;  %v1459_v36 = vsel %vm1446_vm3, %v5655_v49, %v6015_v54 }
 0x141   : > { %986 = vrot.lane.b32.xlu1 %v545_v40, %s5353_s27  ;;  %611 = vrot.lane.b32.xlu0 %v543_v41, %s5352_s26  ;;  %v723_v41 = vrot.slane %v6058_v20, 2 }
 0x143   : > { %v6044_v4 = vpop.permute.xlu1 %870  ;;  %v6046_v63 = vpop.permute.xlu0 %774  ;;  %v725_v15 = vsel %vm667_vm0, %v723_v41, %v724_v22  ;;  %v555_v41 = vsel %vm490_vm1, %v552_v14, %v554_v1 }
 0x145   : > { %1384 = vrot.lane.b32.xlu1 %v722_v50, %s5357_s29  ;;  %1085 = vrot.lane.b32.xlu0 %v720_v24, %s5354_s28 }
 0x147   : > { %v1270_v9 = vpop.permute.xlu1 %1269  ;;  %v1170_v10 = vpop.permute.xlu0 %1169 }
 0x148   : > { %v1655_v57 = vsel %vm1644_vm9, %v1622_v42, %v1270_v9  ;;  %v1623_v19 = vsel %vm1611_vm8, %v1590_v35, %v1170_v10  ;;  %v6137_v9 = vld [vmem:[%s5436_s23 + $0x120] sm:$0xff] }
 0x149   : > { %788 = vrot.lane.b32.xlu1 %v720_v24, %s5351_s25  ;;  %613 = vrot.lane.b32.xlu0 %v545_v40, %s5352_s26 }
 0x14b   : > { %v6062_v30 = vpop.permute.xlu1 %972  ;;  %v6064_v46 = vpop.permute.xlu0 %872 }
 0x14d   : > { %1183 = vrot.lane.b32.xlu1 %v6058_v20, %s5355_s14  ;;  %1087 = vrot.lane.b32.xlu0 %v722_v50, %s5354_s28 }
 0x14f   : > { %v1371_v51 = vpop.permute.xlu1 %1370  ;;  %v1272_v13 = vpop.permute.xlu0 %1271 }
 0x150   : > { %v1688_v25 = vsel %vm1677_vm10, %v1655_v57, %v1371_v51  ;;  %v1656_v60 = vsel %vm1644_vm9, %v1623_v19, %v1272_v13  ;;  %v1493_v57 = vsel %vm1479_vm4, %v1460_v59, %v6046_v63 }
 0x151   : > { %886 = vrot.lane.b32.xlu1 %v6058_v20, %s5350_s24  ;;  %790 = vrot.lane.b32.xlu0 %v722_v50, %s5351_s25  ;;  %v1492_v50 = vsel %vm1479_vm4, %v1459_v36, %v6035_v61  ;;  %v1526_v13 = vsel %vm1512_vm5, %v1493_v57, %v6064_v46  ;;  %v729_v46 = vrot.slane %v6146_v21, 2 }
 0x152   : > { %4801 = vmatprep.mubr.msk.f32.mxu0 %vm1715_vm11, %v1688_v25  ;;  %v1525_v10 = vsel %vm1512_vm5, %v1492_v50, %v6044_v4  ;;  %v551_v4 = vrot.slane %v6137_v9, 1 }
 0x153   : > { %v6092_v31 = vpop.permute.xlu1 %974  ;;  %v6094_v23 = vpop.permute.xlu0 %599  ;;  %v1558_v49 = vsel %vm1545_vm6, %v1525_v10, %v6062_v30 }
 0x154   : > { %v553_v51 = vsel %vm490_vm1, %v551_v4, %v552_v14  ;;  %v1559_v48 = vsel %vm1545_vm6, %v1526_v13, %v6092_v31 }
 0x155   : > { %1285 = vrot.lane.b32.xlu1 %v548_v33, %s5356_s10  ;;  %1185 = vrot.lane.b32.xlu0 %v6067_v12, %s5355_s14 }
 0x157   : > { %v1373_v6 = vpop.permute.xlu1 %1372  ;;  %v1074_v55 = vpop.permute.xlu0 %1073 }
 0x158   : > { %v1689_v53 = vsel %vm1677_vm10, %v1656_v60, %v1373_v6  ;;  %v1591_v54 = vsel %vm1578_vm7, %v1558_v49, %v1074_v55  ;;  %v731_v60 = vrot.slane %v426_v52, 2 }
 0x159   : > { %988 = vrot.lane.b32.xlu1 %v548_v33, %s5353_s27  ;;  %888 = vrot.lane.b32.xlu0 %v6067_v12, %s5350_s24 }
 0x15a   : > { %4802 = vmatmul.mubr.msk.f32.gmra.mrb[10].mxu0 %vm1715_vm11, %v1689_v53  ;;  %v732_v53 = vsel %vm667_vm0, %v729_v46, %v731_v60 }
 0x15b   : > { %v6114_v32 = vpop.permute.xlu1 %776  ;;  %v6116_v27 = vpop.permute.xlu0 %601 }
 0x15d   : > { %1386 = vrot.lane.b32.xlu1 %v725_v15, %s5357_s29  ;;  %1287 = vrot.lane.b32.xlu0 %v550_v56, %s5356_s10 }
 0x15f   : > { %v1172_v16 = vpop.permute.xlu1 %1171  ;;  %v1076_v34 = vpop.permute.xlu0 %1075 }
 0x160   : > { %v1624_v61 = vsel %vm1611_vm8, %v1591_v54, %v1172_v16  ;;  %v1592_v26 = vsel %vm1578_vm7, %v1559_v48, %v1076_v34  ;;  %v1461_v34 = vsel %vm1446_vm3, %v5730_v43, %v6094_v23  ;;  %v6227_v43 = vld [vmem:[%s8059_s2] ss:$0 sm:$0xff] }
 0x161   : > { %990 = vrot.lane.b32.xlu1 %v550_v56, %s5353_s27  ;;  %615 = vrot.lane.b32.xlu0 %v548_v33, %s5352_s26  ;;  %v728_v33 = vrot.slane %v6137_v9, 2  ;;  %v6230_v23 = vld [vmem:[%s5436_s23 + $0x140] sm:$0xff] }
 0x162   : > { %v557_v14 = vrot.slane %v6230_v23, 1 }
 0x163   : > { %v6123_v24 = vpop.permute.xlu1 %874  ;;  %v6125_v40 = vpop.permute.xlu0 %778  ;;  %v730_v19 = vsel %vm667_vm0, %v728_v33, %v729_v46  ;;  %v429_v46 = vld [vmem:[%s5436_s23 + $0x148] sm:$0x3] }
 0x165   : > { %1388 = vrot.lane.b32.xlu1 %v727_v28, %s5357_s29  ;;  %1089 = vrot.lane.b32.xlu0 %v725_v15, %s5354_s28 }
 0x167   : > { %v1274_v62 = vpop.permute.xlu1 %1273  ;;  %v1174_v0 = vpop.permute.xlu0 %1173 }
 0x168   : > { %v1657_v58 = vsel %vm1644_vm9, %v1624_v61, %v1274_v62  ;;  %v1625_v63 = vsel %vm1611_vm8, %v1592_v26, %v1174_v0  ;;  %v6216_v62 = vld [vmem:[%s5436_s23 + $0x138] sm:$0xff] }
 0x169   : > { %792 = vrot.lane.b32.xlu1 %v725_v15, %s5351_s25  ;;  %617 = vrot.lane.b32.xlu0 %v550_v56, %s5352_s26 }
 0x16b   : > { %v6141_v11 = vpop.permute.xlu1 %976  ;;  %v6143_v7 = vpop.permute.xlu0 %876 }
 0x16d   : > { %1187 = vrot.lane.b32.xlu1 %v6137_v9, %s5355_s14  ;;  %1091 = vrot.lane.b32.xlu0 %v727_v28, %s5354_s28 }
 0x16f   : > { %v1375_v42 = vpop.permute.xlu1 %1374  ;;  %v1276_v18 = vpop.permute.xlu0 %1275 }
 0x170   : > { %v1690_v30 = vsel %vm1677_vm10, %v1657_v58, %v1375_v42  ;;  %v1658_v17 = vsel %vm1644_vm9, %v1625_v63, %v1276_v18 }
 0x171   : > { %890 = vrot.lane.b32.xlu1 %v6137_v9, %s5350_s24  ;;  %794 = vrot.lane.b32.xlu0 %v727_v28, %s5351_s25  ;;  %v1494_v28 = vsel %vm1479_vm4, %v1461_v34, %v6114_v32  ;;  %v736_v34 = vrot.slane %v429_v46, 2 }
 0x172   : > { %4804 = vmatprep.mubr.msk.f32.mxu0 %vm1715_vm11, %v1690_v30  ;;  %v1527_v0 = vsel %vm1512_vm5, %v1494_v28, %v6123_v24  ;;  %v6238_v24 = vld [vmem:[%s8060_s3] ss:$0 sm:$0xff] }
 0x173   : > { %v6171_v25 = vpop.permute.xlu1 %978  ;;  %v6173_v39 = vpop.permute.xlu0 %603  ;;  %v1560_v10 = vsel %vm1545_vm6, %v1527_v0, %v6141_v11  ;;  %v556_v11 = vrot.slane %v6216_v62, 1 }
 0x175   : > { %1289 = vrot.lane.b32.xlu1 %v553_v51, %s5356_s10  ;;  %1189 = vrot.lane.b32.xlu0 %v6146_v21, %s5355_s14  ;;  %v558_v26 = vsel %vm490_vm1, %v556_v11, %v557_v14 }
 0x177   : > { %v1377_v5 = vpop.permute.xlu1 %1376  ;;  %v1078_v35 = vpop.permute.xlu0 %1077 }
 0x178   : > { %v1691_v31 = vsel %vm1677_vm10, %v1658_v17, %v1377_v5  ;;  %v1593_v32 = vsel %vm1578_vm7, %v1560_v10, %v1078_v35 }
 0x179   : > { %992 = vrot.lane.b32.xlu1 %v553_v51, %s5353_s27  ;;  %892 = vrot.lane.b32.xlu0 %v6146_v21, %s5350_s24 }
 0x17a   : > { %4805 = vmatmul.mubr.msk.f32.gmra.mrb[12].mxu0 %vm1715_vm11, %v1691_v31  ;;  %v559_v31 = vrot.slane %v429_v46, 1 }
 0x17b   : > { %v6193_v22 = vpop.permute.xlu1 %780  ;;  %v6195_v45 = vpop.permute.xlu0 %605 }
 0x17c   : > { %v1464_v46 = vsel %vm1446_vm3, %v5818_v44, %v6195_v45 }
 0x17d   : > { %1390 = vrot.lane.b32.xlu1 %v730_v19, %s5357_s29  ;;  %1291 = vrot.lane.b32.xlu0 %v555_v41, %s5356_s10 }
 0x17f   : > { %v1176_v6 = vpop.permute.xlu1 %1175  ;;  %v1080_v55 = vpop.permute.xlu0 %1079 }
 0x180   : > { %v1626_v54 = vsel %vm1611_vm8, %v1593_v32, %v1176_v6 }
 0x181   : > { %994 = vrot.lane.b32.xlu1 %v555_v41, %s5353_s27  ;;  %619 = vrot.lane.b32.xlu0 %v553_v51, %s5352_s26  ;;  %v1462_v51 = vsel %vm1446_vm3, %v5739_v2, %v6116_v27 }
 0x182   : > { %v1495_v52 = vsel %vm1479_vm4, %v1462_v51, %v6125_v40 }
 0x183   : > { %v6202_v15 = vpop.permute.xlu1 %878  ;;  %v6204_v56 = vpop.permute.xlu0 %782  ;;  %v1528_v63 = vsel %vm1512_vm5, %v1495_v52, %v6143_v7  ;;  %v733_v7 = vrot.slane %v6216_v62, 2 }
 0x184   : > { %v1561_v1 = vsel %vm1545_vm6, %v1528_v63, %v6171_v25  ;;  %v734_v25 = vrot.slane %v6230_v23, 2 }
 0x185   : > { %1392 = vrot.lane.b32.xlu1 %v732_v53, %s5357_s29  ;;  %1093 = vrot.lane.b32.xlu0 %v730_v19, %s5354_s28  ;;  %v1594_v40 = vsel %vm1578_vm7, %v1561_v1, %v1080_v55 }
 0x186   : > { %v735_v55 = vsel %vm667_vm0, %v733_v7, %v734_v25  ;;  %v737_v10 = vsel %vm667_vm0, %v734_v25, %v736_v34 }
 0x187   : > { %v1278_v47 = vpop.permute.xlu1 %1277  ;;  %v1178_v16 = vpop.permute.xlu0 %1177 }
 0x188   : > { %v1659_v58 = vsel %vm1644_vm9, %v1626_v54, %v1278_v47  ;;  %v1627_v5 = vsel %vm1611_vm8, %v1594_v40, %v1178_v16  ;;  %v1497_v40 = vsel %vm1479_vm4, %v1464_v46, %v6204_v56 }
 0x189   : > { %796 = vrot.lane.b32.xlu1 %v730_v19, %s5351_s25  ;;  %621 = vrot.lane.b32.xlu0 %v555_v41, %s5352_s26 }
 0x18b   : > { %v6220_v36 = vpop.permute.xlu1 %980  ;;  %v6222_v50 = vpop.permute.xlu0 %880 }
 0x18c   : > { %v1530_v25 = vsel %vm1512_vm5, %v1497_v40, %v6222_v50 }
 0x18d   : > { %v4788_v49 = vpop.f32.mrb[0].mxu0  ;;  %1191 = vrot.lane.b32.xlu1 %v6216_v62, %s5355_s14  ;;  %1095 = vrot.lane.b32.xlu0 %v732_v53, %s5354_s28 }
 0x18e   : > { %v2049_v61 = vmul.f32 %v4788_v49, %v6227_v43  ;;  %v1882_v4 = vpop.f32.mrb[1].mxu0 }
 0x18f   : > { %v2048_v42 = vmul.f32 %v6227_v43, %v1882_v4  ;;  %v1379_v18 = vpop.permute.xlu1 %1378  ;;  %v1280_v30 = vpop.permute.xlu0 %1279  ;;  %v1463_v4 = vsel %vm1446_vm3, %v5809_v37, %v6173_v39 }
 0x190   : > { %v2088_v59 = vadd.f32 %v6238_v24, %v2049_v61  ;;  %v1692_v57 = vsel %vm1677_vm10, %v1659_v58, %v1379_v18  ;;  %v1660_v19 = vsel %vm1644_vm9, %v1627_v5, %v1280_v30  ;;  %v1496_v11 = vsel %vm1479_vm4, %v1463_v4, %v6193_v22  ;;  %v6326_v30 = vld [vmem:[%s5436_s23 + $0x158] sm:$0xff] }
 0x191   : > { %v2087_v13 = vadd.f32 %v6238_v24, %v2048_v42  ;;  %894 = vrot.lane.b32.xlu1 %v6216_v62, %s5350_s24  ;;  %798 = vrot.lane.b32.xlu0 %v732_v53, %s5351_s25  ;;  %v560_v53 = vsel %vm490_vm1, %v557_v14, %v559_v31  ;;  %v6317_v14 = vld [vmem:[%s5436_s23 + $0x150] sm:$0xff]  ;;  %v1529_v58 = vsel %vm1512_vm5, %v1496_v11, %v6202_v15 }
 0x192   : > { %v2152_v48 = vmul.f32 0.01, %v2088_v59  ;;  %4807 = vmatprep.mubr.msk.f32.mxu0 %vm1715_vm11, %v1692_v57  ;;  %vm2120_vm13 = vcmp.gt.f32.partialorder %v2088_v59, 0.0  ;;  %v1562_v37 = vsel %vm1545_vm6, %v1529_v58, %v6220_v36  ;;  %v561_v51 = vrot.slane %v6317_v14, 1 }
 0x193   : > { %v2151_v33 = vmul.f32 0.01, %v2087_v13  ;;  %v6264_v2 = vpop.permute.xlu1 %982  ;;  %v6266_v27 = vpop.permute.xlu0 %607  ;;  %vm2119_vm12 = vcmp.gt.f32.partialorder %v2087_v13, 0.0  ;;  %v738_v50 = vrot.slane %v6317_v14, 2 }
 0x194   : > { %v6281_v35 = vsel %vm2120_vm13, %v2088_v59, %v2152_v48 }
 0x195   : > { %1293 = vrot.lane.b32.xlu1 %v558_v26, %s5356_s10  ;;  %v6273_v17 = vsel %vm2119_vm12, %v2087_v13, %v2151_v33  ;;  %1193 = vrot.lane.b32.xlu0 %v6230_v23, %s5355_s14  ;;  %8126 = vst [vmem:[#allocation4_spill] sm:$0xff] %v6281_v35  ;;  %v562_v13 = vrot.slane %v6326_v30, 1 }
 0x196   : > { %8125 = vst [vmem:[#allocation3_spill] sm:$0xff] %v6273_v17  ;;  %4842 = vmatprep.mubr.msk.f32.mxu1 %vm1677_vm10, %v6273_v17 }
 0x197   : > { %4843 = vmatmul.mubr.msk.f32.vlgmr.msra.gmra.mrb[0].mxu1 %vm1677_vm10, %v6281_v35  ;;  %v1381_v41 = vpop.permute.xlu1 %1380  ;;  %v1082_v60 = vpop.permute.xlu0 %1081  ;;  %v563_v5 = vsel %vm490_vm1, %v561_v51, %v562_v13 }
 0x198   : > { %v1693_v6 = vsel %vm1677_vm10, %v1660_v19, %v1381_v41  ;;  %v1595_v39 = vsel %vm1578_vm7, %v1562_v37, %v1082_v60  ;;  %v432_v19 = vld [vmem:[%s5436_s23 + $0x160] sm:$0x3]  ;;  %v1563_v41 = vsel %vm1545_vm6, %v1530_v25, %v6264_v2  ;;  %v739_v2 = vrot.slane %v6326_v30, 2 }
 0x199   : > { %996 = vrot.lane.b32.xlu1 %v558_v26, %s5353_s27  ;;  %896 = vrot.lane.b32.xlu0 %v6230_v23, %s5350_s24  ;;  %v741_v58 = vrot.slane %v432_v19, 2 }
 0x19a   : > { %4808 = vmatmul.mubr.msk.f32.gmra.mrb[14].mxu0 %vm1715_vm11, %v1693_v6 }
 0x19b   : > { %v6294_v47 = vpop.permute.xlu1 %784  ;;  %v6296_v16 = vpop.permute.xlu0 %609 }
 0x19d   : > { %1394 = vrot.lane.b32.xlu1 %v735_v55, %s5357_s29  ;;  %1295 = vrot.lane.b32.xlu0 %v560_v53, %s5356_s10 }
 0x19f   : > { %v1180_v28 = vpop.permute.xlu1 %1179  ;;  %v1084_v0 = vpop.permute.xlu0 %1083 }
 0x1a0   : > { %v1628_v22 = vsel %vm1611_vm8, %v1595_v39, %v1180_v28  ;;  %v1596_v56 = vsel %vm1578_vm7, %v1563_v41, %v1084_v0 }
 0x1a1   : > { %998 = vrot.lane.b32.xlu1 %v560_v53, %s5353_s27  ;;  %623 = vrot.lane.b32.xlu0 %v558_v26, %s5352_s26 }
 0x1a3   : > { %v6303_v32 = vpop.permute.xlu1 %882  ;;  %v6305_v49 = vpop.permute.xlu0 %786 }
 0x1a5   : > { %1396 = vrot.lane.b32.xlu1 %v737_v10, %s5357_s29  ;;  %1097 = vrot.lane.b32.xlu0 %v735_v55, %s5354_s28 }
 0x1a7   : > { %v1282_v54 = vpop.permute.xlu1 %1281  ;;  %v1182_v61 = vpop.permute.xlu0 %1181 }
 0x1a8   : > { %v1661_v52 = vsel %vm1644_vm9, %v1628_v22, %v1282_v54  ;;  %v1629_v6 = vsel %vm1611_vm8, %v1596_v56, %v1182_v61  ;;  %v740_v54 = vsel %vm667_vm0, %v738_v50, %v739_v2  ;;  %v1466_v56 = vsel %vm1446_vm3, %v5897_v38, %v6296_v16 }
 0x1a9   : > { %800 = vrot.lane.b32.xlu1 %v735_v55, %s5351_s25  ;;  %625 = vrot.lane.b32.xlu0 %v560_v53, %s5352_s26  ;;  %v564_v53 = vrot.slane %v432_v19, 1 }
 0x1ab   : > { %v6321_v42 = vpop.permute.xlu1 %984  ;;  %v6323_v18 = vpop.permute.xlu0 %884  ;;  %v565_v61 = vsel %vm490_vm1, %v562_v13, %v564_v53  ;;  %v1465_v13 = vsel %vm1446_vm3, %v5888_v29, %v6266_v27 }
 0x1ad   : > { %v4791_v59 = vpop.f32.mrb[2].mxu0  ;;  %1195 = vrot.lane.b32.xlu1 %v6317_v14, %s5355_s14  ;;  %1099 = vrot.lane.b32.xlu0 %v737_v10, %s5354_s28 }
 0x1ae   : > { %v2051_v15 = vmul.f32 %v4791_v59, %v6227_v43  ;;  %v1892_v57 = vpop.f32.mrb[3].mxu0  ;;  %v742_v59 = vsel %vm667_vm0, %v739_v2, %v741_v58 }
 0x1af   : > { %v2050_v36 = vmul.f32 %v6227_v43, %v1892_v57  ;;  %v1383_v48 = vpop.permute.xlu1 %1382  ;;  %v1284_v26 = vpop.permute.xlu0 %1283 }
 0x1b0   : > { %v2090_v63 = vadd.f32 %v6238_v24, %v2051_v15  ;;  %v1694_v33 = vsel %vm1677_vm10, %v1661_v52, %v1383_v48  ;;  %v1662_v34 = vsel %vm1644_vm9, %v1629_v6, %v1284_v26  ;;  %v1498_v52 = vsel %vm1479_vm4, %v1465_v13, %v6294_v47 }
 0x1b1   : > { %v2089_v1 = vadd.f32 %v6238_v24, %v2050_v36  ;;  %898 = vrot.lane.b32.xlu1 %v6317_v14, %s5350_s24  ;;  %802 = vrot.lane.b32.xlu0 %v737_v10, %s5351_s25  ;;  %v6408_v36 = vld [vmem:[%s5436_s23 + $0x168] sm:$0xff]  ;;  %v1531_v48 = vsel %vm1512_vm5, %v1498_v52, %v6303_v32  ;;  %v1499_v6 = vsel %vm1479_vm4, %v1466_v56, %v6305_v49 }
 0x1b2   : > { %v2154_v7 = vmul.f32 0.01, %v2090_v63  ;;  %4810 = vmatprep.mubr.msk.f32.mxu0 %vm1715_vm11, %v1694_v33  ;;  %vm2122_vm15 = vcmp.gt.f32.partialorder %v2090_v63, 0.0  ;;  %v6417_v33 = vld [vmem:[%s5436_s23 + $0x170] sm:$0xff]  ;;  %v1564_v29 = vsel %vm1545_vm6, %v1531_v48, %v6321_v42  ;;  %v566_v40 = vrot.slane %v6408_v36, 1 }
 0x1b3   : > { %v2153_v31 = vmul.f32 0.01, %v2089_v1  ;;  %v6355_v44 = vpop.permute.xlu1 %986  ;;  %v6357_v45 = vpop.permute.xlu0 %611  ;;  %vm2121_vm14 = vcmp.gt.f32.partialorder %v2089_v1, 0.0 }
 0x1b4   : > { %v6372_v55 = vsel %vm2122_vm15, %v2090_v63, %v2154_v7  ;;  %v567_v7 = vrot.slane %v6417_v33, 1 }
 0x1b5   : > { %1297 = vrot.lane.b32.xlu1 %v563_v5, %s5356_s10  ;;  %v6364_v60 = vsel %vm2121_vm14, %v2089_v1, %v2153_v31  ;;  %1197 = vrot.lane.b32.xlu0 %v6326_v30, %s5355_s14  ;;  %8128 = vst [vmem:[#allocation6_spill] sm:$0xff] %v6372_v55 }
 0x1b6   : > { %8127 = vst [vmem:[#allocation5_spill] sm:$0xff] %v6364_v60  ;;  %4845 = vmatprep.mubr.msk.f32.mxu1 %vm1677_vm10, %v6364_v60  ;;  %v568_v53 = vsel %vm490_vm1, %v566_v40, %v567_v7 }
 0x1b7   : > { %4846 = vmatmul.mubr.msk.f32.gmra.mrb[2].mxu1 %vm1677_vm10, %v6372_v55  ;;  %v1385_v28 = vpop.permute.xlu1 %1384  ;;  %v1086_v0 = vpop.permute.xlu0 %1085 }
 0x1b8   : > { %v1695_v10 = vsel %vm1677_vm10, %v1662_v34, %v1385_v28  ;;  %v1597_v27 = vsel %vm1578_vm7, %v1564_v29, %v1086_v0  ;;  %v1532_v34 = vsel %vm1512_vm5, %v1499_v6, %v6323_v18  ;;  %v435_v0 = vld [vmem:[%s5436_s23 + $0x178] sm:$0x3]  ;;  %v743_v18 = vrot.slane %v6408_v36, 2 }
 0x1b9   : > { %1000 = vrot.lane.b32.xlu1 %v563_v5, %s5353_s27  ;;  %900 = vrot.lane.b32.xlu0 %v6326_v30, %s5350_s24 }
 0x1ba   : > { %4811 = vmatmul.mubr.msk.f32.gmra.mrb[16].mxu0 %vm1715_vm11, %v1695_v10  ;;  %v1565_v10 = vsel %vm1545_vm6, %v1532_v34, %v6355_v44  ;;  %v744_v44 = vrot.slane %v6417_v33, 2 }
 0x1bb   : > { %v6385_v4 = vpop.permute.xlu1 %788  ;;  %v6387_v11 = vpop.permute.xlu0 %613 }
 0x1bd   : > { %1398 = vrot.lane.b32.xlu1 %v740_v54, %s5357_s29  ;;  %1299 = vrot.lane.b32.xlu0 %v565_v61, %s5356_s10 }
 0x1bf   : > { %v1184_v37 = vpop.permute.xlu1 %1183  ;;  %v1088_v39 = vpop.permute.xlu0 %1087 }
 0x1c0   : > { %v1630_v47 = vsel %vm1611_vm8, %v1597_v27, %v1184_v37  ;;  %v1598_v49 = vsel %vm1578_vm7, %v1565_v10, %v1088_v39  ;;  %v569_v37 = vrot.slane %v435_v0, 1  ;;  %v746_v27 = vrot.slane %v435_v0, 2 }
 0x1c1   : > { %1002 = vrot.lane.b32.xlu1 %v565_v61, %s5353_s27  ;;  %627 = vrot.lane.b32.xlu0 %v563_v5, %s5352_s26 }
 0x1c2   : > { %v570_v52 = vsel %vm490_vm1, %v567_v7, %v569_v37 }
 0x1c3   : > { %v6394_v22 = vpop.permute.xlu1 %886  ;;  %v6396_v15 = vpop.permute.xlu0 %790 }
 0x1c5   : > { %1400 = vrot.lane.b32.xlu1 %v742_v59, %s5357_s29  ;;  %1101 = vrot.lane.b32.xlu0 %v740_v54, %s5354_s28 }
 0x1c7   : > { %v1286_v57 = vpop.permute.xlu1 %1285  ;;  %v1186_v51 = vpop.permute.xlu0 %1185 }
 0x1c8   : > { %v1663_v5 = vsel %vm1644_vm9, %v1630_v47, %v1286_v57 }
 0x1c9   : > { %804 = vrot.lane.b32.xlu1 %v740_v54, %s5351_s25  ;;  %629 = vrot.lane.b32.xlu0 %v565_v61, %s5352_s26  ;;  %v1631_v61 = vsel %vm1611_vm8, %v1598_v49, %v1186_v51  ;;  %v745_v51 = vsel %vm667_vm0, %v743_v18, %v744_v44 }
 0x1cb   : > { %v6412_v26 = vpop.permute.xlu1 %988  ;;  %v6414_v63 = vpop.permute.xlu0 %888 }
 0x1cd   : > { %v4794_v46 = vpop.f32.mrb[4].mxu0  ;;  %1199 = vrot.lane.b32.xlu1 %v6408_v36, %s5355_s14  ;;  %1103 = vrot.lane.b32.xlu0 %v742_v59, %s5354_s28 }
 0x1ce   : > { %v2053_v32 = vmul.f32 %v4794_v46, %v6227_v43  ;;  %v1902_v1 = vpop.f32.mrb[5].mxu0 }
 0x1cf   : > { %v2052_v42 = vmul.f32 %v6227_v43, %v1902_v1  ;;  %v1387_v25 = vpop.permute.xlu1 %1386  ;;  %v1288_v31 = vpop.permute.xlu0 %1287 }
 0x1d0   : > { %v2092_v19 = vadd.f32 %v6238_v24, %v2053_v32  ;;  %v1696_v41 = vsel %vm1677_vm10, %v1663_v5, %v1387_v25  ;;  %v1664_v39 = vsel %vm1644_vm9, %v1631_v61, %v1288_v31  ;;  %v747_v32 = vsel %vm667_vm0, %v744_v44, %v746_v27  ;;  %v436_v31 = vld [vmem:[%s5436_s23 + $0x180] sm:$0xff] }
 0x1d1   : > { %v2091_v50 = vadd.f32 %v6238_v24, %v2052_v42  ;;  %902 = vrot.lane.b32.xlu1 %v6408_v36, %s5350_s24  ;;  %806 = vrot.lane.b32.xlu0 %v742_v59, %s5351_s25  ;;  %v1467_v42 = vsel %vm1446_vm3, %v5979_v3, %v6357_v45  ;;  %v1468_v61 = vsel %vm1446_vm3, %v5988_v8, %v6387_v11  ;;  %v438_v11 = vld [vmem:[%s5436_s23 + $0x190] sm:$0x3]  ;;  %v1044_v27 = vrot.slane %v436_v31, 2 }
 0x1d2   : > { %v2156_v2 = vmul.f32 0.01, %v2092_v19  ;;  %4813 = vmatprep.mubr.msk.f32.mxu0 %vm1715_vm11, %v1696_v41  ;;  %vm2124_vm12 = vcmp.gt.f32.partialorder %v2092_v19, 0.0  ;;  %v1500_v25 = vsel %vm1479_vm4, %v1467_v42, %v6385_v4  ;;  %v1501_v37 = vsel %vm1479_vm4, %v1468_v61, %v6396_v15  ;;  %v2786_v61 = vld [vmem:[%s8065_s8 + $0x18] sm:$0xff] }
 0x1d3   : > { %v2155_v28 = vmul.f32 0.01, %v2091_v50  ;;  %v6446_v38 = vpop.permute.xlu1 %990  ;;  %v6448_v16 = vpop.permute.xlu0 %615  ;;  %vm2123_vm2 = vcmp.gt.f32.partialorder %v2091_v50, 0.0 }
 0x1d4   : > { %v6463_v58 = vsel %vm2124_vm12, %v2092_v19, %v2156_v2  ;;  %v1533_v19 = vsel %vm1512_vm5, %v1500_v25, %v6394_v22  ;;  %v943_v2 = vrot.slane %v436_v31, 1 }
 0x1d5   : > { %1301 = vrot.lane.b32.xlu1 %v568_v53, %s5356_s10  ;;  %v6455_v54 = vsel %vm2123_vm2, %v2091_v50, %v2155_v28  ;;  %1201 = vrot.lane.b32.xlu0 %v6417_v33, %s5355_s14  ;;  %8130 = vst [vmem:[#allocation8_spill] sm:$0xff] %v6463_v58  ;;  %v6506_v50 = vld [vmem:[%s5436_s23 + $0x188] sm:$0xff]  ;;  %v1566_v3 = vsel %vm1545_vm6, %v1533_v19, %v6412_v26 }
 0x1d6   : > { %8129 = vst [vmem:[#allocation7_spill] sm:$0xff] %v6455_v54  ;;  %4848 = vmatprep.mubr.msk.f32.mxu1 %vm1677_vm10, %v6455_v54  ;;  %v944_v34 = vrot.slane %v6506_v50, 1 }
 0x1d7   : > { %4849 = vmatmul.mubr.msk.f32.gmra.mrb[4].mxu1 %vm1677_vm10, %v6463_v58  ;;  %v1389_v59 = vpop.permute.xlu1 %1388  ;;  %v1090_v57 = vpop.permute.xlu0 %1089 }
 0x1d8   : > { %v1697_v13 = vsel %vm1677_vm10, %v1664_v39, %v1389_v59  ;;  %v1599_v45 = vsel %vm1578_vm7, %v1566_v3, %v1090_v57  ;;  %v945_v59 = vsel %vm490_vm1, %v943_v2, %v944_v34  ;;  %v1534_v57 = vsel %vm1512_vm5, %v1501_v37, %v6414_v63  ;;  %v2784_v2 = vld [vmem:[%s8065_s8 + $0x8] sm:$0xff] }
 0x1d9   : > { %1004 = vrot.lane.b32.xlu1 %v568_v53, %s5353_s27  ;;  %904 = vrot.lane.b32.xlu0 %v6417_v33, %s5350_s24 }
 0x1da   : > { %4814 = vmatmul.mubr.msk.f32.gmra.mrb[18].mxu0 %vm1715_vm11, %v1697_v13 }
 0x1db   : > { %v6476_v48 = vpop.permute.xlu1 %792  ;;  %v6478_v29 = vpop.permute.xlu0 %617 }
 0x1dd   : > { %1402 = vrot.lane.b32.xlu1 %v745_v51, %s5357_s29  ;;  %1303 = vrot.lane.b32.xlu0 %v570_v52, %s5356_s10 }
 0x1df   : > { %v1188_v46 = vpop.permute.xlu1 %1187  ;;  %v1092_v47 = vpop.permute.xlu0 %1091 }
 0x1e0   : > { %v1632_v4 = vsel %vm1611_vm8, %v1599_v45, %v1188_v46 }
 0x1e1   : > { %1006 = vrot.lane.b32.xlu1 %v570_v52, %s5353_s27  ;;  %631 = vrot.lane.b32.xlu0 %v568_v53, %s5352_s26 }
 0x1e3   : > { %v6485_v1 = vpop.permute.xlu1 %890  ;;  %v6487_v40 = vpop.permute.xlu0 %794 }
 0x1e5   : > { %1404 = vrot.lane.b32.xlu1 %v747_v32, %s5357_s29  ;;  %1105 = vrot.lane.b32.xlu0 %v745_v51, %s5354_s28 }
 0x1e7   : > { %v1290_v7 = vpop.permute.xlu1 %1289  ;;  %v1190_v5 = vpop.permute.xlu0 %1189 }
 0x1e8   : > { %v1665_v28 = vsel %vm1644_vm9, %v1632_v4, %v1290_v7  ;;  %v1045_v7 = vrot.slane %v6506_v50, 2 }
 0x1e9   : > { %808 = vrot.lane.b32.xlu1 %v745_v51, %s5351_s25  ;;  %633 = vrot.lane.b32.xlu0 %v570_v52, %s5352_s26  ;;  %v1567_v52 = vsel %vm1545_vm6, %v1534_v57, %v6446_v38  ;;  %v946_v38 = vrot.slane %v438_v11, 1 }
 0x1ea   : > { %v1600_v15 = vsel %vm1578_vm7, %v1567_v52, %v1092_v47 }
 0x1eb   : > { %v6501_v41 = vpop.permute.xlu1 %992  ;;  %v6503_v56 = vpop.permute.xlu0 %892  ;;  %v1633_v63 = vsel %vm1611_vm8, %v1600_v15, %v1190_v5  ;;  %v1046_v5 = vsel %vm667_vm0, %v1044_v27, %v1045_v7  ;;  %v947_v19 = vsel %vm490_vm1, %v944_v34, %v946_v38 }
 0x1ed   : > { %v4797_v6 = vpop.f32.mrb[6].mxu0  ;;  %1203 = vrot.lane.b32.xlu1 %v436_v31, %s5355_s14  ;;  %1107 = vrot.lane.b32.xlu0 %v747_v32, %s5354_s28 }
 0x1ee   : > { %v2055_v22 = vmul.f32 %v4797_v6, %v6227_v43  ;;  %v1912_v53 = vpop.f32.mrb[7].mxu0  ;;  %v1047_v6 = vrot.slane %v438_v11, 2  ;;  %v1469_v11 = vsel %vm1446_vm3, %v6058_v20, %v6448_v16 }
 0x1ef   : > { %v2054_v0 = vmul.f32 %v6227_v43, %v1912_v53  ;;  %v1391_v26 = vpop.permute.xlu1 %1390  ;;  %v1292_v10 = vpop.permute.xlu0 %1291  ;;  %v1502_v27 = vsel %vm1479_vm4, %v1469_v11, %v6476_v48 }
 0x1f0   : > { %v2094_v49 = vadd.f32 %v6238_v24, %v2055_v22  ;;  %v1698_v18 = vsel %vm1677_vm10, %v1665_v28, %v1391_v26  ;;  %v1666_v47 = vsel %vm1644_vm9, %v1633_v63, %v1292_v10  ;;  %v2783_v22 = vld [vmem:[%s8065_s8] sm:$0xff]  ;;  %v1048_v34 = vsel %vm667_vm0, %v1045_v7, %v1047_v6  ;;  %v439_v10 = vld [vmem:[%s5436_s23 + $0x198] sm:$0xff] }
 0x1f1   : > { %v2093_v44 = vadd.f32 %v6238_v24, %v2054_v0  ;;  %906 = vrot.lane.b32.xlu1 %v436_v31, %s5350_s24  ;;  %810 = vrot.lane.b32.xlu0 %v747_v32, %s5351_s25  ;;  %v5026_v53 = vpack.c.bf16 %v2784_v2, %v2783_v22  ;;  %v440_v26 = vld [vmem:[%s5436_s23 + $0x1a0] sm:$0xff]  ;;  %v1345_v15 = vrot.slane %v439_v10, 2 }
 0x1f2   : > { %v2158_v39 = vmul.f32 0.01, %v2094_v49  ;;  %4816 = vmatprep.mubr.msk.f32.mxu0 %vm1715_vm11, %v1698_v18  ;;  %vm2126_vm14 = vcmp.gt.f32.partialorder %v2094_v49, 0.0  ;;  %v2785_v18 = vld [vmem:[%s8065_s8 + $0x10] sm:$0xff]  ;;  %v1245_v37 = vrot.slane %v440_v26, 1  ;;  %v1346_v52 = vrot.slane %v440_v26, 2 }
 0x1f3   : > { %v2157_v13 = vmul.f32 0.01, %v2093_v44  ;;  %v6532_v51 = vpop.permute.xlu1 %994  ;;  %v6534_v8 = vpop.permute.xlu0 %619  ;;  %vm2125_vm13 = vcmp.gt.f32.partialorder %v2093_v44, 0.0  ;;  %5027 = vmatprep.subr.bf16.mxu0 %v5026_v53 }
 0x1f4   : > { %v6548_v32 = vsel %vm2126_vm14, %v2094_v49, %v2158_v39  ;;  %v441_v49 = vld [vmem:[%s5436_s23 + $0x1a8] sm:$0x3]  ;;  %5029 = vmatpush3.bf16.msra.mxu0 %v5026_v53  ;;  %v1244_v39 = vrot.slane %v439_v10, 1  ;;  %v1347_v22 = vsel %vm667_vm0, %v1345_v15, %v1346_v52  ;;  %s4173_s23 = sld [smem:[#allocation2]] }
 0x1f5   : > { %1305 = vrot.lane.b32.xlu1 %v945_v59, %s5356_s10  ;;  %v6541_v46 = vsel %vm2125_vm13, %v2093_v44, %v2157_v13  ;;  %1205 = vrot.lane.b32.xlu0 %v6506_v50, %s5355_s14  ;;  %8132 = vst [vmem:[#allocation10_spill] sm:$0xff] %v6548_v32  ;;  %v5030_v44 = vpack.c.bf16 %v2786_v61, %v2785_v18  ;;  %v1348_v38 = vrot.slane %v441_v49, 2 }
 0x1f6   : > { %8131 = vst [vmem:[#allocation9_spill] sm:$0xff] %v6541_v46  ;;  %4851 = vmatprep.mubr.msk.f32.mxu1 %vm1677_vm10, %v6541_v46  ;;  %v1246_v7 = vsel %vm490_vm1, %v1244_v39, %v1245_v37 }
 0x1f7   : > { %4852 = vmatmul.mubr.msk.f32.gmra.mrb[6].mxu1 %vm1677_vm10, %v6548_v32  ;;  %v1393_v42 = vpop.permute.xlu1 %1392  ;;  %v1094_v25 = vpop.permute.xlu0 %1093  ;;  %5031 = vmatprep.subr.bf16.mxu0 %v5030_v44 }
 0x1f8   : > { %v1699_v31 = vsel %vm1677_vm10, %v1666_v47, %v1393_v42  ;;  %5033 = vmatpush3.bf16.msra.mxu0 %v5030_v44  ;;  %v1535_v47 = vsel %vm1512_vm5, %v1502_v27, %v6485_v1  ;;  %v1349_v1 = vsel %vm667_vm0, %v1346_v52, %v1348_v38 }
 0x1f9   : > { %1008 = vrot.lane.b32.xlu1 %v945_v59, %s5353_s27  ;;  %908 = vrot.lane.b32.xlu0 %v6506_v50, %s5350_s24  ;;  %v1247_v59 = vrot.slane %v441_v49, 1  ;;  %v1568_v20 = vsel %vm1545_vm6, %v1535_v47, %v6501_v41 }
 0x1fa   : > { %4817 = vmatmul.mubr.msk.f32.gmra.mrb[20].mxu0 %vm1715_vm11, %v1699_v31  ;;  %v1601_v16 = vsel %vm1578_vm7, %v1568_v20, %v1094_v25  ;;  %v1471_v20 = vsel %vm1446_vm3, %v6137_v9, %v6534_v8 }
 0x1fb   : > { %v6561_v3 = vpop.permute.xlu1 %796  ;;  %v6563_v45 = vpop.permute.xlu0 %621  ;;  %v1248_v63 = vsel %vm490_vm1, %v1245_v37, %v1247_v59 }
 0x1fd   : > { %1406 = vrot.lane.b32.xlu1 %v1046_v5, %s5357_s29  ;;  %1307 = vrot.lane.b32.xlu0 %v947_v19, %s5356_s10 }
 0x1ff   : > { %v1192_v4 = vpop.permute.xlu1 %1191  ;;  %v6567_v50 = vpop.permute.xlu0 %1095 }
 0x200   : > { %v1634_v48 = vsel %vm1611_vm8, %v1601_v16, %v1192_v4  ;;  %v1470_v4 = vsel %vm1446_vm3, %v6067_v12, %v6478_v29  ;;  %v1504_v16 = vsel %vm1479_vm4, %v1471_v20, %v6561_v3 }
 0x201   : > { %1109 = vrot.lane.b32.xlu1 %v1046_v5, %s5354_s28  ;;  %1010 = vrot.lane.b32.xlu0 %v947_v19, %s5353_s27  ;;  %v1503_v49 = vsel %vm1479_vm4, %v1470_v4, %v6487_v40  ;;  %s4534_s27 = sshll.u32 %s8243_s20, 8 }
 0x202   : > { %v1536_v61 = vsel %vm1512_vm5, %v1503_v49, %v6503_v56 }
 0x203   : > { %v6578_v28 = vpop.permute.xlu1 %894  ;;  %v6580_v0 = vpop.permute.xlu0 %798  ;;  %v1569_v12 = vsel %vm1545_vm6, %v1536_v61, %v6532_v51 }
 0x204   : > { %v1602_v29 = vsel %vm1578_vm7, %v1569_v12, %v6567_v50 }
 0x205   : > { %1111 = vrot.lane.b32.xlu1 %v1048_v34, %s5354_s28  ;;  %1408 = vrot.lane.b32.xlu0 %v1048_v34, %s5357_s29 }
 0x207   : > { %v1294_v57 = vpop.permute.xlu1 %1293  ;;  %v1194_v13 = vpop.permute.xlu0 %1193 }
 0x208   : > { %v1667_v2 = vsel %vm1644_vm9, %v1634_v48, %v1294_v57  ;;  %v1635_v40 = vsel %vm1611_vm8, %v1602_v29, %v1194_v13 }
 0x209   : > { %1209 = vrot.lane.b32.xlu1 %v440_v26, %s5355_s14  ;;  %1207 = vrot.lane.b32.xlu0 %v439_v10, %s5355_s14 }
 0x20b   : > { %v997_v42 = vpop.permute.xlu1 %996  ;;  %v6604_v31 = vpop.permute.xlu0 %896 }
 0x20d   : > { %v4800_v5 = vpop.f32.mrb[8].mxu0  ;;  %1311 = vrot.lane.b32.xlu1 %v1248_v63, %s5356_s10  ;;  %1309 = vrot.lane.b32.xlu0 %v1246_v7, %s5356_s10  ;;  %s7925_s10 = scalar_lea.vmem %s8068_s11, %s4534_s27 }
 0x20e   : > { %v2057_v19 = vmul.f32 %v4800_v5, %v6227_v43  ;;  %v1922_v6 = vpop.f32.mrb[9].mxu0  ;;  %v1537_v5 = vsel %vm1512_vm5, %v1504_v16, %v6578_v28 }
 0x20f   : > { %v2056_v41 = vmul.f32 %v6227_v43, %v1922_v6  ;;  %v1395_v53 = vpop.permute.xlu1 %1394  ;;  %v1296_v25 = vpop.permute.xlu0 %1295  ;;  %v1570_v6 = vsel %vm1545_vm6, %v1537_v5, %v997_v42  ;;  %v1472_v42 = vsel %vm1446_vm3, %v6146_v21, %v6563_v45 }
 0x210   : > { %v2096_v34 = vadd.f32 %v6238_v24, %v2057_v19  ;;  %v1700_v26 = vsel %vm1677_vm10, %v1667_v2, %v1395_v53  ;;  %v1668_v57 = vsel %vm1644_vm9, %v1635_v40, %v1296_v25  ;;  %v1505_v4 = vsel %vm1479_vm4, %v1472_v42, %v6580_v0 }
 0x211   : > { %v2095_v10 = vadd.f32 %v6238_v24, %v2056_v41  ;;  %1412 = vrot.lane.b32.xlu1 %v1349_v1, %s5357_s29  ;;  %1410 = vrot.lane.b32.xlu0 %v1347_v22, %s5357_s29  ;;  %v1538_v49 = vsel %vm1512_vm5, %v1505_v4, %v6604_v31 }
 0x212   : > { %v2160_v18 = vmul.f32 0.01, %v2096_v34  ;;  %4819 = vmatprep.mubr.msk.f32.mxu0 %vm1715_vm11, %v1700_v26  ;;  %vm2128_vm1 = vcmp.gt.f32.partialorder %v2096_v34, 0.0 }
 0x213   : > { %v2159_v44 = vmul.f32 0.01, %v2095_v10  ;;  %v999_v37 = vpop.permute.xlu1 %998  ;;  %v6630_v39 = vpop.permute.xlu0 %623  ;;  %vm2127_vm0 = vcmp.gt.f32.partialorder %v2095_v10, 0.0 }
 0x214   : > { %v6641_v56 = vsel %vm2128_vm1, %v2096_v34, %v2160_v18  ;;  %v1571_v12 = vsel %vm1545_vm6, %v1538_v49, %v999_v37  ;;  %v1473_v16 = vsel %vm1446_vm3, %v6216_v62, %v6630_v39 }
 0x215   : > { %v6636_v59 = vsel %vm2127_vm0, %v2095_v10, %v2159_v44  ;;  %8134 = vst [vmem:[#allocation12_spill] sm:$0xff] %v6641_v56 }
 0x216   : > { %8133 = vst [vmem:[#allocation11_spill] sm:$0xff] %v6636_v59  ;;  %4854 = vmatprep.mubr.msk.f32.mxu1 %vm1677_vm10, %v6636_v59 }
 0x217   : > { %4855 = vmatmul.mubr.msk.f32.gmra.mrb[8].mxu1 %vm1677_vm10, %v6641_v56  ;;  %v1397_v11 = vpop.permute.xlu1 %1396  ;;  %v1098_v52 = vpop.permute.xlu0 %1097 }
 0x218   : > { %v1701_v51 = vsel %vm1677_vm10, %v1668_v57, %v1397_v11  ;;  %v1603_v1 = vsel %vm1578_vm7, %v1570_v6, %v1098_v52 }
 0x219   : > { %4820 = vmatmul.mubr.msk.f32.gmra.mrb[22].mxu0 %vm1715_vm11, %v1701_v51 }
 0x21b   : > { %v801_v50 = vpop.permute.xlu1 %800  ;;  %v6648_v15 = vpop.permute.xlu0 %625 }
 0x21c   : > { %v1506_v5 = vsel %vm1479_vm4, %v1473_v16, %v801_v50 }
 0x21f   : > { %v1196_v13 = vpop.permute.xlu1 %1195  ;;  %v1100_v27 = vpop.permute.xlu0 %1099 }
 0x220   : > { %v1636_v2 = vsel %vm1611_vm8, %v1603_v1, %v1196_v13  ;;  %v1604_v21 = vsel %vm1578_vm7, %v1571_v12, %v1100_v27 }
 0x223   : > { %v899_v63 = vpop.permute.xlu1 %898  ;;  %v6650_v7 = vpop.permute.xlu0 %802 }
 0x224   : > { %v1539_v6 = vsel %vm1512_vm5, %v1506_v5, %v899_v63 }
 0x227   : > { %v1298_v38 = vpop.permute.xlu1 %1297  ;;  %v1198_v47 = vpop.permute.xlu0 %1197 }
 0x228   : > { %v1669_v9 = vsel %vm1644_vm9, %v1636_v2, %v1298_v38  ;;  %v1637_v29 = vsel %vm1611_vm8, %v1604_v21, %v1198_v47 }
 0x22b   : > { %v1001_v48 = vpop.permute.xlu1 %1000  ;;  %v6659_v19 = vpop.permute.xlu0 %900 }
 0x22c   : > { %v1572_v2 = vsel %vm1545_vm6, %v1539_v6, %v1001_v48  ;;  %v1474_v48 = vsel %vm1446_vm3, %v6230_v23, %v6648_v15 }
 0x22d   : > { %v4803_v22 = vpop.f32.mrb[10].mxu0  ;;  %v1507_v42 = vsel %vm1479_vm4, %v1474_v48, %v6650_v7 }
 0x22e   : > { %v2059_v41 = vmul.f32 %v4803_v22, %v6227_v43  ;;  %v1932_v53 = vpop.f32.mrb[11].mxu0  ;;  %v1540_v4 = vsel %vm1512_vm5, %v1507_v42, %v6659_v19 }
 0x22f   : > { %v2058_v8 = vmul.f32 %v6227_v43, %v1932_v53  ;;  %v1399_v3 = vpop.permute.xlu1 %1398  ;;  %v1300_v25 = vpop.permute.xlu0 %1299 }
 0x230   : > { %v2098_v28 = vadd.f32 %v6238_v24, %v2059_v41  ;;  %v1702_v34 = vsel %vm1677_vm10, %v1669_v9, %v1399_v3  ;;  %v1670_v31 = vsel %vm1644_vm9, %v1637_v29, %v1300_v25 }
 0x231   : > { %v2097_v26 = vadd.f32 %v6238_v24, %v2058_v8  ;;  %4822 = vmatprep.mubr.msk.f32.mxu0 %vm1715_vm11, %v1702_v34 }
 0x232   : > { %v2162_v10 = vmul.f32 0.01, %v2098_v28  ;;  %vm2130_vm2 = vcmp.gt.f32.partialorder %v2098_v28, 0.0 }
 0x233   : > { %v2161_v18 = vmul.f32 0.01, %v2097_v26  ;;  %v1003_v61 = vpop.permute.xlu1 %1002  ;;  %v6678_v44 = vpop.permute.xlu0 %627  ;;  %vm2129_vm15 = vcmp.gt.f32.partialorder %v2097_v26, 0.0 }
 0x234   : > { %v6687_v0 = vsel %vm2130_vm2, %v2098_v28, %v2162_v10  ;;  %v1573_v12 = vsel %vm1545_vm6, %v1540_v4, %v1003_v61  ;;  %v1475_v5 = vsel %vm1446_vm3, %v6317_v14, %v6678_v44 }
 0x235   : > { %v6682_v45 = vsel %vm2129_vm15, %v2097_v26, %v2161_v18  ;;  %8136 = vst [vmem:[#allocation14_spill] sm:$0xff] %v6687_v0 }
 0x236   : > { %8135 = vst [vmem:[#allocation13_spill] sm:$0xff] %v6682_v45  ;;  %4857 = vmatprep.mubr.msk.f32.mxu1 %vm1677_vm10, %v6682_v45 }
 0x237   : > { %4858 = vmatmul.mubr.msk.f32.gmra.mrb[10].mxu1 %vm1677_vm10, %v6687_v0  ;;  %v1401_v40 = vpop.permute.xlu1 %1400  ;;  %v1102_v57 = vpop.permute.xlu0 %1101 }
 0x238   : > { %v1703_v37 = vsel %vm1677_vm10, %v1670_v31, %v1401_v40  ;;  %v1605_v41 = vsel %vm1578_vm7, %v1572_v2, %v1102_v57 }
 0x239   : > { %4823 = vmatmul.mubr.msk.f32.gmra.mrb[24].mxu0 %vm1715_vm11, %v1703_v37 }
 0x23b   : > { %v805_v11 = vpop.permute.xlu1 %804  ;;  %v6694_v52 = vpop.permute.xlu0 %629 }
 0x23c   : > { %v1508_v6 = vsel %vm1479_vm4, %v1475_v5, %v805_v11 }
 0x23f   : > { %v1200_v51 = vpop.permute.xlu1 %1199  ;;  %v1104_v13 = vpop.permute.xlu0 %1103 }
 0x240   : > { %v1638_v9 = vsel %vm1611_vm8, %v1605_v41, %v1200_v51  ;;  %v1606_v23 = vsel %vm1578_vm7, %v1573_v12, %v1104_v13 }
 0x243   : > { %v903_v27 = vpop.permute.xlu1 %902  ;;  %v6696_v38 = vpop.permute.xlu0 %806 }
 0x244   : > { %v1541_v41 = vsel %vm1512_vm5, %v1508_v6, %v903_v27 }
 0x247   : > { %v1302_v47 = vpop.permute.xlu1 %1301  ;;  %v1202_v20 = vpop.permute.xlu0 %1201 }
 0x248   : > { %v1671_v25 = vsel %vm1644_vm9, %v1638_v9, %v1302_v47  ;;  %v1639_v21 = vsel %vm1611_vm8, %v1606_v23, %v1202_v20 }
 0x24b   : > { %v1005_v1 = vpop.permute.xlu1 %1004  ;;  %v6703_v22 = vpop.permute.xlu0 %904 }
 0x24d   : > { %v4806_v53 = vpop.f32.mrb[12].mxu0 }
 0x24e   : > { %v2061_v8 = vmul.f32 %v4806_v53, %v6227_v43  ;;  %v1942_v3 = vpop.f32.mrb[13].mxu0 }
 0x24f   : > { %v2060_v62 = vmul.f32 %v6227_v43, %v1942_v3  ;;  %v1403_v39 = vpop.permute.xlu1 %1402  ;;  %v1304_v50 = vpop.permute.xlu0 %1303 }
 0x250   : > { %v2100_v63 = vadd.f32 %v6238_v24, %v2061_v8  ;;  %v1704_v28 = vsel %vm1677_vm10, %v1671_v25, %v1403_v39  ;;  %v1672_v19 = vsel %vm1644_vm9, %v1639_v21, %v1304_v50  ;;  %v1574_v8 = vsel %vm1545_vm6, %v1541_v41, %v1005_v1 }
 0x251   : > { %v2099_v34 = vadd.f32 %v6238_v24, %v2060_v62  ;;  %4825 = vmatprep.mubr.msk.f32.mxu0 %vm1715_vm11, %v1704_v28 }
 0x252   : > { %v2164_v26 = vmul.f32 0.01, %v2100_v63  ;;  %vm2132_vm13 = vcmp.gt.f32.partialorder %v2100_v63, 0.0 }
 0x253   : > { %v2163_v10 = vmul.f32 0.01, %v2099_v34  ;;  %v1007_v49 = vpop.permute.xlu1 %1006  ;;  %v6722_v18 = vpop.permute.xlu0 %631  ;;  %vm2131_vm12 = vcmp.gt.f32.partialorder %v2099_v34, 0.0 }
 0x254   : > { %v6731_v7 = vsel %vm2132_vm13, %v2100_v63, %v2164_v26 }
 0x255   : > { %v6726_v15 = vsel %vm2131_vm12, %v2099_v34, %v2163_v10  ;;  %8138 = vst [vmem:[#allocation16_spill] sm:$0xff] %v6731_v7  ;;  %v1476_v34 = vsel %vm1446_vm3, %v6326_v30, %v6694_v52 }
 0x256   : > { %8137 = vst [vmem:[#allocation15_spill] sm:$0xff] %v6726_v15  ;;  %4860 = vmatprep.mubr.msk.f32.mxu1 %vm1677_vm10, %v6726_v15  ;;  %v1509_v26 = vsel %vm1479_vm4, %v1476_v34, %v6696_v38 }
 0x257   : > { %4861 = vmatmul.mubr.msk.f32.gmra.mrb[12].mxu1 %vm1677_vm10, %v6731_v7  ;;  %v1405_v29 = vpop.permute.xlu1 %1404  ;;  %v1106_v31 = vpop.permute.xlu0 %1105  ;;  %v1542_v10 = vsel %vm1512_vm5, %v1509_v26, %v6703_v22 }
 0x258   : > { %v1705_v61 = vsel %vm1677_vm10, %v1672_v19, %v1405_v29  ;;  %v1607_v25 = vsel %vm1578_vm7, %v1574_v8, %v1106_v31 }
 0x259   : > { %4826 = vmatmul.mubr.msk.f32.gmra.mrb[26].mxu0 %vm1715_vm11, %v1705_v61 }
 0x25b   : > { %v809_v40 = vpop.permute.xlu1 %808  ;;  %v634_v57 = vpop.permute.xlu0 %633 }
 0x25c   : > { %v1478_v61 = vsel %vm1446_vm3, %v6417_v33, %v634_v57 }
 0x25f   : > { %v1204_v37 = vpop.permute.xlu1 %1203  ;;  %v1108_v51 = vpop.permute.xlu0 %1107 }
 0x260   : > { %v1640_v39 = vsel %vm1611_vm8, %v1607_v25, %v1204_v37  ;;  %v1477_v37 = vsel %vm1446_vm3, %v6408_v36, %v6722_v18 }
 0x263   : > { %v907_v13 = vpop.permute.xlu1 %906  ;;  %v811_v47 = vpop.permute.xlu0 %810 }
 0x267   : > { %v1306_v20 = vpop.permute.xlu1 %1305  ;;  %v1206_v16 = vpop.permute.xlu0 %1205 }
 0x268   : > { %v1673_v44 = vsel %vm1644_vm9, %v1640_v39, %v1306_v20  ;;  %v1510_v20 = vsel %vm1479_vm4, %v1477_v37, %v809_v40 }
 0x269   : > { %v1543_v6 = vsel %vm1512_vm5, %v1510_v20, %v907_v13  ;;  %v2549_v20 = vld [vmem:[%s8063_s6 + $0x10] sm:$0xff] }
 0x26a   : > { %v6742_v2 = vpop.f32.mrb[0].mxu1 }
 0x26b   : > { %v6745_v53 = vpop.f32.mrb[1].mxu1  ;;  %v1009_v9 = vpop.permute.xlu1 %1008 }
 0x26c   : > { %v909_v3 = vpop.permute.xlu0 %908  ;;  %v1576_v25 = vsel %vm1545_vm6, %v1543_v6, %v1009_v9 }
 0x26d   : > { %v4809_v62 = vpop.f32.mrb[14].mxu0 }
 0x26e   : > { %v2063_v50 = vmul.f32 %v4809_v62, %v6227_v43  ;;  %v1952_v14 = vpop.f32.mrb[15].mxu0 }
 0x26f   : > { %v2062_v11 = vmul.f32 %v6227_v43, %v1952_v14  ;;  %v1407_v63 = vpop.permute.xlu1 %1406 }
 0x270   : > { %v2102_v27 = vadd.f32 %v6238_v24, %v2063_v50  ;;  %v1706_v28 = vsel %vm1677_vm10, %v1673_v44, %v1407_v63  ;;  %v1308_v48 = vpop.permute.xlu0 %1307  ;;  %v6812_v44 = vld [vmem:[%s8059_s2] ss:$0 sm:$0xff] }
 0x271   : > { %v2101_v1 = vadd.f32 %v6238_v24, %v2062_v11  ;;  %4828 = vmatprep.mubr.msk.f32.mxu0 %vm1715_vm11, %v1706_v28  ;;  %v1575_v24 = vsel %vm1545_vm6, %v1542_v10, %v1007_v49  ;;  %v6821_v28 = vld [vmem:[%s8060_s3] ss:$0 sm:$0xff]  ;;  %v2548_v10 = vld [vmem:[%s8063_s6 + $0x8] sm:$0xff] }
 0x272   : > { %v2166_v42 = vmul.f32 0.01, %v2102_v27  ;;  %vm2134_vm0 = vcmp.gt.f32.partialorder %v2102_v27, 0.0  ;;  %v1608_v21 = vsel %vm1578_vm7, %v1575_v24, %v1108_v51  ;;  %v1511_v51 = vsel %vm1479_vm4, %v1478_v61, %v811_v47 }
 0x273   : > { %v2165_v4 = vmul.f32 0.01, %v2101_v1  ;;  %v1110_v43 = vpop.permute.xlu1 %1109  ;;  %vm2133_vm14 = vcmp.gt.f32.partialorder %v2101_v1, 0.0  ;;  %v1641_v52 = vsel %vm1611_vm8, %v1608_v21, %v1206_v16  ;;  %v1544_v16 = vsel %vm1512_vm5, %v1511_v51, %v909_v3 }
 0x274   : > { %v1011_v12 = vpop.permute.xlu0 %1010  ;;  %v6770_v30 = vsel %vm2134_vm0, %v2102_v27, %v2166_v42  ;;  %v1674_v22 = vsel %vm1644_vm9, %v1641_v52, %v1308_v48  ;;  %v1609_v57 = vsel %vm1578_vm7, %v1576_v25, %v1110_v43  ;;  %v2547_v43 = vld [vmem:[%s8063_s6] sm:$0xff] }
 0x275   : > { %v6765_v23 = vsel %vm2133_vm14, %v2101_v1, %v2165_v4  ;;  %8140 = vst [vmem:[#allocation18_spill] sm:$0xff] %v6770_v30  ;;  %v1577_v41 = vsel %vm1545_vm6, %v1544_v16, %v1011_v12  ;;  %v5018_v12 = vpack.c.bf16 %v2548_v10, %v2547_v43  ;;  %v2550_v16 = vld [vmem:[%s8063_s6 + $0x18] sm:$0xff] }
 0x276   : > { %8139 = vst [vmem:[#allocation17_spill] sm:$0xff] %v6765_v23  ;;  %4863 = vmatprep.mubr.msk.f32.mxu1 %vm1677_vm10, %v6765_v23 }
 0x277   : > { %4864 = vmatmul.mubr.msk.f32.gmra.mrb[14].mxu1 %vm1677_vm10, %v6770_v30  ;;  %v1112_v38 = vpop.permute.xlu1 %1111  ;;  %5019 = vmatprep.subr.bf16.mxu1 %v5018_v12 }
 0x278   : > { %v1409_v19 = vpop.permute.xlu0 %1408  ;;  %v1610_v33 = vsel %vm1578_vm7, %v1577_v41, %v1112_v38  ;;  %5021 = vmatpush3.bf16.msra.mxu1 %v5018_v12 }
 0x279   : > { %v1707_v49 = vsel %vm1677_vm10, %v1674_v22, %v1409_v19 }
 0x27a   : > { %4829 = vmatmul.mubr.msk.f32.gmra.mrb[28].mxu0 %vm1715_vm11, %v1707_v49 }
 0x27b   : > { %v1210_v29 = vpop.permute.xlu1 %1209 }
 0x27c   : > { %v1208_v31 = vpop.permute.xlu0 %1207  ;;  %v1643_v36 = vsel %vm1611_vm8, %v1610_v33, %v1210_v29 }
 0x27d   : > { %v1642_v18 = vsel %vm1611_vm8, %v1609_v57, %v1208_v31 }
 0x27f   : > { %v1312_v5 = vpop.permute.xlu1 %1311 }
 0x280   : > { %v1310_v8 = vpop.permute.xlu0 %1309  ;;  %v1676_v40 = vsel %vm1644_vm9, %v1643_v36, %v1312_v5  ;;  %v5022_v5 = vpack.c.bf16 %v2550_v16, %v2549_v20 }
 0x281   : > { %v1675_v3 = vsel %vm1644_vm9, %v1642_v18, %v1310_v8 }
 0x282   : > { %5023 = vmatprep.subr.bf16.mxu1 %v5022_v5 }
 0x283   : > { %v1413_v47 = vpop.permute.xlu1 %1412  ;;  %5025 = vmatpush3.bf16.msra.mxu1 %v5022_v5 }
 0x284   : > { %v1709_v13 = vsel %vm1677_vm10, %v1676_v40, %v1413_v47  ;;  %v1411_v62 = vpop.permute.xlu0 %1410 }
 0x285   : > { %v1708_v39 = vsel %vm1677_vm10, %v1675_v3, %v1411_v62  ;;  %v5358_v62 = vmov 0.0|0.0  }
 0x286   : > { %4831 = vmatprep.mubr.msk.f32.mxu0 %vm1715_vm11, %v1708_v39  ;;  %5082 = vmatprep.subr.bf16.mxu0 %v5358_v62 }
 0x287   : > { %4832 = vmatmul.mubr.msk.f32.gmra.mrb[30].mxu0 %vm1715_vm11, %v1709_v13 }
 0x288   : > { %4954 = vmatprep.mubr.msk.f32.mxu0 %vm1677_vm10, %v6273_v17 }
 0x28a   : > { %v6801_v9 = vpop.f32.mrb[2].mxu1 }
 0x28b   : > { %v6803_v50 = vpop.f32.mrb[3].mxu1  ;;  %4955 = vmatmul.mubr.msk.f32.vlgmr.msra.gmra.mrb[32].mxu0 %vm1677_vm10, %v6281_v35 }
 0x28c   : > { %4957 = vmatprep.mubr.msk.f32.mxu0 %vm1677_vm10, %v6364_v60 }
 0x28d   : > { %v4812_v14 = vpop.f32.mrb[16].mxu0 }
 0x28e   : > { %v2065_v11 = vmul.f32 %v6812_v44, %v4812_v14  ;;  %v1962_v63 = vpop.f32.mrb[17].mxu0 }
 0x28f   : > { %v2064_v27 = vmul.f32 %v6812_v44, %v1962_v63  ;;  %4958 = vmatmul.mubr.msk.f32.gmra.mrb[34].mxu0 %vm1677_vm10, %v6372_v55 }
 0x290   : > { %v2104_v48 = vadd.f32 %v6821_v28, %v2065_v11  ;;  %4960 = vmatprep.mubr.msk.f32.mxu0 %vm1677_vm10, %v6455_v54 }
 0x291   : > { %v2103_v1 = vadd.f32 %v6821_v28, %v2064_v27 }
 0x292   : > { %v2168_v34 = vmul.f32 0.01, %v2104_v48  ;;  %vm2136_vm5 = vcmp.gt.f32.partialorder %v2104_v48, 0.0 }
 0x293   : > { %v2167_v42 = vmul.f32 0.01, %v2103_v1  ;;  %4961 = vmatmul.mubr.msk.f32.gmra.mrb[36].mxu0 %vm1677_vm10, %v6463_v58  ;;  %vm2135_vm4 = vcmp.gt.f32.partialorder %v2103_v1, 0.0 }
 0x294   : > { %4963 = vmatprep.mubr.msk.f32.mxu0 %vm1677_vm10, %v6541_v46  ;;  %v6835_v4 = vsel %vm2136_vm5, %v2104_v48, %v2168_v34 }
 0x295   : > { %v6831_v26 = vsel %vm2135_vm4, %v2103_v1, %v2167_v42  ;;  %8142 = vst [vmem:[#allocation20_spill] sm:$0xff] %v6835_v4 }
 0x296   : > { %8141 = vst [vmem:[#allocation19_spill] sm:$0xff] %v6831_v26  ;;  %4866 = vmatprep.mubr.msk.f32.mxu1 %vm1677_vm10, %v6831_v26 }
 0x297   : > { %4867 = vmatmul.mubr.msk.f32.gmra.mrb[16].mxu1 %vm1677_vm10, %v6835_v4  ;;  %4964 = vmatmul.mubr.msk.f32.gmra.mrb[38].mxu0 %vm1677_vm10, %v6548_v32 }
 0x298   : > { %4966 = vmatprep.mubr.msk.f32.mxu0 %vm1677_vm10, %v6636_v59 }
 0x29b   : > { %4967 = vmatmul.mubr.msk.f32.gmra.mrb[40].mxu0 %vm1677_vm10, %v6641_v56 }
 0x29c   : > { %4969 = vmatprep.mubr.msk.f32.mxu0 %vm1677_vm10, %v6682_v45 }
 0x29f   : > { %4970 = vmatmul.mubr.msk.f32.gmra.mrb[42].mxu0 %vm1677_vm10, %v6687_v0 }
 0x2a0   : > { %4972 = vmatprep.mubr.msk.f32.mxu0 %vm1677_vm10, %v6726_v15 }
 0x2a3   : > { %4973 = vmatmul.mubr.msk.f32.gmra.mrb[44].mxu0 %vm1677_vm10, %v6731_v7 }
 0x2a4   : > { %4975 = vmatprep.mubr.msk.f32.mxu0 %vm1677_vm10, %v6765_v23 }
 0x2a7   : > { %4976 = vmatmul.mubr.msk.f32.gmra.mrb[46].mxu0 %vm1677_vm10, %v6770_v30 }
 0x2a8   : > { %4978 = vmatprep.mubr.msk.f32.mxu0 %vm1677_vm10, %v6831_v26 }
 0x2aa   : > { %v6865_v24 = vpop.f32.mrb[4].mxu1 }
 0x2ab   : > { %v6867_v21 = vpop.f32.mrb[5].mxu1  ;;  %4979 = vmatmul.mubr.msk.f32.gmra.mrb[48].mxu0 %vm1677_vm10, %v6835_v4 }
 0x2ad   : > { %v4815_v52 = vpop.f32.mrb[18].mxu0 }
 0x2ae   : > { %v2067_v38 = vmul.f32 %v6812_v44, %v4815_v52  ;;  %v1972_v22 = vpop.f32.mrb[19].mxu0 }
 0x2af   : > { %v2066_v19 = vmul.f32 %v6812_v44, %v1972_v22 }
 0x2b0   : > { %v2106_v49 = vadd.f32 %v6821_v28, %v2067_v38 }
 0x2b1   : > { %v2105_v29 = vadd.f32 %v6821_v28, %v2066_v19 }
 0x2b2   : > { %v2170_v31 = vmul.f32 0.01, %v2106_v49  ;;  %vm2138_vm7 = vcmp.gt.f32.partialorder %v2106_v49, 0.0 }
 0x2b3   : > { %v2169_v61 = vmul.f32 0.01, %v2105_v29  ;;  %vm2137_vm6 = vcmp.gt.f32.partialorder %v2105_v29, 0.0 }
 0x2b4   : > { %v6881_v51 = vsel %vm2138_vm7, %v2106_v49, %v2170_v31 }
 0x2b5   : > { %v6875_v37 = vsel %vm2137_vm6, %v2105_v29, %v2169_v61  ;;  %8144 = vst [vmem:[#allocation22_spill] sm:$0xff] %v6881_v51  ;;  %vm7221_vm6 = vmpackc.low %vm1446_vm3, %vm1446_vm3 }
 0x2b6   : > { %8143 = vst [vmem:[#allocation21_spill] sm:$0xff] %v6875_v37  ;;  %4869 = vmatprep.mubr.msk.f32.mxu1 %vm1677_vm10, %v6875_v37  ;;  %4981 = vmatprep.mubr.msk.f32.mxu0 %vm1677_vm10, %v6875_v37 }
 0x2b7   : > { %4870 = vmatmul.mubr.msk.f32.gmra.mrb[18].mxu1 %vm1677_vm10, %v6881_v51  ;;  %4982 = vmatmul.mubr.msk.f32.gmra.mrb[50].mxu0 %vm1677_vm10, %v6881_v51 }
 0x2ca   : > { %v6893_v6 = vpop.f32.mrb[6].mxu1 }
 0x2cb   : > { %v6895_v41 = vpop.f32.mrb[7].mxu1 }
 0x2cd   : > { %v4818_v8 = vpop.f32.mrb[20].mxu0 }
 0x2ce   : > { %v2069_v25 = vmul.f32 %v6812_v44, %v4818_v8  ;;  %v1982_v33 = vpop.f32.mrb[21].mxu0 }
 0x2cf   : > { %v2068_v57 = vmul.f32 %v6812_v44, %v1982_v33 }
 0x2d0   : > { %v2108_v36 = vadd.f32 %v6821_v28, %v2069_v25 }
 0x2d1   : > { %v2107_v18 = vadd.f32 %v6821_v28, %v2068_v57 }
 0x2d2   : > { %v2172_v40 = vmul.f32 0.01, %v2108_v36  ;;  %vm2140_vm9 = vcmp.gt.f32.partialorder %v2108_v36, 0.0 }
 0x2d3   : > { %v2171_v47 = vmul.f32 0.01, %v2107_v18  ;;  %vm2139_vm8 = vcmp.gt.f32.partialorder %v2107_v18, 0.0 }
 0x2d4   : > { %v6907_v13 = vsel %vm2140_vm9, %v2108_v36, %v2172_v40 }
 0x2d5   : > { %v6901_v3 = vsel %vm2139_vm8, %v2107_v18, %v2171_v47  ;;  %8146 = vst [vmem:[#allocation24_spill] sm:$0xff] %v6907_v13 }
 0x2d6   : > { %8145 = vst [vmem:[#allocation23_spill] sm:$0xff] %v6901_v3  ;;  %4872 = vmatprep.mubr.msk.f32.mxu1 %vm1677_vm10, %v6901_v3  ;;  %4984 = vmatprep.mubr.msk.f32.mxu0 %vm1677_vm10, %v6901_v3 }
 0x2d7   : > { %4873 = vmatmul.mubr.msk.f32.gmra.mrb[20].mxu1 %vm1677_vm10, %v6907_v13  ;;  %4985 = vmatmul.mubr.msk.f32.gmra.mrb[52].mxu0 %vm1677_vm10, %v6907_v13 }
 0x2ea   : > { %v6914_v39 = vpop.f32.mrb[8].mxu1 }
 0x2eb   : > { %v6916_v14 = vpop.f32.mrb[9].mxu1 }
 0x2ec   : > { %v4821_v11 = vpop.f32.mrb[22].mxu0 }
 0x2ed   : > { %v2071_v63 = vmul.f32 %v6812_v44, %v4821_v11  ;;  %v1992_v27 = vpop.f32.mrb[23].mxu0 }
 0x2ee   : > { %v2070_v48 = vmul.f32 %v6812_v44, %v1992_v27 }
 0x2ef   : > { %v2110_v1 = vadd.f32 %v6821_v28, %v2071_v63 }
 0x2f0   : > { %v2109_v34 = vadd.f32 %v6821_v28, %v2070_v48 }
 0x2f1   : > { %v2174_v42 = vmul.f32 0.01, %v2110_v1  ;;  %vm2142_vm1 = vcmp.gt.f32.partialorder %v2110_v1, 0.0 }
 0x2f2   : > { %v2173_v43 = vmul.f32 0.01, %v2109_v34  ;;  %vm2141_vm11 = vcmp.gt.f32.partialorder %v2109_v34, 0.0 }
 0x2f3   : > { %v6928_v12 = vsel %vm2142_vm1, %v2110_v1, %v2174_v42 }
 0x2f4   : > { %v6922_v10 = vsel %vm2141_vm11, %v2109_v34, %v2173_v43  ;;  %8148 = vst [vmem:[#allocation26_spill] sm:$0xff] %v6928_v12 }
 0x2f5   : > { %8147 = vst [vmem:[#allocation25_spill] sm:$0xff] %v6922_v10  ;;  %4875 = vmatprep.mubr.msk.f32.mxu1 %vm1677_vm10, %v6922_v10  ;;  %4987 = vmatprep.mubr.msk.f32.mxu0 %vm1677_vm10, %v6922_v10 }
 0x2f6   : > { %4876 = vmatmul.mubr.msk.f32.gmra.mrb[22].mxu1 %vm1677_vm10, %v6928_v12  ;;  %4988 = vmatmul.mubr.msk.f32.gmra.mrb[54].mxu0 %vm1677_vm10, %v6928_v12 }
 0x30a   : > { %v6934_v52 = vpop.f32.mrb[10].mxu1 }
 0x30b   : > { %v6936_v38 = vpop.f32.mrb[11].mxu1 }
 0x30c   : > { %v4824_v22 = vpop.f32.mrb[24].mxu0 }
 0x30d   : > { %v2073_v19 = vmul.f32 %v6812_v44, %v4824_v22  ;;  %v2002_v49 = vpop.f32.mrb[25].mxu0 }
 0x30e   : > { %v2072_v29 = vmul.f32 %v6812_v44, %v2002_v49 }
 0x30f   : > { %v2112_v31 = vadd.f32 %v6821_v28, %v2073_v19 }
 0x310   : > { %v2111_v61 = vadd.f32 %v6821_v28, %v2072_v29 }
 0x311   : > { %v2176_v20 = vmul.f32 0.01, %v2112_v31  ;;  %vm2144_vm2 = vcmp.gt.f32.partialorder %v2112_v31, 0.0 }
 0x312   : > { %v2175_v16 = vmul.f32 0.01, %v2111_v61  ;;  %vm2143_vm15 = vcmp.gt.f32.partialorder %v2111_v61, 0.0 }
 0x313   : > { %v6948_v8 = vsel %vm2144_vm2, %v2112_v31, %v2176_v20 }
 0x314   : > { %v6942_v5 = vsel %vm2143_vm15, %v2111_v61, %v2175_v16  ;;  %8150 = vst [vmem:[#allocation28_spill] sm:$0xff] %v6948_v8 }
 0x315   : > { %8149 = vst [vmem:[#allocation27_spill] sm:$0xff] %v6942_v5  ;;  %4878 = vmatprep.mubr.msk.f32.mxu1 %vm1677_vm10, %v6942_v5  ;;  %4990 = vmatprep.mubr.msk.f32.mxu0 %vm1677_vm10, %v6942_v5 }
 0x316   : > { %4879 = vmatmul.mubr.msk.f32.gmra.mrb[24].mxu1 %vm1677_vm10, %v6948_v8  ;;  %4991 = vmatmul.mubr.msk.f32.gmra.mrb[56].mxu0 %vm1677_vm10, %v6948_v8 }
 0x32a   : > { %v6954_v25 = vpop.f32.mrb[12].mxu1 }
 0x32b   : > { %v6956_v33 = vpop.f32.mrb[13].mxu1 }
 0x32c   : > { %v4827_v57 = vpop.f32.mrb[26].mxu0 }
 0x32d   : > { %v2075_v36 = vmul.f32 %v6812_v44, %v4827_v57  ;;  %v2012_v18 = vpop.f32.mrb[27].mxu0 }
 0x32e   : > { %v2074_v40 = vmul.f32 %v6812_v44, %v2012_v18 }
 0x32f   : > { %v2114_v47 = vadd.f32 %v6821_v28, %v2075_v36 }
 0x330   : > { %v2113_v11 = vadd.f32 %v6821_v28, %v2074_v40 }
 0x331   : > { %v2178_v63 = vmul.f32 0.01, %v2114_v47  ;;  %vm2146_vm13 = vcmp.gt.f32.partialorder %v2114_v47, 0.0 }
 0x332   : > { %v2177_v27 = vmul.f32 0.01, %v2113_v11  ;;  %vm2145_vm12 = vcmp.gt.f32.partialorder %v2113_v11, 0.0 }
 0x333   : > { %v6968_v1 = vsel %vm2146_vm13, %v2114_v47, %v2178_v63 }
 0x334   : > { %v6962_v48 = vsel %vm2145_vm12, %v2113_v11, %v2177_v27  ;;  %8152 = vst [vmem:[#allocation30_spill] sm:$0xff] %v6968_v1  ;;  %v6999_v11 = vld [vmem:[%s8066_s9] ss:$0 sm:$0xff] }
 0x335   : > { %8151 = vst [vmem:[#allocation29_spill] sm:$0xff] %v6962_v48  ;;  %4881 = vmatprep.mubr.msk.f32.mxu1 %vm1677_vm10, %v6962_v48  ;;  %4993 = vmatprep.mubr.msk.f32.mxu0 %vm1677_vm10, %v6962_v48 }
 0x336   : > { %4882 = vmatmul.mubr.msk.f32.gmra.mrb[26].mxu1 %vm1677_vm10, %v6968_v1  ;;  %4994 = vmatmul.mubr.msk.f32.gmra.mrb[58].mxu0 %vm1677_vm10, %v6968_v1 }
 0x34a   : > { %v6974_v34 = vpop.f32.mrb[14].mxu1 }
 0x34b   : > { %v6976_v42 = vpop.f32.mrb[15].mxu1 }
 0x34d   : > { %v4830_v43 = vpop.f32.mrb[28].mxu0 }
 0x34e   : > { %v2077_v22 = vmul.f32 %v6812_v44, %v4830_v43  ;;  %v2022_v19 = vpop.f32.mrb[29].mxu0 }
 0x34f   : > { %v2076_v49 = vmul.f32 %v6812_v44, %v2022_v19 }
 0x350   : > { %v2116_v29 = vadd.f32 %v6821_v28, %v2077_v22 }
 0x351   : > { %v2115_v31 = vadd.f32 %v6821_v28, %v2076_v49 }
 0x352   : > { %v2180_v61 = vmul.f32 0.01, %v2116_v29  ;;  %vm2148_vm0 = vcmp.gt.f32.partialorder %v2116_v29, 0.0 }
 0x353   : > { %v2179_v20 = vmul.f32 0.01, %v2115_v31  ;;  %vm2147_vm14 = vcmp.gt.f32.partialorder %v2115_v31, 0.0 }
 0x354   : > { %v6988_v57 = vsel %vm2148_vm0, %v2116_v29, %v2180_v61 }
 0x355   : > { %v6982_v16 = vsel %vm2147_vm14, %v2115_v31, %v2179_v20  ;;  %8154 = vst [vmem:[#allocation32_spill] sm:$0xff] %v6988_v57 }
 0x356   : > { %8153 = vst [vmem:[#allocation31_spill] sm:$0xff] %v6982_v16  ;;  %4884 = vmatprep.mubr.msk.f32.mxu1 %vm1677_vm10, %v6982_v16  ;;  %4996 = vmatprep.mubr.msk.f32.mxu0 %vm1677_vm10, %v6982_v16 }
 0x357   : > { %4885 = vmatmul.mubr.msk.f32.gmra.mrb[28].mxu1 %vm1677_vm10, %v6988_v57  ;;  %4997 = vmatmul.mubr.msk.f32.gmra.mrb[60].mxu0 %vm1677_vm10, %v6988_v57 }
 0x35a   : > { %v4833_v36 = vpop.f32.mrb[30].mxu0 }
 0x35b   : > { %v2079_v18 = vmul.f32 %v6812_v44, %v4833_v36  ;;  %v2032_v40 = vpop.f32.mrb[31].mxu0 }
 0x35c   : > { %v2078_v47 = vmul.f32 %v6812_v44, %v2032_v40 }
 0x35d   : > { %v2118_v63 = vadd.f32 %v6821_v28, %v2079_v18 }
 0x35e   : > { %v2117_v27 = vadd.f32 %v6821_v28, %v2078_v47  ;;  %v4956_v43 = vpop.f32.mrb[32].mxu0 }
 0x35f   : > { %v2182_v22 = vmul.f32 0.01, %v2118_v63  ;;  %v2866_v19 = vadd.f32 %v4956_v43, %v6999_v11  ;;  %v2860_v49 = vpop.f32.mrb[33].mxu0  ;;  %vm2150_vm5 = vcmp.gt.f32.partialorder %v2118_v63, 0.0 }
 0x360   : > { %v2181_v29 = vmul.f32 0.01, %v2117_v27  ;;  %v2861_v31 = vadd.f32 %v6999_v11, %v2860_v49  ;;  %vm2149_vm4 = vcmp.gt.f32.partialorder %v2117_v27, 0.0 }
 0x361   : > { %v7012_v18 = vsel %vm2150_vm5, %v2118_v63, %v2182_v22 }
 0x362   : > { %v5083_v44 = vpack.c.bf16 %v2866_v19, %v2861_v31  ;;  %v4959_v61 = vpop.f32.mrb[34].mxu0  ;;  %v7005_v20 = vsel %vm2149_vm4, %v2117_v27, %v2181_v29  ;;  %8156 = vst [vmem:[#allocation34_spill] sm:$0xff] %v7012_v18 }
 0x363   : > { %8155 = vst [vmem:[#allocation33_spill] sm:$0xff] %v7005_v20  ;;  %v2876_v36 = vadd.f32 %v4959_v61, %v6999_v11  ;;  %4887 = vmatprep.mubr.msk.f32.mxu1 %vm1677_vm10, %v7005_v20  ;;  %v2870_v28 = vpop.f32.mrb[35].mxu0  ;;  %4999 = vmatprep.mubr.msk.f32.mxu0 %vm1677_vm10, %v7005_v20 }
 0x364   : > { %v2871_v40 = vadd.f32 %v6999_v11, %v2870_v28  ;;  %4888 = vmatmul.mubr.msk.f32.gmra.mrb[30].mxu1 %vm1677_vm10, %v7012_v18  ;;  %5000 = vmatmul.mubr.msk.f32.gmra.mrb[62].mxu0 %vm1677_vm10, %v7012_v18 }
 0x365   : > { %5084 = vmatpush1.bf16.msra.mxu0 %v5083_v44  ;;  %4898 = vmatprep.mubr.msk.f32.mxu1 %vm1677_vm10, %v6273_v17 }
 0x366   : > { %v5086_v47 = vpack.c.bf16 %v2876_v36, %v2871_v40  ;;  %v4962_v27 = vpop.f32.mrb[36].mxu0  ;;  %5085 = vmatprep.subr.bf16.mxu0 %v5358_v62 }
 0x367   : > { %v2886_v43 = vadd.f32 %v4962_v27, %v6999_v11  ;;  %v2880_v63 = vpop.f32.mrb[37].mxu0 }
 0x368   : > { %v2881_v22 = vadd.f32 %v6999_v11, %v2880_v63  ;;  %4899 = vmatmul.mubr.msk.f32.vlgmr.msra.gmra.mrb[32].mxu1 %vm1677_vm10, %v6281_v35 }
 0x369   : > { %5087 = vmatpush1.bf16.msra.mxu0 %v5086_v47  ;;  %4901 = vmatprep.mubr.msk.f32.mxu1 %vm1677_vm10, %v6364_v60 }
 0x36a   : > { %v5089_v19 = vpack.c.bf16 %v2886_v43, %v2881_v22  ;;  %v7028_v49 = vpop.f32.mrb[16].mxu1  ;;  %v4965_v29 = vpop.f32.mrb[38].mxu0  ;;  %5088 = vmatprep.subr.bf16.mxu0 %v5358_v62 }
 0x36b   : > { %v2896_v31 = vadd.f32 %v4965_v29, %v6999_v11  ;;  %v7032_v44 = vpop.f32.mrb[17].mxu1  ;;  %v2890_v61 = vpop.f32.mrb[39].mxu0 }
 0x36c   : > { %v2891_v36 = vadd.f32 %v6999_v11, %v2890_v61  ;;  %4902 = vmatmul.mubr.msk.f32.gmra.mrb[34].mxu1 %vm1677_vm10, %v6372_v55 }
 0x36d   : > { %5090 = vmatpush1.bf16.msra.mxu0 %v5089_v19  ;;  %4904 = vmatprep.mubr.msk.f32.mxu1 %vm1677_vm10, %v6455_v54 }
 0x36e   : > { %v5092_v28 = vpack.c.bf16 %v2896_v31, %v2891_v36  ;;  %v4968_v40 = vpop.f32.mrb[40].mxu0  ;;  %5091 = vmatprep.subr.bf16.mxu0 %v5358_v62 }
 0x36f   : > { %v2906_v47 = vadd.f32 %v4968_v40, %v6999_v11  ;;  %v2900_v27 = vpop.f32.mrb[41].mxu0 }
 0x370   : > { %v2901_v43 = vadd.f32 %v6999_v11, %v2900_v27  ;;  %4905 = vmatmul.mubr.msk.f32.gmra.mrb[36].mxu1 %vm1677_vm10, %v6463_v58 }
 0x371   : > { %5093 = vmatpush1.bf16.msra.mxu0 %v5092_v28  ;;  %4907 = vmatprep.mubr.msk.f32.mxu1 %vm1677_vm10, %v6541_v46 }
 0x372   : > { %v5095_v63 = vpack.c.bf16 %v2906_v47, %v2901_v43  ;;  %v4971_v22 = vpop.f32.mrb[42].mxu0  ;;  %5094 = vmatprep.subr.bf16.mxu0 %v5358_v62 }
 0x373   : > { %v2916_v19 = vadd.f32 %v4971_v22, %v6999_v11  ;;  %v2910_v29 = vpop.f32.mrb[43].mxu0 }
 0x374   : > { %v2911_v31 = vadd.f32 %v6999_v11, %v2910_v29  ;;  %4908 = vmatmul.mubr.msk.f32.gmra.mrb[38].mxu1 %vm1677_vm10, %v6548_v32 }
 0x375   : > { %5096 = vmatpush1.bf16.msra.mxu0 %v5095_v63  ;;  %4910 = vmatprep.mubr.msk.f32.mxu1 %vm1677_vm10, %v6636_v59 }
 0x376   : > { %v5098_v61 = vpack.c.bf16 %v2916_v19, %v2911_v31  ;;  %v4974_v36 = vpop.f32.mrb[44].mxu0  ;;  %5097 = vmatprep.subr.bf16.mxu0 %v5358_v62 }
 0x377   : > { %v2926_v28 = vadd.f32 %v4974_v36, %v6999_v11  ;;  %v2920_v40 = vpop.f32.mrb[45].mxu0 }
 0x378   : > { %v2921_v47 = vadd.f32 %v6999_v11, %v2920_v40  ;;  %4911 = vmatmul.mubr.msk.f32.gmra.mrb[40].mxu1 %vm1677_vm10, %v6641_v56 }
 0x379   : > { %5099 = vmatpush1.bf16.msra.mxu0 %v5098_v61  ;;  %4913 = vmatprep.mubr.msk.f32.mxu1 %vm1677_vm10, %v6682_v45 }
 0x37a   : > { %v5101_v27 = vpack.c.bf16 %v2926_v28, %v2921_v47  ;;  %v4977_v43 = vpop.f32.mrb[46].mxu0  ;;  %5100 = vmatprep.subr.bf16.mxu0 %v5358_v62 }
 0x37b   : > { %v2936_v63 = vadd.f32 %v4977_v43, %v6999_v11  ;;  %v2930_v22 = vpop.f32.mrb[47].mxu0 }
 0x37c   : > { %v2931_v19 = vadd.f32 %v6999_v11, %v2930_v22  ;;  %4914 = vmatmul.mubr.msk.f32.gmra.mrb[42].mxu1 %vm1677_vm10, %v6687_v0 }
 0x37d   : > { %5102 = vmatpush1.bf16.msra.mxu0 %v5101_v27  ;;  %4916 = vmatprep.mubr.msk.f32.mxu1 %vm1677_vm10, %v6726_v15 }
 0x37e   : > { %v5104_v29 = vpack.c.bf16 %v2936_v63, %v2931_v19  ;;  %v4980_v31 = vpop.f32.mrb[48].mxu0  ;;  %5103 = vmatprep.subr.bf16.mxu0 %v5358_v62 }
 0x37f   : > { %v2946_v61 = vadd.f32 %v4980_v31, %v6999_v11  ;;  %v2940_v36 = vpop.f32.mrb[49].mxu0  ;;  %v7114_v31 = vld [vmem:[%s8062_s5] ss:$0 sm:$0xff] }
 0x380   : > { %v2941_v28 = vadd.f32 %v6999_v11, %v2940_v36  ;;  %4917 = vmatmul.mubr.msk.f32.gmra.mrb[44].mxu1 %vm1677_vm10, %v6731_v7 }
 0x381   : > { %5105 = vmatpush1.bf16.msra.mxu0 %v5104_v29  ;;  %4919 = vmatprep.mubr.msk.f32.mxu1 %vm1677_vm10, %v6765_v23 }
 0x382   : > { %v5107_v40 = vpack.c.bf16 %v2946_v61, %v2941_v28  ;;  %5106 = vmatprep.subr.bf16.mxu0 %v5358_v62  ;;  %v7122_v61 = vadd.f32 %v7114_v31, %v6745_v53 }
 0x384   : > { %4920 = vmatmul.mubr.msk.f32.gmra.mrb[46].mxu1 %vm1677_vm10, %v6770_v30 }
 0x385   : > { %5108 = vmatpush1.bf16.msra.mxu0 %v5107_v40  ;;  %4922 = vmatprep.mubr.msk.f32.mxu1 %vm1677_vm10, %v6831_v26 }
 0x386   : > { %5109 = vmatprep.subr.bf16.mxu0 %v5358_v62 }
 0x388   : > { %4923 = vmatmul.mubr.msk.f32.gmra.mrb[48].mxu1 %vm1677_vm10, %v6835_v4 }
 0x389   : > { %4925 = vmatprep.mubr.msk.f32.mxu1 %vm1677_vm10, %v6875_v37 }
 0x38a   : > { %v7084_v47 = vpop.f32.mrb[18].mxu1  ;;  %v4983_v27 = vpop.f32.mrb[50].mxu0 }
 0x38b   : > { %v2956_v43 = vadd.f32 %v4983_v27, %v6999_v11  ;;  %v7087_v63 = vpop.f32.mrb[19].mxu1  ;;  %v2950_v22 = vpop.f32.mrb[51].mxu0 }
 0x38c   : > { %v2951_v19 = vadd.f32 %v6999_v11, %v2950_v22  ;;  %4926 = vmatmul.mubr.msk.f32.gmra.mrb[50].mxu1 %vm1677_vm10, %v6881_v51 }
 0x38d   : > { %4928 = vmatprep.mubr.msk.f32.mxu1 %vm1677_vm10, %v6901_v3 }
 0x38e   : > { %v5110_v29 = vpack.c.bf16 %v2956_v43, %v2951_v19 }
 0x390   : > { %4929 = vmatmul.mubr.msk.f32.gmra.mrb[52].mxu1 %vm1677_vm10, %v6907_v13  ;;  %5111 = vmatpush1.bf16.msra.mxu0 %v5110_v29 }
 0x391   : > { %4931 = vmatprep.mubr.msk.f32.mxu1 %vm1677_vm10, %v6922_v10  ;;  %5112 = vmatprep.subr.bf16.mxu0 %v5358_v62 }
 0x394   : > { %4932 = vmatmul.mubr.msk.f32.gmra.mrb[54].mxu1 %vm1677_vm10, %v6928_v12 }
 0x395   : > { %4934 = vmatprep.mubr.msk.f32.mxu1 %vm1677_vm10, %v6942_v5 }
 0x398   : > { %4935 = vmatmul.mubr.msk.f32.gmra.mrb[56].mxu1 %vm1677_vm10, %v6948_v8 }
 0x399   : > { %4937 = vmatprep.mubr.msk.f32.mxu1 %vm1677_vm10, %v6962_v48 }
 0x39c   : > { %4938 = vmatmul.mubr.msk.f32.gmra.mrb[58].mxu1 %vm1677_vm10, %v6968_v1 }
 0x39d   : > { %4940 = vmatprep.mubr.msk.f32.mxu1 %vm1677_vm10, %v6982_v16 }
 0x3a0   : > { %4941 = vmatmul.mubr.msk.f32.gmra.mrb[60].mxu1 %vm1677_vm10, %v6988_v57 }
 0x3a1   : > { %4943 = vmatprep.mubr.msk.f32.mxu1 %vm1677_vm10, %v7005_v20 }
 0x3a4   : > { %4944 = vmatmul.mubr.msk.f32.gmra.mrb[62].mxu1 %vm1677_vm10, %v7012_v18 }
 0x3a5   : > { %4712 = vmatprep.mubr.msk.f32.mxu1 %vm1446_vm3, %v7122_v61 }
 0x3aa   : > { %v7128_v36 = vpop.f32.mrb[20].mxu1  ;;  %v4986_v28 = vpop.f32.mrb[52].mxu0 }
 0x3ab   : > { %v2966_v40 = vadd.f32 %v4986_v28, %v6999_v11  ;;  %v7131_v27 = vpop.f32.mrb[21].mxu1  ;;  %v2960_v43 = vpop.f32.mrb[53].mxu0 }
 0x3ac   : > { %v2961_v22 = vadd.f32 %v6999_v11, %v2960_v43 }
 0x3ae   : > { %v5113_v19 = vpack.c.bf16 %v2966_v40, %v2961_v22 }
 0x3b0   : > { %5114 = vmatpush1.bf16.msra.mxu0 %v5113_v19 }
 0x3b1   : > { %5115 = vmatprep.subr.bf16.mxu0 %v5358_v62 }
 0x3c9   : > { %v7135_v53 = vpop.f32.mrb[22].mxu1  ;;  %v4989_v29 = vpop.f32.mrb[54].mxu0 }
 0x3ca   : > { %v2976_v18 = vadd.f32 %v4989_v29, %v6999_v11  ;;  %v7138_v20 = vpop.f32.mrb[23].mxu1  ;;  %v2970_v57 = vpop.f32.mrb[55].mxu0 }
 0x3cb   : > { %v2971_v16 = vadd.f32 %v6999_v11, %v2970_v57 }
 0x3cd   : > { %v5116_v28 = vpack.c.bf16 %v2976_v18, %v2971_v16 }
 0x3cf   : > { %5117 = vmatpush1.bf16.msra.mxu0 %v5116_v28 }
 0x3d0   : > { %5118 = vmatprep.subr.bf16.mxu0 %v5358_v62 }
 0x3e9   : > { %v7142_v1 = vpop.f32.mrb[24].mxu1  ;;  %v4992_v40 = vpop.f32.mrb[56].mxu0 }
 0x3ea   : > { %v2986_v43 = vadd.f32 %v4992_v40, %v6999_v11  ;;  %v7145_v22 = vpop.f32.mrb[25].mxu1  ;;  %v2980_v19 = vpop.f32.mrb[57].mxu0 }
 0x3eb   : > { %v2981_v48 = vadd.f32 %v6999_v11, %v2980_v19 }
 0x3ed   : > { %v5119_v29 = vpack.c.bf16 %v2986_v43, %v2981_v48 }
 0x3ef   : > { %5120 = vmatpush1.bf16.msra.mxu0 %v5119_v29 }
 0x3f0   : > { %5121 = vmatprep.subr.bf16.mxu0 %v5358_v62 }
 0x409   : > { %v7149_v8 = vpop.f32.mrb[26].mxu1  ;;  %v4995_v16 = vpop.f32.mrb[58].mxu0 }
 0x40a   : > { %v2996_v57 = vadd.f32 %v4995_v16, %v6999_v11  ;;  %v7152_v18 = vpop.f32.mrb[27].mxu1  ;;  %v2990_v28 = vpop.f32.mrb[59].mxu0 }
 0x40b   : > { %v2991_v5 = vadd.f32 %v6999_v11, %v2990_v28 }
 0x40d   : > { %v5122_v40 = vpack.c.bf16 %v2996_v57, %v2991_v5 }
 0x40f   : > { %5123 = vmatpush1.bf16.msra.mxu0 %v5122_v40 }
 0x410   : > { %5124 = vmatprep.subr.bf16.mxu0 %v5358_v62 }
 0x42a   : > { %v7156_v12 = vpop.f32.mrb[28].mxu1  ;;  %v4998_v48 = vpop.f32.mrb[60].mxu0 }
 0x42b   : > { %v3006_v43 = vadd.f32 %v4998_v48, %v6999_v11  ;;  %v7159_v19 = vpop.f32.mrb[29].mxu1  ;;  %v3000_v29 = vpop.f32.mrb[61].mxu0  ;;  %v7172_v48 = vld [vmem:[%s8064_s7] ss:$0 sm:$0xff] }
 0x42c   : > { %v3001_v10 = vadd.f32 %v6999_v11, %v3000_v29 }
 0x42e   : > { %v5125_v16 = vpack.c.bf16 %v3006_v43, %v3001_v10 }
 0x430   : > { %5126 = vmatpush1.bf16.msra.mxu0 %v5125_v16 }
 0x431   : > { %5127 = vmatprep.subr.bf16.mxu0 %v5358_v62 }
 0x437   : > { %v7163_v13 = vpop.f32.mrb[30].mxu1  ;;  %v5001_v5 = vpop.f32.mrb[62].mxu0 }
 0x438   : > { %v3016_v57 = vadd.f32 %v5001_v5, %v6999_v11  ;;  %v7166_v28 = vpop.f32.mrb[31].mxu1  ;;  %v3010_v40 = vpop.f32.mrb[63].mxu0 }
 0x439   : > { %v3011_v3 = vadd.f32 %v6999_v11, %v3010_v40 }
 0x43b   : > { %v5128_v29 = vpack.c.bf16 %v3016_v57, %v3011_v3  ;;  %v4900_v10 = vpop.f32.mrb[32].mxu1 }
 0x43c   : > { %v2630_v43 = vadd.f32 %v4900_v10, %v7172_v48  ;;  %v2624_v62 = vpop.f32.mrb[33].mxu1 }
 0x43d   : > { %v2625_v16 = vadd.f32 %v7172_v48, %v2624_v62  ;;  %5129 = vmatpush1.bf16.msra.mxu0 %v5128_v29 }
 0x43f   : > { %v5037_v51 = vpack.c.bf16 %v2630_v43, %v2625_v16  ;;  %v4903_v5 = vpop.f32.mrb[34].mxu1 }
 0x440   : > { %v2640_v37 = vadd.f32 %v4903_v5, %v7172_v48  ;;  %v2634_v4 = vpop.f32.mrb[35].mxu1 }
 0x441   : > { %v2635_v11 = vadd.f32 %v7172_v48, %v2634_v4 }
 0x443   : > { %v5043_v40 = vpack.c.bf16 %v2640_v37, %v2635_v11  ;;  %v4906_v26 = vpop.f32.mrb[36].mxu1 }
 0x444   : > { %v7179_v30 = vadd.f32 %v4906_v26, %v7172_v48  ;;  %v2644_v3 = vpop.f32.mrb[37].mxu1 }
 0x445   : > { %v7182_v57 = vadd.f32 %v7172_v48, %v2644_v3 }
 0x447   : > { %v5049_v10 = vpack.c.bf16 %v7179_v30, %v7182_v57  ;;  %v4909_v29 = vpop.f32.mrb[38].mxu1 }
 0x448   : > { %v7187_v43 = vadd.f32 %v4909_v29, %v7172_v48  ;;  %v2654_v62 = vpop.f32.mrb[39].mxu1 }
 0x449   : > { %v7190_v16 = vadd.f32 %v7172_v48, %v2654_v62 }
 0x44b   : > { %v4912_v26 = vpop.f32.mrb[40].mxu1 }
 0x44c   : > { %v7195_v37 = vadd.f32 %v4912_v26, %v7172_v48  ;;  %v2664_v5 = vpop.f32.mrb[41].mxu1 }
 0x44d   : > { %v7198_v11 = vadd.f32 %v7172_v48, %v2664_v5 }
 0x44f   : > { %v4915_v3 = vpop.f32.mrb[42].mxu1 }
 0x450   : > { %v7203_v57 = vadd.f32 %v4915_v3, %v7172_v48  ;;  %v2674_v29 = vpop.f32.mrb[43].mxu1 }
 0x451   : > { %v7206_v62 = vadd.f32 %v7172_v48, %v2674_v29 }
 0x453   : > { %v4918_v26 = vpop.f32.mrb[44].mxu1 }
 0x454   : > { %v7211_v23 = vadd.f32 %v4918_v26, %v7172_v48  ;;  %v2684_v5 = vpop.f32.mrb[45].mxu1 }
 0x455   : > { %v2685_v7 = vadd.f32 %v7172_v48, %v2684_v5 }
 0x457   : > { %v5073_v30 = vpack.c.bf16 %v7211_v23, %v2685_v7  ;;  %v4921_v15 = vpop.f32.mrb[46].mxu1 }
 0x458   : > { %v2700_v3 = vadd.f32 %v4921_v15, %v7172_v48  ;;  %v2694_v0 = vpop.f32.mrb[47].mxu1 }
 0x459   : > { %v2695_v45 = vadd.f32 %v7172_v48, %v2694_v0 }
 0x45b   : > { %v5079_v29 = vpack.c.bf16 %v2700_v3, %v2695_v45  ;;  %v4924_v56 = vpop.f32.mrb[48].mxu1 }
 0x45c   : > { %v2710_v59 = vadd.f32 %v4924_v56, %v7172_v48  ;;  %v2704_v4 = vpop.f32.mrb[49].mxu1 }
 0x45d   : > { %v2705_v32 = vadd.f32 %v7172_v48, %v2704_v4 }
 0x45f   : > { %v5034_v7 = vpack.c.bf16 %v2710_v59, %v2705_v32  ;;  %v4927_v23 = vpop.f32.mrb[50].mxu1 }
 0x460   : > { %v2720_v15 = vadd.f32 %v4927_v23, %v7172_v48  ;;  %v2714_v5 = vpop.f32.mrb[51].mxu1 }
 0x461   : > { %v2715_v0 = vadd.f32 %v7172_v48, %v2714_v5  ;;  %5036 = vmatprep.subr.msk.bf16.mxu1 %vm7221_vm6, %v5034_v7 }
 0x462   : > { %5039 = vmatpush3.bf16.xpose.msk.msra.mxu1 %vm7221_vm6, %v5037_v51 }
 0x463   : > { %v5040_v56 = vpack.c.bf16 %v2720_v15, %v2715_v0  ;;  %v4930_v45 = vpop.f32.mrb[52].mxu1 }
 0x464   : > { %v2730_v4 = vadd.f32 %v4930_v45, %v7172_v48  ;;  %v2724_v3 = vpop.f32.mrb[53].mxu1 }
 0x465   : > { %v2725_v46 = vadd.f32 %v7172_v48, %v2724_v3  ;;  %5042 = vmatprep.subr.msk.bf16.mxu1 %vm7221_vm6, %v5040_v56 }
 0x467   : > { %v5046_v32 = vpack.c.bf16 %v2730_v4, %v2725_v46  ;;  %v4933_v59 = vpop.f32.mrb[54].mxu1 }
 0x468   : > { %v2740_v23 = vadd.f32 %v4933_v59, %v7172_v48  ;;  %v2734_v5 = vpop.f32.mrb[55].mxu1 }
 0x469   : > { %v2735_v7 = vadd.f32 %v7172_v48, %v2734_v5 }
 0x46a   : > { %5045 = vmatpush3.bf16.xpose.msk.msra.mxu1 %vm7221_vm6, %v5043_v40 }
 0x46b   : > { %v5052_v51 = vpack.c.bf16 %v2740_v23, %v2735_v7  ;;  %v4936_v15 = vpop.f32.mrb[56].mxu1  ;;  %5048 = vmatprep.subr.msk.bf16.mxu1 %vm7221_vm6, %v5046_v32 }
 0x46c   : > { %v2750_v0 = vadd.f32 %v4936_v15, %v7172_v48  ;;  %v2744_v45 = vpop.f32.mrb[57].mxu1 }
 0x46d   : > { %v2745_v56 = vadd.f32 %v7172_v48, %v2744_v45 }
 0x46f   : > { %v5058_v46 = vpack.c.bf16 %v2750_v0, %v2745_v56  ;;  %v4939_v4 = vpop.f32.mrb[58].mxu1 }
 0x470   : > { %v2760_v3 = vadd.f32 %v4939_v4, %v7172_v48  ;;  %v2754_v59 = vpop.f32.mrb[59].mxu1 }
 0x471   : > { %v2755_v5 = vadd.f32 %v7172_v48, %v2754_v59 }
 0x472   : > { %5051 = vmatpush3.bf16.xpose.msk.msra.mxu1 %vm7221_vm6, %v5049_v10  ;;  %v8159_v10 = vpack.c.bf16 %v7187_v43, %v7190_v16  ;;  %v2394_v43 = vadd.f32 %v6742_v2, %v7114_v31  ;;  %v2399_v16 = vadd.f32 %v7114_v31, %v6803_v50  ;;  %v2409_v2 = vadd.f32 %v7114_v31, %v6867_v21 }
 0x473   : > { %v5064_v40 = vpack.c.bf16 %v2760_v3, %v2755_v5  ;;  %v4942_v23 = vpop.f32.mrb[60].mxu1  ;;  %5054 = vmatprep.subr.msk.bf16.mxu1 %vm7221_vm6, %v5052_v51  ;;  %v8160_v51 = vpack.c.bf16 %v7195_v37, %v7198_v11  ;;  %v2404_v37 = vadd.f32 %v6801_v9, %v7114_v31  ;;  %v2414_v50 = vadd.f32 %v6865_v24, %v7114_v31 }
 0x474   : > { %v2770_v32 = vadd.f32 %v4942_v23, %v7172_v48  ;;  %v2764_v7 = vpop.f32.mrb[61].mxu1  ;;  %v2419_v9 = vadd.f32 %v7114_v31, %v6895_v41  ;;  %v2424_v21 = vadd.f32 %v6893_v6, %v7114_v31  ;;  %v2429_v24 = vadd.f32 %v7114_v31, %v6916_v14 }
 0x475   : > { %v2765_v15 = vadd.f32 %v7172_v48, %v2764_v7  ;;  %v2434_v41 = vadd.f32 %v6914_v39, %v7114_v31  ;;  %v2439_v6 = vadd.f32 %v7114_v31, %v6936_v38  ;;  %v2444_v14 = vadd.f32 %v6934_v52, %v7114_v31 }
 0x476   : > { %v2449_v39 = vadd.f32 %v7114_v31, %v6956_v33  ;;  %v2454_v38 = vadd.f32 %v6954_v25, %v7114_v31  ;;  %v2459_v52 = vadd.f32 %v7114_v31, %v6976_v42  ;;  %v2464_v33 = vadd.f32 %v6974_v34, %v7114_v31 }
 0x477   : > { %v5070_v0 = vpack.c.bf16 %v2770_v32, %v2765_v15  ;;  %v4945_v45 = vpop.f32.mrb[62].mxu1  ;;  %v2469_v25 = vadd.f32 %v7114_v31, %v7032_v44  ;;  %v2474_v42 = vadd.f32 %v7028_v49, %v7114_v31  ;;  %v2479_v34 = vadd.f32 %v7114_v31, %v7087_v63 }
 0x478   : > { %v2780_v56 = vadd.f32 %v4945_v45, %v7172_v48  ;;  %v2774_v4 = vpop.f32.mrb[63].mxu1  ;;  %v2484_v44 = vadd.f32 %v7084_v47, %v7114_v31  ;;  %v2489_v49 = vadd.f32 %v7114_v31, %v7131_v27  ;;  %v2494_v63 = vadd.f32 %v7128_v36, %v7114_v31 }
 0x479   : > { %v2775_v59 = vadd.f32 %v7172_v48, %v2774_v4  ;;  %v8161_v48 = vpack.c.bf16 %v7203_v57, %v7206_v62  ;;  %v2499_v47 = vadd.f32 %v7114_v31, %v7138_v20  ;;  %v2509_v36 = vadd.f32 %v7114_v31, %v7145_v22 }
 0x47a   : > { %5057 = vmatpush3.bf16.xpose.msk.msra.mxu1 %vm7221_vm6, %v8159_v10  ;;  %v2514_v20 = vadd.f32 %v7142_v1, %v7114_v31  ;;  %v2519_v27 = vadd.f32 %v7114_v31, %v7152_v18  ;;  %v2529_v1 = vadd.f32 %v7114_v31, %v7159_v19  ;;  %v2534_v22 = vadd.f32 %v7156_v12, %v7114_v31 }
 0x47b   : > { %v5076_v3 = vpack.c.bf16 %v2780_v56, %v2775_v59  ;;  %5060 = vmatprep.subr.msk.bf16.mxu1 %vm7221_vm6, %v5058_v46  ;;  %v2544_v18 = vadd.f32 %v7163_v13, %v7114_v31 }
 0x482   : > { %5063 = vmatpush3.bf16.xpose.msk.msra.mxu1 %vm7221_vm6, %v8160_v51 }
 0x483   : > { %5066 = vmatprep.subr.msk.bf16.mxu1 %vm7221_vm6, %v5064_v40 }
 0x48a   : > { %5069 = vmatpush3.bf16.xpose.msk.msra.mxu1 %vm7221_vm6, %v8161_v48 }
 0x48b   : > { %5072 = vmatprep.subr.msk.bf16.mxu1 %vm7221_vm6, %v5070_v0 }
 0x492   : > { %5075 = vmatpush3.bf16.xpose.msk.msra.mxu1 %vm7221_vm6, %v5073_v30 }
 0x493   : > { %5078 = vmatprep.subr.msk.bf16.mxu1 %vm7221_vm6, %v5076_v3 }
 0x49a   : > { %5081 = vmatpush3.bf16.xpose.msk.msra.mxu1 %vm7221_vm6, %v5079_v29 }
 0x4a1   : > { %4713 = vmatmul.mubr.msk.f32.vlgmr.msra.gmra.mrb[64].mxu1 %vm1446_vm3, %v7122_v61  ;;  %v2504_v61 = vadd.f32 %v7135_v53, %v7114_v31  ;;  %v2524_v53 = vadd.f32 %v7149_v8, %v7114_v31  ;;  %v2539_v8 = vadd.f32 %v7114_v31, %v7166_v28 }
 0x4a2   : > { %4714 = vmatprep.mubr.msk.f32.mxu1 %vm1446_vm3, %v2394_v43 }
 0x4a5   : > { %4715 = vmatmul.mubr.msk.f32.gmra.mrb[66].mxu1 %vm1446_vm3, %v2394_v43 }
 0x4a6   : > { %4716 = vmatprep.mubr.msk.f32.mxu1 %vm1446_vm3, %v2399_v16 }
 0x4a9   : > { %4717 = vmatmul.mubr.msk.f32.gmra.mrb[68].mxu1 %vm1446_vm3, %v2399_v16 }
 0x4aa   : > { %4718 = vmatprep.mubr.msk.f32.mxu1 %vm1446_vm3, %v2404_v37 }
 0x4ad   : > { %4719 = vmatmul.mubr.msk.f32.gmra.mrb[70].mxu1 %vm1446_vm3, %v2404_v37 }
 0x4ae   : > { %4720 = vmatprep.mubr.msk.f32.mxu1 %vm1446_vm3, %v2409_v2 }
 0x4b1   : > { %4721 = vmatmul.mubr.msk.f32.gmra.mrb[72].mxu1 %vm1446_vm3, %v2409_v2 }
 0x4b2   : > { %4722 = vmatprep.mubr.msk.f32.mxu1 %vm1446_vm3, %v2414_v50 }
 0x4b5   : > { %4723 = vmatmul.mubr.msk.f32.gmra.mrb[74].mxu1 %vm1446_vm3, %v2414_v50 }
 0x4b6   : > { %4724 = vmatprep.mubr.msk.f32.mxu1 %vm1446_vm3, %v2419_v9 }
 0x4b9   : > { %4725 = vmatmul.mubr.msk.f32.gmra.mrb[76].mxu1 %vm1446_vm3, %v2419_v9 }
 0x4ba   : > { %4726 = vmatprep.mubr.msk.f32.mxu1 %vm1446_vm3, %v2424_v21 }
 0x4bd   : > { %4727 = vmatmul.mubr.msk.f32.gmra.mrb[78].mxu1 %vm1446_vm3, %v2424_v21 }
 0x4be   : > { %4728 = vmatprep.mubr.msk.f32.mxu1 %vm1446_vm3, %v2429_v24 }
 0x4c1   : > { %4729 = vmatmul.mubr.msk.f32.gmra.mrb[80].mxu1 %vm1446_vm3, %v2429_v24 }
 0x4c2   : > { %4730 = vmatprep.mubr.msk.f32.mxu1 %vm1446_vm3, %v2434_v41 }
 0x4c5   : > { %4731 = vmatmul.mubr.msk.f32.gmra.mrb[82].mxu1 %vm1446_vm3, %v2434_v41 }
 0x4c6   : > { %4732 = vmatprep.mubr.msk.f32.mxu1 %vm1446_vm3, %v2439_v6 }
 0x4c9   : > { %4733 = vmatmul.mubr.msk.f32.gmra.mrb[84].mxu1 %vm1446_vm3, %v2439_v6 }
 0x4ca   : > { %4734 = vmatprep.mubr.msk.f32.mxu1 %vm1446_vm3, %v2444_v14 }
 0x4cd   : > { %4735 = vmatmul.mubr.msk.f32.gmra.mrb[86].mxu1 %vm1446_vm3, %v2444_v14 }
 0x4ce   : > { %4736 = vmatprep.mubr.msk.f32.mxu1 %vm1446_vm3, %v2449_v39 }
 0x4d1   : > { %4737 = vmatmul.mubr.msk.f32.gmra.mrb[88].mxu1 %vm1446_vm3, %v2449_v39 }
 0x4d2   : > { %4738 = vmatprep.mubr.msk.f32.mxu1 %vm1446_vm3, %v2454_v38 }
 0x4d5   : > { %4739 = vmatmul.mubr.msk.f32.gmra.mrb[90].mxu1 %vm1446_vm3, %v2454_v38 }
 0x4d6   : > { %4740 = vmatprep.mubr.msk.f32.mxu1 %vm1446_vm3, %v2459_v52 }
 0x4d9   : > { %4741 = vmatmul.mubr.msk.f32.gmra.mrb[92].mxu1 %vm1446_vm3, %v2459_v52 }
 0x4da   : > { %4742 = vmatprep.mubr.msk.f32.mxu1 %vm1446_vm3, %v2464_v33 }
 0x4dd   : > { %4743 = vmatmul.mubr.msk.f32.gmra.mrb[94].mxu1 %vm1446_vm3, %v2464_v33 }
 0x4de   : > { %4744 = vmatprep.mubr.msk.f32.mxu1 %vm1446_vm3, %v2469_v25 }
 0x4e1   : > { %4745 = vmatmul.mubr.msk.f32.gmra.mrb[96].mxu1 %vm1446_vm3, %v2469_v25 }
 0x4e2   : > { %4746 = vmatprep.mubr.msk.f32.mxu1 %vm1446_vm3, %v2474_v42 }
 0x4e5   : > { %4747 = vmatmul.mubr.msk.f32.gmra.mrb[98].mxu1 %vm1446_vm3, %v2474_v42 }
 0x4e6   : > { %4748 = vmatprep.mubr.msk.f32.mxu1 %vm1446_vm3, %v2479_v34 }
 0x4e9   : > { %4749 = vmatmul.mubr.msk.f32.gmra.mrb[100].mxu1 %vm1446_vm3, %v2479_v34 }
 0x4ea   : > { %4750 = vmatprep.mubr.msk.f32.mxu1 %vm1446_vm3, %v2484_v44 }
 0x4ed   : > { %4751 = vmatmul.mubr.msk.f32.gmra.mrb[102].mxu1 %vm1446_vm3, %v2484_v44 }
 0x4ee   : > { %4752 = vmatprep.mubr.msk.f32.mxu1 %vm1446_vm3, %v2489_v49 }
 0x4f1   : > { %4753 = vmatmul.mubr.msk.f32.gmra.mrb[104].mxu1 %vm1446_vm3, %v2489_v49 }
 0x4f2   : > { %4754 = vmatprep.mubr.msk.f32.mxu1 %vm1446_vm3, %v2494_v63 }
 0x4f5   : > { %4755 = vmatmul.mubr.msk.f32.gmra.mrb[106].mxu1 %vm1446_vm3, %v2494_v63 }
 0x4f6   : > { %4756 = vmatprep.mubr.msk.f32.mxu1 %vm1446_vm3, %v2499_v47 }
 0x4f9   : > { %4757 = vmatmul.mubr.msk.f32.gmra.mrb[108].mxu1 %vm1446_vm3, %v2499_v47 }
 0x4fa   : > { %4758 = vmatprep.mubr.msk.f32.mxu1 %vm1446_vm3, %v2504_v61 }
 0x4fd   : > { %4759 = vmatmul.mubr.msk.f32.gmra.mrb[110].mxu1 %vm1446_vm3, %v2504_v61 }
 0x4fe   : > { %4760 = vmatprep.mubr.msk.f32.mxu1 %vm1446_vm3, %v2509_v36 }
 0x501   : > { %4761 = vmatmul.mubr.msk.f32.gmra.mrb[112].mxu1 %vm1446_vm3, %v2509_v36 }
 0x502   : > { %4762 = vmatprep.mubr.msk.f32.mxu1 %vm1446_vm3, %v2514_v20 }
 0x505   : > { %4763 = vmatmul.mubr.msk.f32.gmra.mrb[114].mxu1 %vm1446_vm3, %v2514_v20 }
 0x506   : > { %4764 = vmatprep.mubr.msk.f32.mxu1 %vm1446_vm3, %v2519_v27 }
 0x509   : > { %4765 = vmatmul.mubr.msk.f32.gmra.mrb[116].mxu1 %vm1446_vm3, %v2519_v27 }
 0x50a   : > { %4766 = vmatprep.mubr.msk.f32.mxu1 %vm1446_vm3, %v2524_v53 }
 0x50d   : > { %4767 = vmatmul.mubr.msk.f32.gmra.mrb[118].mxu1 %vm1446_vm3, %v2524_v53 }
 0x50e   : > { %4768 = vmatprep.mubr.msk.f32.mxu1 %vm1446_vm3, %v2529_v1 }
 0x511   : > { %4769 = vmatmul.mubr.msk.f32.gmra.mrb[120].mxu1 %vm1446_vm3, %v2529_v1 }
 0x512   : > { %4770 = vmatprep.mubr.msk.f32.mxu1 %vm1446_vm3, %v2534_v22 }
 0x515   : > { %4771 = vmatmul.mubr.msk.f32.gmra.mrb[122].mxu1 %vm1446_vm3, %v2534_v22 }
 0x516   : > { %4772 = vmatprep.mubr.msk.f32.mxu1 %vm1446_vm3, %v2539_v8 }
 0x519   : > { %4773 = vmatmul.mubr.msk.f32.gmra.mrb[124].mxu1 %vm1446_vm3, %v2539_v8 }
 0x51a   : > { %4774 = vmatprep.mubr.msk.f32.mxu1 %vm1446_vm3, %v2544_v18 }
 0x51d   : > { %4775 = vmatmul.mubr.msk.f32.gmra.mrb[126].mxu1 %vm1446_vm3, %v2544_v18 }
 0x574   : > { %v7406_v12 = vpop.f32.mrb[64].mxu1 }
 0x575   : > { %v7408_v19 = vpop.f32.mrb[65].mxu1 }
 0x576   : > { %v3468_v28 = vmax.f32 %v7406_v12, %v7408_v19 }
 0x578   : > { %3469 = vmax.xlane.f32.xlu0 %v3468_v28  ;;  %v7412_v11 = vpop.f32.mrb[66].mxu1 }
 0x579   : > { %v7414_v30 = vpop.f32.mrb[67].mxu1 }
 0x57a   : > { %v3471_v13 = vmax.f32 %v7412_v11, %v7414_v30 }
 0x57c   : > { %3472 = vmax.xlane.f32.xlu1 %v3471_v13  ;;  %v7418_v31 = vpop.f32.mrb[68].mxu1 }
 0x57d   : > { %v7420_v57 = vpop.f32.mrb[69].mxu1 }
 0x57e   : > { %v3474_v62 = vmax.f32 %v7418_v31, %v7420_v57 }
 0x580   : > { %3475 = vmax.xlane.f32.xlu0 %v3474_v62  ;;  %v7424_v29 = vpop.f32.mrb[70].mxu1 }
 0x581   : > { %v7426_v26 = vpop.f32.mrb[71].mxu1 }
 0x582   : > { %v3477_v46 = vmax.f32 %v7424_v29, %v7426_v26 }
 0x584   : > { %3478 = vmax.xlane.f32.xlu0 %v3477_v46  ;;  %v7430_v5 = vpop.f32.mrb[72].mxu1 }
 0x585   : > { %v7432_v40 = vpop.f32.mrb[73].mxu1 }
 0x586   : > { %v3480_v23 = vmax.f32 %v7430_v5, %v7432_v40 }
 0x588   : > { %3481 = vmax.xlane.f32.xlu1 %v3480_v23  ;;  %v7436_v32 = vpop.f32.mrb[74].mxu1 }
 0x589   : > { %v7438_v7 = vpop.f32.mrb[75].mxu1 }
 0x58a   : > { %v3483_v15 = vmax.f32 %v7436_v32, %v7438_v7 }
 0x58c   : > { %3484 = vmax.xlane.f32.xlu0 %v3483_v15  ;;  %v7442_v0 = vpop.f32.mrb[76].mxu1 }
 0x58d   : > { %v7444_v45 = vpop.f32.mrb[77].mxu1 }
 0x58e   : > { %v3486_v56 = vmax.f32 %v7442_v0, %v7444_v45 }
 0x590   : > { %3487 = vmax.xlane.f32.xlu1 %v3486_v56  ;;  %v7448_v4 = vpop.f32.mrb[78].mxu1 }
 0x591   : > { %v7450_v59 = vpop.f32.mrb[79].mxu1 }
 0x592   : > { %v3489_v10 = vmax.f32 %v7448_v4, %v7450_v59 }
 0x594   : > { %3490 = vmax.xlane.f32.xlu0 %v3489_v10  ;;  %v7454_v3 = vpop.f32.mrb[80].mxu1 }
 0x595   : > { %v7456_v51 = vpop.f32.mrb[81].mxu1 }
 0x596   : > { %v3492_v48 = vmax.f32 %v7454_v3, %v7456_v51 }
 0x598   : > { %3493 = vmax.xlane.f32.xlu1 %v3492_v48  ;;  %v7460_v43 = vpop.f32.mrb[82].mxu1 }
 0x599   : > { %v7462_v16 = vpop.f32.mrb[83].mxu1 }
 0x59a   : > { %v3495_v37 = vmax.f32 %v7460_v43, %v7462_v16 }
 0x59c   : > { %3496 = vmax.xlane.f32.xlu0 %v3495_v37  ;;  %v7466_v2 = vpop.f32.mrb[84].mxu1 }
 0x59d   : > { %v7468_v50 = vpop.f32.mrb[85].mxu1 }
 0x59e   : > { %v3498_v9 = vmax.f32 %v7466_v2, %v7468_v50 }
 0x5a0   : > { %3499 = vmax.xlane.f32.xlu1 %v3498_v9  ;;  %v7472_v21 = vpop.f32.mrb[86].mxu1 }
 0x5a1   : > { %v7474_v24 = vpop.f32.mrb[87].mxu1 }
 0x5a2   : > { %v3501_v41 = vmax.f32 %v7472_v21, %v7474_v24 }
 0x5a4   : > { %3502 = vmax.xlane.f32.xlu0 %v3501_v41  ;;  %v7478_v6 = vpop.f32.mrb[88].mxu1 }
 0x5a5   : > { %v7480_v14 = vpop.f32.mrb[89].mxu1 }
 0x5a6   : > { %v3504_v39 = vmax.f32 %v7478_v6, %v7480_v14 }
 0x5a8   : > { %3505 = vmax.xlane.f32.xlu1 %v3504_v39  ;;  %v7484_v38 = vpop.f32.mrb[90].mxu1 }
 0x5a9   : > { %v7486_v52 = vpop.f32.mrb[91].mxu1 }
 0x5aa   : > { %v3507_v33 = vmax.f32 %v7484_v38, %v7486_v52 }
 0x5ac   : > { %3508 = vmax.xlane.f32.xlu0 %v3507_v33  ;;  %v7490_v25 = vpop.f32.mrb[92].mxu1 }
 0x5ad   : > { %v7492_v42 = vpop.f32.mrb[93].mxu1 }
 0x5ae   : > { %v3510_v34 = vmax.f32 %v7490_v25, %v7492_v42 }
 0x5b0   : > { %3511 = vmax.xlane.f32.xlu1 %v3510_v34  ;;  %v7496_v44 = vpop.f32.mrb[94].mxu1 }
 0x5b1   : > { %v7498_v49 = vpop.f32.mrb[95].mxu1 }
 0x5b2   : > { %v3513_v63 = vmax.f32 %v7496_v44, %v7498_v49 }
 0x5b4   : > { %3514 = vmax.xlane.f32.xlu0 %v3513_v63  ;;  %v7502_v47 = vpop.f32.mrb[96].mxu1 }
 0x5b5   : > { %v7504_v61 = vpop.f32.mrb[97].mxu1 }
 0x5b6   : > { %v3516_v36 = vmax.f32 %v7502_v47, %v7504_v61 }
 0x5b8   : > { %3517 = vmax.xlane.f32.xlu1 %v3516_v36  ;;  %v7508_v20 = vpop.f32.mrb[98].mxu1 }
 0x5b9   : > { %v7510_v27 = vpop.f32.mrb[99].mxu1 }
 0x5ba   : > { %v3519_v53 = vmax.f32 %v7508_v20, %v7510_v27 }
 0x5bc   : > { %3520 = vmax.xlane.f32.xlu0 %v3519_v53  ;;  %v7514_v1 = vpop.f32.mrb[100].mxu1 }
 0x5bd   : > { %v7516_v22 = vpop.f32.mrb[101].mxu1 }
 0x5be   : > { %v3522_v8 = vmax.f32 %v7514_v1, %v7516_v22 }
 0x5c0   : > { %3523 = vmax.xlane.f32.xlu1 %v3522_v8  ;;  %v7520_v18 = vpop.f32.mrb[102].mxu1 }
 0x5c1   : > { %v7522_v28 = vpop.f32.mrb[103].mxu1 }
 0x5c2   : > { %v3525_v13 = vmax.f32 %v7520_v18, %v7522_v28 }
 0x5c4   : > { %3526 = vmax.xlane.f32.xlu0 %v3525_v13  ;;  %v7526_v62 = vpop.f32.mrb[104].mxu1 }
 0x5c5   : > { %v7528_v46 = vpop.f32.mrb[105].mxu1 }
 0x5c6   : > { %v3528_v23 = vmax.f32 %v7526_v62, %v7528_v46 }
 0x5c8   : > { %3529 = vmax.xlane.f32.xlu1 %v3528_v23  ;;  %v7532_v15 = vpop.f32.mrb[106].mxu1 }
 0x5c9   : > { %v7534_v56 = vpop.f32.mrb[107].mxu1 }
 0x5ca   : > { %v3531_v10 = vmax.f32 %v7532_v15, %v7534_v56 }
 0x5cc   : > { %3532 = vmax.xlane.f32.xlu0 %v3531_v10  ;;  %v7538_v48 = vpop.f32.mrb[108].mxu1 }
 0x5cd   : > { %v7540_v37 = vpop.f32.mrb[109].mxu1 }
 0x5ce   : > { %v3534_v9 = vmax.f32 %v7538_v48, %v7540_v37 }
 0x5d0   : > { %3535 = vmax.xlane.f32.xlu1 %v3534_v9  ;;  %v7544_v41 = vpop.f32.mrb[110].mxu1 }
 0x5d1   : > { %v7546_v39 = vpop.f32.mrb[111].mxu1 }
 0x5d2   : > { %v3537_v33 = vmax.f32 %v7544_v41, %v7546_v39 }
 0x5d4   : > { %3538 = vmax.xlane.f32.xlu1 %v3537_v33  ;;  %v7550_v34 = vpop.f32.mrb[112].mxu1 }
 0x5d5   : > { %v7552_v63 = vpop.f32.mrb[113].mxu1 }
 0x5d6   : > { %v3540_v36 = vmax.f32 %v7550_v34, %v7552_v63 }
 0x5d8   : > { %3541 = vmax.xlane.f32.xlu1 %v3540_v36  ;;  %v7556_v53 = vpop.f32.mrb[114].mxu1 }
 0x5d9   : > { %8162 = vst [vmem:[#allocation35_spill] sm:$0xff] %v7556_v53  ;;  %v7558_v8 = vpop.f32.mrb[115].mxu1 }
 0x5da   : > { %8163 = vst [vmem:[#allocation36_spill] sm:$0xff] %v7558_v8  ;;  %v3543_v13 = vmax.f32 %v7556_v53, %v7558_v8 }
 0x5dc   : > { %3544 = vmax.xlane.f32.xlu1 %v3543_v13  ;;  %v7562_v23 = vpop.f32.mrb[116].mxu1 }
 0x5dd   : > { %8164 = vst [vmem:[#allocation37_spill] sm:$0xff] %v7562_v23  ;;  %v7564_v10 = vpop.f32.mrb[117].mxu1 }
 0x5de   : > { %8165 = vst [vmem:[#allocation38_spill] sm:$0xff] %v7564_v10  ;;  %v3546_v9 = vmax.f32 %v7562_v23, %v7564_v10 }
 0x5e0   : > { %3547 = vmax.xlane.f32.xlu1 %v3546_v9  ;;  %v7568_v33 = vpop.f32.mrb[118].mxu1 }
 0x5e1   : > { %8166 = vst [vmem:[#allocation39_spill] sm:$0xff] %v7568_v33  ;;  %v7570_v58 = vpop.f32.mrb[119].mxu1 }
 0x5e2   : > { %8167 = vst [vmem:[#allocation40_spill] sm:$0xff] %v7570_v58  ;;  %v3549_v36 = vmax.f32 %v7568_v33, %v7570_v58 }
 0x5e4   : > { %3550 = vmax.xlane.f32.xlu1 %v3549_v36  ;;  %v7574_v54 = vpop.f32.mrb[120].mxu1 }
 0x5e5   : > { %8168 = vst [vmem:[#allocation41_spill] sm:$0xff] %v7574_v54  ;;  %v7576_v55 = vpop.f32.mrb[121].mxu1 }
 0x5e6   : > { %8169 = vst [vmem:[#allocation42_spill] sm:$0xff] %v7576_v55  ;;  %v3552_v13 = vmax.f32 %v7574_v54, %v7576_v55 }
 0x5e8   : > { %3553 = vmax.xlane.f32.xlu1 %v3552_v13  ;;  %v7580_v60 = vpop.f32.mrb[122].mxu1 }
 0x5e9   : > { %8170 = vst [vmem:[#allocation43_spill] sm:$0xff] %v7580_v60  ;;  %v7582_v35 = vpop.f32.mrb[123].mxu1 }
 0x5ea   : > { %8171 = vst [vmem:[#allocation44_spill] sm:$0xff] %v7582_v35  ;;  %v3555_v9 = vmax.f32 %v7580_v60, %v7582_v35 }
 0x5ec   : > { %3556 = vmax.xlane.f32.xlu1 %v3555_v9  ;;  %v7586_v17 = vpop.f32.mrb[124].mxu1 }
 0x5ed   : > { %8172 = vst [vmem:[#allocation45_spill] sm:$0xff] %v7586_v17  ;;  %v7588_v58 = vpop.f32.mrb[125].mxu1 }
 0x5ee   : > { %8173 = vst [vmem:[#allocation46_spill] sm:$0xff] %v7588_v58  ;;  %v3558_v36 = vmax.f32 %v7586_v17, %v7588_v58 }
 0x5f0   : > { %3559 = vmax.xlane.f32.xlu1 %v3558_v36  ;;  %v7592_v33 = vpop.f32.mrb[126].mxu1 }
 0x5f1   : > { %v7594_v55 = vpop.f32.mrb[127].mxu1 }
 0x5f2   : > { %8174 = vst [vmem:[#allocation47_spill] sm:$0xff] %v7594_v55  ;;  %v3561_v13 = vmax.f32 %v7592_v33, %v7594_v55 }
 0x5f4   : > { %3562 = vmax.xlane.f32.xlu1 %v3561_v13 }
 0x605   : > { %v3470_v54 = vpop.xlane.xlu0 %3469 }
 0x606   : > { %v3564_v35 = vsub.f32 %v7406_v12, %v3470_v54  ;;  %v3565_v9 = vsub.f32 %v7408_v19, %v3470_v54 }
 0x608   : > { %v3628_v60 = vmul.f32 1.442695, %v3564_v35  ;;  %v3630_v10 = vmul.f32 1.442695, %v3565_v9 }
 0x609   : > { %v3473_v23 = vpop.xlane.xlu1 %3472 }
 0x60a   : > { %5148 = vpow2.f32 %v3628_v60  ;;  %v3566_v58 = vsub.f32 %v7412_v11, %v3473_v23  ;;  %v3567_v36 = vsub.f32 %v7414_v30, %v3473_v23 }
 0x60b   : > { %5150 = vpow2.f32 %v3630_v10 }
 0x60c   : > { %v3632_v17 = vmul.f32 1.442695, %v3566_v58  ;;  %v3634_v8 = vmul.f32 1.442695, %v3567_v36 }
 0x60d   : > { %v3476_v53 = vpop.xlane.xlu0 %3475 }
 0x60e   : > { %5152 = vpow2.f32 %v3632_v17  ;;  %v3568_v13 = vsub.f32 %v7418_v31, %v3476_v53  ;;  %v3569_v55 = vsub.f32 %v7420_v57, %v3476_v53 }
 0x60f   : > { %5154 = vpow2.f32 %v3634_v8 }
 0x610   : > { %v3636_v12 = vmul.f32 1.442695, %v3568_v13  ;;  %v3638_v54 = vmul.f32 1.442695, %v3569_v55 }
 0x611   : > { %v3479_v35 = vpop.xlane.xlu0 %3478 }
 0x612   : > { %5156 = vpow2.f32 %v3636_v12  ;;  %v3570_v60 = vsub.f32 %v7424_v29, %v3479_v35  ;;  %v3571_v19 = vsub.f32 %v7426_v26, %v3479_v35 }
 0x613   : > { %5158 = vpow2.f32 %v3638_v54 }
 0x614   : > { %v7606_v11 = vpop.eup %5148  ;;  %v3640_v58 = vmul.f32 1.442695, %v3570_v60  ;;  %v3642_v30 = vmul.f32 1.442695, %v3571_v19 }
 0x615   : > { %v7608_v23 = vpop.eup %5150  ;;  %v3482_v17 = vpop.xlane.xlu1 %3481 }
 0x616   : > { %5160 = vpow2.f32 %v3640_v58  ;;  %v3572_v31 = vsub.f32 %v7430_v5, %v3482_v17  ;;  %v3573_v57 = vsub.f32 %v7432_v40, %v3482_v17  ;;  %v3756_v55 = vadd.f32 %v7608_v23, %v7606_v11 }
 0x617   : > { %5162 = vpow2.f32 %v3642_v30 }
 0x618   : > { %v7614_v29 = vpop.eup %5152  ;;  %v3644_v26 = vmul.f32 1.442695, %v3572_v31  ;;  %v3646_v53 = vmul.f32 1.442695, %v3573_v57  ;;  %3757 = vadd.xlane.f32.xlu0 %v3756_v55 }
 0x619   : > { %v7616_v8 = vpop.eup %5154  ;;  %v3485_v10 = vpop.xlane.xlu0 %3484 }
 0x61a   : > { %5164 = vpow2.f32 %v3644_v26  ;;  %v3574_v9 = vsub.f32 %v7436_v32, %v3485_v10  ;;  %v3575_v36 = vsub.f32 %v7438_v7, %v3485_v10  ;;  %v3759_v5 = vadd.f32 %v7616_v8, %v7614_v29 }
 0x61b   : > { %5166 = vpow2.f32 %v3646_v53 }
 0x61c   : > { %v7622_v40 = vpop.eup %5156  ;;  %v3648_v13 = vmul.f32 1.442695, %v3574_v9  ;;  %v3650_v12 = vmul.f32 1.442695, %v3575_v36  ;;  %3760 = vadd.xlane.f32.xlu0 %v3759_v5 }
 0x61d   : > { %v7624_v54 = vpop.eup %5158  ;;  %v3488_v35 = vpop.xlane.xlu1 %3487 }
 0x61e   : > { %5168 = vpow2.f32 %v3648_v13  ;;  %v3576_v60 = vsub.f32 %v7442_v0, %v3488_v35  ;;  %v3577_v19 = vsub.f32 %v7444_v45, %v3488_v35  ;;  %v3762_v32 = vadd.f32 %v7624_v54, %v7622_v40 }
 0x61f   : > { %5170 = vpow2.f32 %v3650_v12 }
 0x620   : > { %v7630_v7 = vpop.eup %5160  ;;  %v3652_v58 = vmul.f32 1.442695, %v3576_v60  ;;  %v3654_v30 = vmul.f32 1.442695, %v3577_v19  ;;  %3763 = vadd.xlane.f32.xlu0 %v3762_v32 }
 0x621   : > { %v7632_v17 = vpop.eup %5162  ;;  %v3491_v31 = vpop.xlane.xlu0 %3490 }
 0x622   : > { %5172 = vpow2.f32 %v3652_v58  ;;  %v3578_v57 = vsub.f32 %v7448_v4, %v3491_v31  ;;  %v3579_v55 = vsub.f32 %v7450_v59, %v3491_v31  ;;  %v3765_v0 = vadd.f32 %v7632_v17, %v7630_v7 }
 0x623   : > { %5174 = vpow2.f32 %v3654_v30 }
 0x624   : > { %v7638_v45 = vpop.eup %5164  ;;  %v3656_v26 = vmul.f32 1.442695, %v3578_v57  ;;  %v3658_v53 = vmul.f32 1.442695, %v3579_v55  ;;  %3766 = vadd.xlane.f32.xlu0 %v3765_v0 }
 0x625   : > { %v7640_v10 = vpop.eup %5166  ;;  %v3494_v9 = vpop.xlane.xlu1 %3493 }
 0x626   : > { %5176 = vpow2.f32 %v3656_v26  ;;  %v3580_v36 = vsub.f32 %v7454_v3, %v3494_v9  ;;  %v3581_v5 = vsub.f32 %v7456_v51, %v3494_v9  ;;  %v3768_v4 = vadd.f32 %v7640_v10, %v7638_v45 }
 0x627   : > { %5178 = vpow2.f32 %v3658_v53 }
 0x628   : > { %v7646_v59 = vpop.eup %5168  ;;  %v3660_v13 = vmul.f32 1.442695, %v3580_v36  ;;  %v3662_v12 = vmul.f32 1.442695, %v3581_v5  ;;  %3769 = vadd.xlane.f32.xlu0 %v3768_v4 }
 0x629   : > { %v7648_v35 = vpop.eup %5170  ;;  %v3497_v60 = vpop.xlane.xlu0 %3496 }
 0x62a   : > { %5180 = vpow2.f32 %v3660_v13  ;;  %v3582_v19 = vsub.f32 %v7460_v43, %v3497_v60  ;;  %v3583_v32 = vsub.f32 %v7462_v16, %v3497_v60  ;;  %v3771_v3 = vadd.f32 %v7648_v35, %v7646_v59 }
 0x62b   : > { %5182 = vpow2.f32 %v3662_v12 }
 0x62c   : > { %v7654_v51 = vpop.eup %5172  ;;  %v3664_v58 = vmul.f32 1.442695, %v3582_v19  ;;  %v3666_v30 = vmul.f32 1.442695, %v3583_v32  ;;  %3772 = vadd.xlane.f32.xlu0 %v3771_v3 }
 0x62d   : > { %v7656_v31 = vpop.eup %5174  ;;  %v3500_v57 = vpop.xlane.xlu1 %3499 }
 0x62e   : > { %5184 = vpow2.f32 %v3664_v58  ;;  %v3584_v55 = vsub.f32 %v7466_v2, %v3500_v57  ;;  %v3585_v0 = vsub.f32 %v7468_v50, %v3500_v57  ;;  %v3774_v43 = vadd.f32 %v7656_v31, %v7654_v51 }
 0x62f   : > { %5186 = vpow2.f32 %v3666_v30 }
 0x630   : > { %v7662_v16 = vpop.eup %5176  ;;  %v3668_v26 = vmul.f32 1.442695, %v3584_v55  ;;  %v3670_v53 = vmul.f32 1.442695, %v3585_v0  ;;  %3775 = vadd.xlane.f32.xlu0 %v3774_v43 }
 0x631   : > { %v7664_v9 = vpop.eup %5178  ;;  %v3503_v36 = vpop.xlane.xlu0 %3502 }
 0x632   : > { %5188 = vpow2.f32 %v3668_v26  ;;  %v3586_v5 = vsub.f32 %v7472_v21, %v3503_v36  ;;  %v3587_v4 = vsub.f32 %v7474_v24, %v3503_v36  ;;  %v3777_v2 = vadd.f32 %v7664_v9, %v7662_v16 }
 0x633   : > { %5190 = vpow2.f32 %v3670_v53 }
 0x634   : > { %v7670_v50 = vpop.eup %5180  ;;  %v3672_v13 = vmul.f32 1.442695, %v3586_v5  ;;  %v3674_v12 = vmul.f32 1.442695, %v3587_v4  ;;  %3778 = vadd.xlane.f32.xlu0 %v3777_v2 }
 0x635   : > { %v7672_v60 = vpop.eup %5182  ;;  %v3506_v19 = vpop.xlane.xlu1 %3505 }
 0x636   : > { %5192 = vpow2.f32 %v3672_v13  ;;  %v3588_v32 = vsub.f32 %v7478_v6, %v3506_v19  ;;  %v3589_v3 = vsub.f32 %v7480_v14, %v3506_v19  ;;  %v3780_v21 = vadd.f32 %v7672_v60, %v7670_v50 }
 0x637   : > { %5194 = vpow2.f32 %v3674_v12 }
 0x638   : > { %v7678_v24 = vpop.eup %5184  ;;  %v3676_v58 = vmul.f32 1.442695, %v3588_v32  ;;  %v3678_v30 = vmul.f32 1.442695, %v3589_v3  ;;  %3781 = vadd.xlane.f32.xlu0 %v3780_v21 }
 0x639   : > { %v7680_v57 = vpop.eup %5186  ;;  %v3509_v55 = vpop.xlane.xlu0 %3508 }
 0x63a   : > { %5196 = vpow2.f32 %v3676_v58  ;;  %v3590_v0 = vsub.f32 %v7484_v38, %v3509_v55  ;;  %v3591_v43 = vsub.f32 %v7486_v52, %v3509_v55  ;;  %v3783_v6 = vadd.f32 %v7680_v57, %v7678_v24 }
 0x63b   : > { %5198 = vpow2.f32 %v3678_v30 }
 0x63c   : > { %v7686_v14 = vpop.eup %5188  ;;  %v3680_v26 = vmul.f32 1.442695, %v3590_v0  ;;  %v3682_v53 = vmul.f32 1.442695, %v3591_v43  ;;  %3784 = vadd.xlane.f32.xlu0 %v3783_v6 }
 0x63d   : > { %v7688_v36 = vpop.eup %5190  ;;  %v3512_v5 = vpop.xlane.xlu1 %3511 }
 0x63e   : > { %5200 = vpow2.f32 %v3680_v26  ;;  %v3592_v4 = vsub.f32 %v7490_v25, %v3512_v5  ;;  %v3593_v2 = vsub.f32 %v7492_v42, %v3512_v5  ;;  %v3786_v38 = vadd.f32 %v7688_v36, %v7686_v14 }
 0x63f   : > { %5202 = vpow2.f32 %v3682_v53 }
 0x640   : > { %v7694_v52 = vpop.eup %5192  ;;  %v3684_v13 = vmul.f32 1.442695, %v3592_v4  ;;  %v3686_v12 = vmul.f32 1.442695, %v3593_v2  ;;  %3787 = vadd.xlane.f32.xlu1 %v3786_v38 }
 0x641   : > { %v7696_v19 = vpop.eup %5194  ;;  %v3515_v32 = vpop.xlane.xlu0 %3514 }
 0x642   : > { %5204 = vpow2.f32 %v3684_v13  ;;  %v3594_v3 = vsub.f32 %v7496_v44, %v3515_v32  ;;  %v3595_v21 = vsub.f32 %v7498_v49, %v3515_v32  ;;  %v3789_v25 = vadd.f32 %v7696_v19, %v7694_v52 }
 0x643   : > { %5206 = vpow2.f32 %v3686_v12 }
 0x644   : > { %v7702_v42 = vpop.eup %5196  ;;  %v3688_v58 = vmul.f32 1.442695, %v3594_v3  ;;  %v3690_v30 = vmul.f32 1.442695, %v3595_v21  ;;  %3790 = vadd.xlane.f32.xlu0 %v3789_v25 }
 0x645   : > { %v7704_v55 = vpop.eup %5198  ;;  %v3518_v0 = vpop.xlane.xlu1 %3517 }
 0x646   : > { %5208 = vpow2.f32 %v3688_v58  ;;  %v3596_v43 = vsub.f32 %v7502_v47, %v3518_v0  ;;  %v3597_v6 = vsub.f32 %v7504_v61, %v3518_v0  ;;  %v3792_v44 = vadd.f32 %v7704_v55, %v7702_v42 }
 0x647   : > { %5210 = vpow2.f32 %v3690_v30 }
 0x648   : > { %v7710_v49 = vpop.eup %5200  ;;  %v3692_v26 = vmul.f32 1.442695, %v3596_v43  ;;  %v3694_v53 = vmul.f32 1.442695, %v3597_v6  ;;  %3793 = vadd.xlane.f32.xlu1 %v3792_v44 }
 0x649   : > { %v7712_v5 = vpop.eup %5202  ;;  %v3521_v4 = vpop.xlane.xlu0 %3520 }
 0x64a   : > { %5212 = vpow2.f32 %v3692_v26  ;;  %v3598_v2 = vsub.f32 %v7508_v20, %v3521_v4  ;;  %v3599_v38 = vsub.f32 %v7510_v27, %v3521_v4  ;;  %v3795_v47 = vadd.f32 %v7712_v5, %v7710_v49 }
 0x64b   : > { %5214 = vpow2.f32 %v3694_v53 }
 0x64c   : > { %v7718_v61 = vpop.eup %5204  ;;  %v3696_v13 = vmul.f32 1.442695, %v3598_v2  ;;  %v3698_v12 = vmul.f32 1.442695, %v3599_v38  ;;  %3796 = vadd.xlane.f32.xlu0 %v3795_v47 }
 0x64d   : > { %v7720_v32 = vpop.eup %5206  ;;  %v3524_v3 = vpop.xlane.xlu1 %3523 }
 0x64e   : > { %5216 = vpow2.f32 %v3696_v13  ;;  %v3600_v21 = vsub.f32 %v7514_v1, %v3524_v3  ;;  %v3601_v25 = vsub.f32 %v7516_v22, %v3524_v3  ;;  %v3798_v20 = vadd.f32 %v7720_v32, %v7718_v61 }
 0x64f   : > { %5218 = vpow2.f32 %v3698_v12 }
 0x650   : > { %v7726_v27 = vpop.eup %5208  ;;  %v3700_v58 = vmul.f32 1.442695, %v3600_v21  ;;  %v3702_v30 = vmul.f32 1.442695, %v3601_v25  ;;  %3799 = vadd.xlane.f32.xlu1 %v3798_v20 }
 0x651   : > { %v7728_v0 = vpop.eup %5210  ;;  %v3527_v43 = vpop.xlane.xlu0 %3526 }
 0x652   : > { %5220 = vpow2.f32 %v3700_v58  ;;  %v3602_v6 = vsub.f32 %v7520_v18, %v3527_v43  ;;  %v3603_v44 = vsub.f32 %v7522_v28, %v3527_v43  ;;  %v3801_v1 = vadd.f32 %v7728_v0, %v7726_v27 }
 0x653   : > { %5222 = vpow2.f32 %v3702_v30 }
 0x654   : > { %v7734_v22 = vpop.eup %5212  ;;  %v3704_v26 = vmul.f32 1.442695, %v3602_v6  ;;  %v3706_v53 = vmul.f32 1.442695, %v3603_v44  ;;  %3802 = vadd.xlane.f32.xlu0 %v3801_v1 }
 0x655   : > { %v7736_v4 = vpop.eup %5214  ;;  %v3530_v2 = vpop.xlane.xlu1 %3529 }
 0x656   : > { %5224 = vpow2.f32 %v3704_v26  ;;  %v3604_v38 = vsub.f32 %v7526_v62, %v3530_v2  ;;  %v3605_v47 = vsub.f32 %v7528_v46, %v3530_v2  ;;  %v3804_v18 = vadd.f32 %v7736_v4, %v7734_v22 }
 0x657   : > { %5226 = vpow2.f32 %v3706_v53 }
 0x658   : > { %v7742_v28 = vpop.eup %5216  ;;  %v3708_v13 = vmul.f32 1.442695, %v3604_v38  ;;  %v3710_v12 = vmul.f32 1.442695, %v3605_v47  ;;  %3805 = vadd.xlane.f32.xlu1 %v3804_v18 }
 0x659   : > { %v7744_v3 = vpop.eup %5218  ;;  %v3533_v21 = vpop.xlane.xlu0 %3532 }
 0x65a   : > { %5228 = vpow2.f32 %v3708_v13  ;;  %v3606_v25 = vsub.f32 %v7532_v15, %v3533_v21  ;;  %v3607_v20 = vsub.f32 %v7534_v56, %v3533_v21  ;;  %v3807_v62 = vadd.f32 %v7744_v3, %v7742_v28 }
 0x65b   : > { %5230 = vpow2.f32 %v3710_v12 }
 0x65c   : > { %v7750_v46 = vpop.eup %5220  ;;  %v3712_v58 = vmul.f32 1.442695, %v3606_v25  ;;  %v3714_v30 = vmul.f32 1.442695, %v3607_v20  ;;  %3808 = vadd.xlane.f32.xlu0 %v3807_v62 }
 0x65d   : > { %v7752_v43 = vpop.eup %5222  ;;  %v3536_v6 = vpop.xlane.xlu1 %3535 }
 0x65e   : > { %5232 = vpow2.f32 %v3712_v58  ;;  %v3608_v44 = vsub.f32 %v7538_v48, %v3536_v6  ;;  %v3609_v1 = vsub.f32 %v7540_v37, %v3536_v6  ;;  %v3810_v15 = vadd.f32 %v7752_v43, %v7750_v46 }
 0x65f   : > { %5234 = vpow2.f32 %v3714_v30 }
 0x660   : > { %v7758_v56 = vpop.eup %5224  ;;  %v3716_v26 = vmul.f32 1.442695, %v3608_v44  ;;  %v3718_v53 = vmul.f32 1.442695, %v3609_v1  ;;  %3811 = vadd.xlane.f32.xlu1 %v3810_v15  ;;  %v8175_v1 = vld [vmem:[#allocation35_spill] sm:$0xff] }
 0x661   : > { %v7760_v2 = vpop.eup %5226  ;;  %v3539_v38 = vpop.xlane.xlu1 %3538 }
 0x662   : > { %5236 = vpow2.f32 %v3716_v26  ;;  %v3610_v47 = vsub.f32 %v7544_v41, %v3539_v38  ;;  %v3611_v18 = vsub.f32 %v7546_v39, %v3539_v38  ;;  %v3813_v48 = vadd.f32 %v7760_v2, %v7758_v56  ;;  %v8176_v26 = vld [vmem:[#allocation36_spill] sm:$0xff] }
 0x663   : > { %5238 = vpow2.f32 %v3718_v53 }
 0x664   : > { %v7766_v37 = vpop.eup %5228  ;;  %v3720_v13 = vmul.f32 1.442695, %v3610_v47  ;;  %v3722_v12 = vmul.f32 1.442695, %v3611_v18  ;;  %3814 = vadd.xlane.f32.xlu0 %v3813_v48 }
 0x665   : > { %v7768_v21 = vpop.eup %5230  ;;  %v3542_v25 = vpop.xlane.xlu1 %3541 }
 0x666   : > { %5240 = vpow2.f32 %v3720_v13  ;;  %v3612_v20 = vsub.f32 %v7550_v34, %v3542_v25  ;;  %v3613_v62 = vsub.f32 %v7552_v63, %v3542_v25  ;;  %v3816_v41 = vadd.f32 %v7768_v21, %v7766_v37  ;;  %v8178_v13 = vld [vmem:[#allocation37_spill] sm:$0xff]  ;;  %v8179_v25 = vld [vmem:[#allocation38_spill] sm:$0xff] }
 0x667   : > { %5242 = vpow2.f32 %v3722_v12 }
 0x668   : > { %v7774_v39 = vpop.eup %5232  ;;  %v3724_v58 = vmul.f32 1.442695, %v3612_v20  ;;  %v3726_v30 = vmul.f32 1.442695, %v3613_v62  ;;  %3817 = vadd.xlane.f32.xlu1 %v3816_v41 }
 0x669   : > { %v7776_v6 = vpop.eup %5234  ;;  %v3545_v44 = vpop.xlane.xlu1 %3544 }
 0x66a   : > { %5244 = vpow2.f32 %v3724_v58  ;;  %v3614_v15 = vsub.f32 %v8175_v1, %v3545_v44  ;;  %v3615_v53 = vsub.f32 %v8176_v26, %v3545_v44  ;;  %v3819_v34 = vadd.f32 %v7776_v6, %v7774_v39 }
 0x66b   : > { %5246 = vpow2.f32 %v3726_v30 }
 0x66c   : > { %v7782_v63 = vpop.eup %5236  ;;  %v3728_v38 = vmul.f32 1.442695, %v3614_v15  ;;  %v3730_v47 = vmul.f32 1.442695, %v3615_v53  ;;  %3820 = vadd.xlane.f32.xlu0 %v3819_v34  ;;  %v8182_v15 = vld [vmem:[#allocation39_spill] sm:$0xff]  ;;  %v8183_v53 = vld [vmem:[#allocation40_spill] sm:$0xff] }
 0x66d   : > { %8177 = vst [vmem:[#allocation35_spill] sm:$0xff] %v7782_v63  ;;  %v7784_v18 = vpop.eup %5238  ;;  %v3548_v48 = vpop.xlane.xlu1 %3547 }
 0x66e   : > { %5248 = vpow2.f32 %v3728_v38  ;;  %v3616_v12 = vsub.f32 %v8178_v13, %v3548_v48  ;;  %v3617_v20 = vsub.f32 %v8179_v25, %v3548_v48  ;;  %v3822_v62 = vadd.f32 %v7784_v18, %v7782_v63 }
 0x66f   : > { %5250 = vpow2.f32 %v3730_v47 }
 0x670   : > { %v7790_v41 = vpop.eup %5240  ;;  %v3732_v58 = vmul.f32 1.442695, %v3616_v12  ;;  %v3734_v30 = vmul.f32 1.442695, %v3617_v20  ;;  %3823 = vadd.xlane.f32.xlu1 %v3822_v62  ;;  %v8186_v20 = vld [vmem:[#allocation41_spill] sm:$0xff] }
 0x671   : > { %8180 = vst [vmem:[#allocation36_spill] sm:$0xff] %v7790_v41  ;;  %v7792_v44 = vpop.eup %5242  ;;  %v3551_v1 = vpop.xlane.xlu1 %3550 }
 0x672   : > { %8181 = vst [vmem:[#allocation37_spill] sm:$0xff] %v7792_v44  ;;  %5252 = vpow2.f32 %v3732_v58  ;;  %v3618_v26 = vsub.f32 %v8182_v15, %v3551_v1  ;;  %v3619_v34 = vsub.f32 %v8183_v53, %v3551_v1  ;;  %v3825_v38 = vadd.f32 %v7792_v44, %v7790_v41  ;;  %v8187_v58 = vld [vmem:[#allocation42_spill] sm:$0xff] }
 0x673   : > { %5254 = vpow2.f32 %v3734_v30 }
 0x674   : > { %v7798_v48 = vpop.eup %5244  ;;  %v3736_v47 = vmul.f32 1.442695, %v3618_v26  ;;  %v3738_v13 = vmul.f32 1.442695, %v3619_v34  ;;  %3826 = vadd.xlane.f32.xlu0 %v3825_v38  ;;  %v8189_v38 = vld [vmem:[#allocation43_spill] sm:$0xff] }
 0x675   : > { %8184 = vst [vmem:[#allocation38_spill] sm:$0xff] %v7798_v48  ;;  %v7800_v12 = vpop.eup %5246  ;;  %v3554_v25 = vpop.xlane.xlu1 %3553 }
 0x676   : > { %8185 = vst [vmem:[#allocation39_spill] sm:$0xff] %v7800_v12  ;;  %5256 = vpow2.f32 %v3736_v47  ;;  %v3620_v62 = vsub.f32 %v8186_v20, %v3554_v25  ;;  %v3621_v63 = vsub.f32 %v8187_v58, %v3554_v25  ;;  %v3828_v1 = vadd.f32 %v7800_v12, %v7798_v48  ;;  %v8190_v47 = vld [vmem:[#allocation44_spill] sm:$0xff] }
 0x677   : > { %5258 = vpow2.f32 %v3738_v13 }
 0x678   : > { %v7806_v15 = vpop.eup %5248  ;;  %v3740_v30 = vmul.f32 1.442695, %v3620_v62  ;;  %v3742_v53 = vmul.f32 1.442695, %v3621_v63  ;;  %3829 = vadd.xlane.f32.xlu1 %v3828_v1  ;;  %v8191_v1 = vld [vmem:[#allocation45_spill] sm:$0xff] }
 0x679   : > { %8188 = vst [vmem:[#allocation40_spill] sm:$0xff] %v7806_v15  ;;  %v7808_v26 = vpop.eup %5250  ;;  %v3557_v34 = vpop.xlane.xlu1 %3556 }
 0x67a   : > { %5260 = vpow2.f32 %v3740_v30  ;;  %v3622_v41 = vsub.f32 %v8189_v38, %v3557_v34  ;;  %v3623_v44 = vsub.f32 %v8190_v47, %v3557_v34  ;;  %v3831_v25 = vadd.f32 %v7808_v26, %v7806_v15  ;;  %v8192_v30 = vld [vmem:[#allocation46_spill] sm:$0xff] }
 0x67b   : > { %5262 = vpow2.f32 %v3742_v53 }
 0x67c   : > { %v7814_v20 = vpop.eup %5252  ;;  %v3744_v13 = vmul.f32 1.442695, %v3622_v41  ;;  %v3746_v58 = vmul.f32 1.442695, %v3623_v44  ;;  %3832 = vadd.xlane.f32.xlu0 %v3831_v25 }
 0x67d   : > { %v7816_v62 = vpop.eup %5254  ;;  %v3560_v63 = vpop.xlane.xlu1 %3559 }
 0x67e   : > { %5264 = vpow2.f32 %v3744_v13  ;;  %v3624_v48 = vsub.f32 %v8191_v1, %v3560_v63  ;;  %v3625_v12 = vsub.f32 %v8192_v30, %v3560_v63  ;;  %v3834_v34 = vadd.f32 %v7816_v62, %v7814_v20  ;;  %v8193_v13 = vld [vmem:[#allocation47_spill] sm:$0xff] }
 0x67f   : > { %5266 = vpow2.f32 %v3746_v58 }
 0x680   : > { %v7822_v38 = vpop.eup %5256  ;;  %v3748_v53 = vmul.f32 1.442695, %v3624_v48  ;;  %v3750_v47 = vmul.f32 1.442695, %v3625_v12  ;;  %3835 = vadd.xlane.f32.xlu1 %v3834_v34 }
 0x681   : > { %v7824_v41 = vpop.eup %5258  ;;  %v3563_v44 = vpop.xlane.xlu1 %3562 }
 0x682   : > { %5268 = vpow2.f32 %v3748_v53  ;;  %v3626_v25 = vsub.f32 %v7592_v33, %v3563_v44  ;;  %v3627_v15 = vsub.f32 %v8193_v13, %v3563_v44  ;;  %v3837_v63 = vadd.f32 %v7824_v41, %v7822_v38 }
 0x683   : > { %5270 = vpow2.f32 %v3750_v47 }
 0x684   : > { %v7830_v1 = vpop.eup %5260  ;;  %v3752_v58 = vmul.f32 1.442695, %v3626_v25  ;;  %v3754_v30 = vmul.f32 1.442695, %v3627_v15  ;;  %3838 = vadd.xlane.f32.xlu0 %v3837_v63 }
 0x685   : > { %v7832_v48 = vpop.eup %5262 }
 0x686   : > { %5272 = vpow2.f32 %v3752_v58  ;;  %v3840_v12 = vadd.f32 %v7832_v48, %v7830_v1 }
 0x687   : > { %5274 = vpow2.f32 %v3754_v30 }
 0x688   : > { %v7836_v34 = vpop.eup %5264  ;;  %3841 = vadd.xlane.f32.xlu1 %v3840_v12 }
 0x689   : > { %8194 = vst [vmem:[#allocation41_spill] sm:$0xff] %v7836_v34  ;;  %v7838_v33 = vpop.eup %5266 }
 0x68a   : > { %8195 = vst [vmem:[#allocation42_spill] sm:$0xff] %v7838_v33  ;;  %v3843_v53 = vadd.f32 %v7838_v33, %v7836_v34 }
 0x68c   : > { %v7842_v47 = vpop.eup %5268  ;;  %3844 = vadd.xlane.f32.xlu0 %v3843_v53 }
 0x68d   : > { %8196 = vst [vmem:[#allocation43_spill] sm:$0xff] %v7842_v47  ;;  %v7844_v15 = vpop.eup %5270 }
 0x68e   : > { %8197 = vst [vmem:[#allocation44_spill] sm:$0xff] %v7844_v15  ;;  %v3846_v44 = vadd.f32 %v7844_v15, %v7842_v47 }
 0x690   : > { %v7848_v25 = vpop.eup %5272  ;;  %3847 = vadd.xlane.f32.xlu1 %v3846_v44 }
 0x691   : > { %8198 = vst [vmem:[#allocation45_spill] sm:$0xff] %v7848_v25  ;;  %v7850_v13 = vpop.eup %5274 }
 0x692   : > { %v3849_v63 = vadd.f32 %v7850_v13, %v7848_v25 }
 0x694   : > { %3850 = vadd.xlane.f32.xlu0 %v3849_v63 }
 0x6a5   : > { %v3758_v58 = vpop.xlane.xlu0 %3757 }
 0x6a6   : > { %5276 = vrcp.f32 %v3758_v58 }
 0x6a9   : > { %v3761_v30 = vpop.xlane.xlu0 %3760 }
 0x6aa   : > { %5278 = vrcp.f32 %v3761_v30 }
 0x6ad   : > { %v3764_v12 = vpop.xlane.xlu0 %3763 }
 0x6ae   : > { %5280 = vrcp.f32 %v3764_v12 }
 0x6b0   : > { %v5277_v53 = vpop.eup %5276 }
 0x6b1   : > { %v3884_v34 = vmul.f32 %v5277_v53, %v7606_v11  ;;  %v3767_v33 = vpop.xlane.xlu0 %3766  ;;  %v3885_v47 = vmul.f32 %v5277_v53, %v7608_v23 }
 0x6b2   : > { %5282 = vrcp.f32 %v3767_v33 }
 0x6b3   : > { %4012 = vmatprep.mubr.f32.mxu0 %v3885_v47 }
 0x6b4   : > { %v5279_v44 = vpop.eup %5278  ;;  %4013 = vmatmul.mubr.f32.vlgmr.msra.gmra.mrb[64].mxu0 %v3884_v34 }
 0x6b5   : > { %v3770_v15 = vpop.xlane.xlu0 %3769  ;;  %v3887_v25 = vmul.f32 %v5279_v44, %v7616_v8  ;;  %v3886_v63 = vmul.f32 %v5279_v44, %v7614_v29 }
 0x6b6   : > { %5284 = vrcp.f32 %v3770_v15 }
 0x6b7   : > { %4017 = vmatprep.mubr.f32.mxu0 %v3887_v25 }
 0x6b8   : > { %v5281_v58 = vpop.eup %5280  ;;  %4018 = vmatmul.mubr.f32.gmra.mrb[66].mxu0 %v3886_v63 }
 0x6b9   : > { %v3773_v30 = vpop.xlane.xlu0 %3772  ;;  %v3889_v12 = vmul.f32 %v5281_v58, %v7624_v54  ;;  %v3888_v11 = vmul.f32 %v5281_v58, %v7622_v40 }
 0x6ba   : > { %5286 = vrcp.f32 %v3773_v30 }
 0x6bb   : > { %4022 = vmatprep.mubr.f32.mxu0 %v3889_v12 }
 0x6bc   : > { %v5283_v23 = vpop.eup %5282  ;;  %4023 = vmatmul.mubr.f32.gmra.mrb[68].mxu0 %v3888_v11 }
 0x6bd   : > { %v3776_v33 = vpop.xlane.xlu0 %3775  ;;  %v3891_v34 = vmul.f32 %v5283_v23, %v7632_v17  ;;  %v3890_v8 = vmul.f32 %v5283_v23, %v7630_v7 }
 0x6be   : > { %5288 = vrcp.f32 %v3776_v33 }
 0x6bf   : > { %4027 = vmatprep.mubr.f32.mxu0 %v3891_v34 }
 0x6c0   : > { %v5285_v29 = vpop.eup %5284  ;;  %4028 = vmatmul.mubr.f32.gmra.mrb[70].mxu0 %v3890_v8 }
 0x6c1   : > { %v3779_v47 = vpop.xlane.xlu0 %3778  ;;  %v3893_v15 = vmul.f32 %v5285_v29, %v7640_v10  ;;  %v3892_v54 = vmul.f32 %v5285_v29, %v7638_v45 }
 0x6c2   : > { %5290 = vrcp.f32 %v3779_v47 }
 0x6c3   : > { %4032 = vmatprep.mubr.f32.mxu0 %v3893_v15 }
 0x6c4   : > { %v5287_v40 = vpop.eup %5286  ;;  %4033 = vmatmul.mubr.f32.gmra.mrb[72].mxu0 %v3892_v54 }
 0x6c5   : > { %v3782_v25 = vpop.xlane.xlu0 %3781  ;;  %v3895_v53 = vmul.f32 %v5287_v40, %v7648_v35  ;;  %v3894_v17 = vmul.f32 %v5287_v40, %v7646_v59 }
 0x6c6   : > { %5292 = vrcp.f32 %v3782_v25 }
 0x6c7   : > { %4037 = vmatprep.mubr.f32.mxu0 %v3895_v53 }
 0x6c8   : > { %v5289_v7 = vpop.eup %5288  ;;  %4038 = vmatmul.mubr.f32.gmra.mrb[74].mxu0 %v3894_v17 }
 0x6c9   : > { %v3785_v44 = vpop.xlane.xlu0 %3784  ;;  %v3897_v63 = vmul.f32 %v5289_v7, %v7656_v31  ;;  %v3896_v10 = vmul.f32 %v5289_v7, %v7654_v51 }
 0x6ca   : > { %5294 = vrcp.f32 %v3785_v44 }
 0x6cb   : > { %4042 = vmatprep.mubr.f32.mxu0 %v3897_v63 }
 0x6cc   : > { %v5291_v45 = vpop.eup %5290  ;;  %4043 = vmatmul.mubr.f32.gmra.mrb[76].mxu0 %v3896_v10 }
 0x6cd   : > { %v3788_v58 = vpop.xlane.xlu1 %3787  ;;  %v3899_v30 = vmul.f32 %v5291_v45, %v7664_v9  ;;  %v3898_v35 = vmul.f32 %v5291_v45, %v7662_v16 }
 0x6ce   : > { %5296 = vrcp.f32 %v3788_v58 }
 0x6cf   : > { %4047 = vmatprep.mubr.f32.mxu0 %v3899_v30 }
 0x6d0   : > { %v5293_v59 = vpop.eup %5292  ;;  %4048 = vmatmul.mubr.f32.gmra.mrb[78].mxu0 %v3898_v35 }
 0x6d1   : > { %v3791_v12 = vpop.xlane.xlu0 %3790  ;;  %v3901_v11 = vmul.f32 %v5293_v59, %v7672_v60  ;;  %v3900_v31 = vmul.f32 %v5293_v59, %v7670_v50 }
 0x6d2   : > { %5298 = vrcp.f32 %v3791_v12 }
 0x6d3   : > { %4052 = vmatprep.mubr.f32.mxu0 %v3901_v11 }
 0x6d4   : > { %v5295_v51 = vpop.eup %5294  ;;  %4053 = vmatmul.mubr.f32.gmra.mrb[80].mxu0 %v3900_v31 }
 0x6d5   : > { %v3794_v23 = vpop.xlane.xlu1 %3793  ;;  %v3903_v33 = vmul.f32 %v5295_v51, %v7680_v57  ;;  %v3902_v9 = vmul.f32 %v5295_v51, %v7678_v24 }
 0x6d6   : > { %5300 = vrcp.f32 %v3794_v23 }
 0x6d7   : > { %4057 = vmatprep.mubr.f32.mxu0 %v3903_v33 }
 0x6d8   : > { %v5297_v16 = vpop.eup %5296  ;;  %4058 = vmatmul.mubr.f32.gmra.mrb[82].mxu0 %v3902_v9 }
 0x6d9   : > { %v3797_v34 = vpop.xlane.xlu0 %3796  ;;  %v3905_v8 = vmul.f32 %v5297_v16, %v7688_v36  ;;  %v3904_v60 = vmul.f32 %v5297_v16, %v7686_v14  ;;  %v8199_v16 = vld [vmem:[#allocation35_spill] sm:$0xff] }
 0x6da   : > { %5302 = vrcp.f32 %v3797_v34 }
 0x6db   : > { %4062 = vmatprep.mubr.f32.mxu0 %v3905_v8  ;;  %v8200_v8 = vld [vmem:[#allocation37_spill] sm:$0xff] }
 0x6dc   : > { %v5299_v50 = vpop.eup %5298  ;;  %4063 = vmatmul.mubr.f32.gmra.mrb[84].mxu0 %v3904_v60 }
 0x6dd   : > { %v3800_v29 = vpop.xlane.xlu1 %3799  ;;  %v3907_v47 = vmul.f32 %v5299_v50, %v7696_v19  ;;  %v3906_v57 = vmul.f32 %v5299_v50, %v7694_v52  ;;  %v8201_v50 = vld [vmem:[#allocation36_spill] sm:$0xff] }
 0x6de   : > { %5304 = vrcp.f32 %v3800_v29 }
 0x6df   : > { %4067 = vmatprep.mubr.f32.mxu0 %v3907_v47  ;;  %v8202_v47 = vld [vmem:[#allocation39_spill] sm:$0xff] }
 0x6e0   : > { %v5301_v24 = vpop.eup %5300  ;;  %4068 = vmatmul.mubr.f32.gmra.mrb[86].mxu0 %v3906_v57 }
 0x6e1   : > { %v3803_v15 = vpop.xlane.xlu0 %3802  ;;  %v3909_v54 = vmul.f32 %v5301_v24, %v7704_v55  ;;  %v3908_v36 = vmul.f32 %v5301_v24, %v7702_v42  ;;  %v8203_v24 = vld [vmem:[#allocation38_spill] sm:$0xff] }
 0x6e2   : > { %5306 = vrcp.f32 %v3803_v15 }
 0x6e3   : > { %4072 = vmatprep.mubr.f32.mxu0 %v3909_v54 }
 0x6e4   : > { %v5303_v14 = vpop.eup %5302  ;;  %4073 = vmatmul.mubr.f32.gmra.mrb[88].mxu0 %v3908_v36 }
 0x6e5   : > { %v3806_v40 = vpop.xlane.xlu1 %3805  ;;  %v3911_v25 = vmul.f32 %v5303_v14, %v7712_v5  ;;  %v3910_v19 = vmul.f32 %v5303_v14, %v7710_v49  ;;  %v8204_v14 = vld [vmem:[#allocation40_spill] sm:$0xff] }
 0x6e6   : > { %5308 = vrcp.f32 %v3806_v40 }
 0x6e7   : > { %4077 = vmatprep.mubr.f32.mxu0 %v3911_v25 }
 0x6e8   : > { %v5305_v52 = vpop.eup %5304  ;;  %4078 = vmatmul.mubr.f32.gmra.mrb[90].mxu0 %v3910_v19 }
 0x6e9   : > { %v3809_v53 = vpop.xlane.xlu0 %3808  ;;  %v3913_v17 = vmul.f32 %v5305_v52, %v7720_v32  ;;  %v3912_v55 = vmul.f32 %v5305_v52, %v7718_v61 }
 0x6ea   : > { %5310 = vrcp.f32 %v3809_v53 }
 0x6eb   : > { %4082 = vmatprep.mubr.f32.mxu0 %v3913_v17 }
 0x6ec   : > { %v5307_v42 = vpop.eup %5306  ;;  %4083 = vmatmul.mubr.f32.gmra.mrb[92].mxu0 %v3912_v55 }
 0x6ed   : > { %v3812_v7 = vpop.xlane.xlu1 %3811  ;;  %v3915_v44 = vmul.f32 %v5307_v42, %v7728_v0  ;;  %v3914_v5 = vmul.f32 %v5307_v42, %v7726_v27 }
 0x6ee   : > { %5312 = vrcp.f32 %v3812_v7 }
 0x6ef   : > { %4087 = vmatprep.mubr.f32.mxu0 %v3915_v44 }
 0x6f0   : > { %v5309_v49 = vpop.eup %5308  ;;  %4088 = vmatmul.mubr.f32.gmra.mrb[94].mxu0 %v3914_v5 }
 0x6f1   : > { %v3815_v63 = vpop.xlane.xlu0 %3814  ;;  %v3917_v10 = vmul.f32 %v5309_v49, %v7736_v4  ;;  %v3916_v32 = vmul.f32 %v5309_v49, %v7734_v22  ;;  %v8205_v49 = vld [vmem:[#allocation42_spill] sm:$0xff] }
 0x6f2   : > { %5314 = vrcp.f32 %v3815_v63 }
 0x6f3   : > { %4092 = vmatprep.mubr.f32.mxu0 %v3917_v10  ;;  %v8206_v10 = vld [vmem:[#allocation41_spill] sm:$0xff] }
 0x6f4   : > { %v5311_v61 = vpop.eup %5310  ;;  %4093 = vmatmul.mubr.f32.gmra.mrb[96].mxu0 %v3916_v32  ;;  %v8207_v32 = vld [vmem:[#allocation44_spill] sm:$0xff] }
 0x6f5   : > { %v3818_v45 = vpop.xlane.xlu1 %3817  ;;  %v3919_v58 = vmul.f32 %v5311_v61, %v7744_v3  ;;  %v3918_v0 = vmul.f32 %v5311_v61, %v7742_v28 }
 0x6f6   : > { %5316 = vrcp.f32 %v3818_v45  ;;  %v8208_v45 = vld [vmem:[#allocation43_spill] sm:$0xff] }
 0x6f7   : > { %4097 = vmatprep.mubr.f32.mxu0 %v3919_v58 }
 0x6f8   : > { %v5313_v27 = vpop.eup %5312  ;;  %4098 = vmatmul.mubr.f32.gmra.mrb[98].mxu0 %v3918_v0  ;;  %v8209_v0 = vld [vmem:[#allocation45_spill] sm:$0xff] }
 0x6f9   : > { %v3821_v30 = vpop.xlane.xlu0 %3820  ;;  %v3921_v35 = vmul.f32 %v5313_v27, %v7752_v43  ;;  %v3920_v4 = vmul.f32 %v5313_v27, %v7750_v46 }
 0x6fa   : > { %5318 = vrcp.f32 %v3821_v30  ;;  %v7918_v30 = vstv %s4173_s23 }
 0x6fb   : > { %4102 = vmatprep.mubr.f32.mxu0 %v3921_v35 }
 0x6fc   : > { %v5315_v22 = vpop.eup %5314  ;;  %4103 = vmatmul.mubr.f32.gmra.mrb[100].mxu0 %v3920_v4 }
 0x6fd   : > { %v3824_v59 = vpop.xlane.xlu1 %3823  ;;  %v3923_v12 = vmul.f32 %v5315_v22, %v7760_v2  ;;  %v3922_v3 = vmul.f32 %v5315_v22, %v7758_v56 }
 0x6fe   : > { %5320 = vrcp.f32 %v3824_v59  ;;  %v8210_v59 = vld [vmem:[#allocation3_spill] sm:$0xff] }
 0x6ff   : > { %4107 = vmatprep.mubr.f32.mxu0 %v3923_v12 }
 0x700   : > { %v5317_v28 = vpop.eup %5316  ;;  %4108 = vmatmul.mubr.f32.gmra.mrb[102].mxu0 %v3922_v3 }
 0x701   : > { %v3827_v11 = vpop.xlane.xlu0 %3826  ;;  %v3925_v31 = vmul.f32 %v5317_v28, %v7768_v21  ;;  %v3924_v43 = vmul.f32 %v5317_v28, %v7766_v37 }
 0x702   : > { %5322 = vrcp.f32 %v3827_v11  ;;  %v8211_v11 = vld [vmem:[#allocation4_spill] sm:$0xff] }
 0x703   : > { %4112 = vmatprep.mubr.f32.mxu0 %v3925_v31 }
 0x704   : > { %v5319_v46 = vpop.eup %5318  ;;  %4113 = vmatmul.mubr.f32.gmra.mrb[104].mxu0 %v3924_v43 }
 0x705   : > { %v3830_v51 = vpop.xlane.xlu1 %3829  ;;  %v3927_v23 = vmul.f32 %v5319_v46, %v7776_v6  ;;  %v3926_v2 = vmul.f32 %v5319_v46, %v7774_v39 }
 0x706   : > { %5324 = vrcp.f32 %v3830_v51 }
 0x707   : > { %4117 = vmatprep.mubr.f32.mxu0 %v3927_v23  ;;  %v8212_v23 = vld [vmem:[#allocation5_spill] sm:$0xff] }
 0x708   : > { %v5321_v56 = vpop.eup %5320  ;;  %4118 = vmatmul.mubr.f32.gmra.mrb[106].mxu0 %v3926_v2 }
 0x709   : > { %v3833_v33 = vpop.xlane.xlu0 %3832  ;;  %v3929_v9 = vmul.f32 %v5321_v56, %v7784_v18  ;;  %v3928_v21 = vmul.f32 %v5321_v56, %v8199_v16  ;;  %v8213_v16 = vld [vmem:[#allocation6_spill] sm:$0xff] }
 0x70a   : > { %5326 = vrcp.f32 %v3833_v33 }
 0x70b   : > { %4122 = vmatprep.mubr.f32.mxu0 %v3929_v9 }
 0x70c   : > { %v5323_v37 = vpop.eup %5322  ;;  %4123 = vmatmul.mubr.f32.gmra.mrb[108].mxu0 %v3928_v21 }
 0x70d   : > { %v3836_v34 = vpop.xlane.xlu1 %3835  ;;  %v3931_v60 = vmul.f32 %v5323_v37, %v8200_v8  ;;  %v3930_v6 = vmul.f32 %v5323_v37, %v8201_v50 }
 0x70e   : > { %5328 = vrcp.f32 %v3836_v34 }
 0x70f   : > { %4127 = vmatprep.mubr.f32.mxu0 %v3931_v60  ;;  %v8214_v60 = vld [vmem:[#allocation7_spill] sm:$0xff] }
 0x710   : > { %v5325_v39 = vpop.eup %5324  ;;  %4128 = vmatmul.mubr.f32.gmra.mrb[110].mxu0 %v3930_v6 }
 0x711   : > { %v3839_v29 = vpop.xlane.xlu0 %3838  ;;  %v3933_v57 = vmul.f32 %v5325_v39, %v8202_v47  ;;  %v3932_v18 = vmul.f32 %v5325_v39, %v8203_v24  ;;  %v8215_v47 = vld [vmem:[#allocation8_spill] sm:$0xff] }
 0x712   : > { %5330 = vrcp.f32 %v3839_v29 }
 0x713   : > { %4132 = vmatprep.mubr.f32.mxu0 %v3933_v57 }
 0x714   : > { %v5327_v15 = vpop.eup %5326  ;;  %4133 = vmatmul.mubr.f32.gmra.mrb[112].mxu0 %v3932_v18 }
 0x715   : > { %v3842_v54 = vpop.xlane.xlu1 %3841  ;;  %v3935_v36 = vmul.f32 %v5327_v15, %v7808_v26  ;;  %v3934_v40 = vmul.f32 %v5327_v15, %v8204_v14 }
 0x716   : > { %5332 = vrcp.f32 %v3842_v54  ;;  %v8216_v54 = vld [vmem:[#allocation9_spill] sm:$0xff] }
 0x717   : > { %4137 = vmatprep.mubr.f32.mxu0 %v3935_v36 }
 0x718   : > { %v5329_v25 = vpop.eup %5328  ;;  %4138 = vmatmul.mubr.f32.gmra.mrb[114].mxu0 %v3934_v40 }
 0x719   : > { %v3845_v19 = vpop.xlane.xlu0 %3844  ;;  %v3937_v52 = vmul.f32 %v5329_v25, %v7816_v62  ;;  %v3936_v53 = vmul.f32 %v5329_v25, %v7814_v20 }
 0x71a   : > { %5334 = vrcp.f32 %v3845_v19  ;;  %v8217_v19 = vld [vmem:[#allocation10_spill] sm:$0xff] }
 0x71b   : > { %4142 = vmatprep.mubr.f32.mxu0 %v3937_v52 }
 0x71c   : > { %v5331_v17 = vpop.eup %5330  ;;  %4143 = vmatmul.mubr.f32.gmra.mrb[116].mxu0 %v3936_v53 }
 0x71d   : > { %v3848_v55 = vpop.xlane.xlu1 %3847  ;;  %v3939_v42 = vmul.f32 %v5331_v17, %v7824_v41  ;;  %v3938_v26 = vmul.f32 %v5331_v17, %v7822_v38 }
 0x71e   : > { %5336 = vrcp.f32 %v3848_v55 }
 0x71f   : > { %4147 = vmatprep.mubr.f32.mxu0 %v3939_v42  ;;  %v8218_v42 = vld [vmem:[#allocation11_spill] sm:$0xff] }
 0x720   : > { %v5333_v7 = vpop.eup %5332  ;;  %4148 = vmatmul.mubr.f32.gmra.mrb[118].mxu0 %v3938_v26 }
 0x721   : > { %v3851_v44 = vpop.xlane.xlu0 %3850  ;;  %v3941_v5 = vmul.f32 %v5333_v7, %v7832_v48  ;;  %v3940_v62 = vmul.f32 %v5333_v7, %v7830_v1 }
 0x722   : > { %5338 = vrcp.f32 %v3851_v44 }
 0x723   : > { %4152 = vmatprep.mubr.f32.mxu0 %v3941_v5 }
 0x724   : > { %v5335_v20 = vpop.eup %5334  ;;  %4153 = vmatmul.mubr.f32.gmra.mrb[120].mxu0 %v3940_v62  ;;  %v8219_v62 = vld [vmem:[#allocation12_spill] sm:$0xff] }
 0x725   : > { %v3943_v63 = vmul.f32 %v5335_v20, %v8205_v49  ;;  %v3942_v41 = vmul.f32 %v5335_v20, %v8206_v10 }
 0x727   : > { %4157 = vmatprep.mubr.f32.mxu0 %v3943_v63 }
 0x728   : > { %v5337_v38 = vpop.eup %5336  ;;  %4158 = vmatmul.mubr.f32.gmra.mrb[122].mxu0 %v3942_v41  ;;  %v8220_v41 = vld [vmem:[#allocation13_spill] sm:$0xff] }
 0x729   : > { %v3945_v61 = vmul.f32 %v5337_v38, %v8207_v32  ;;  %v3944_v58 = vmul.f32 %v5337_v38, %v8208_v45 }
 0x72b   : > { %4162 = vmatprep.mubr.f32.mxu0 %v3945_v61 }
 0x72c   : > { %v5339_v48 = vpop.eup %5338  ;;  %4163 = vmatmul.mubr.f32.gmra.mrb[124].mxu0 %v3944_v58  ;;  %v8221_v58 = vld [vmem:[#allocation14_spill] sm:$0xff] }
 0x72d   : > { %v3947_v1 = vmul.f32 %v5339_v48, %v7850_v13  ;;  %v3946_v27 = vmul.f32 %v5339_v48, %v8209_v0 }
 0x72f   : > { %4167 = vmatprep.mubr.f32.mxu0 %v3947_v1 }
 0x730   : > { %4168 = vmatmul.mubr.f32.gmra.mrb[126].mxu0 %v3946_v27 }
 0x787   : > { %v4014_v35 = vpop.f32.mrb[64].mxu0 }
 0x788   : > { %v4175_v4 = vmul.f32 %v7918_v30, %v4014_v35  ;;  %v4016_v22 = vpop.f32.mrb[65].mxu0  ;;  %v8222_v35 = vld [vmem:[#allocation15_spill] sm:$0xff] }
 0x78a   : > { %v4207_v13 = vadd.f32 %v4175_v4, %v8210_v59 }
 0x78b   : > { %v4019_v12 = vpop.f32.mrb[66].mxu0 }
 0x78c   : > { %4239 = vst.msk [vmem:[%s7925_s10] sm:$0xff] %vm1677_vm10, %v4207_v13  ;;  %v4176_v3 = vmul.f32 %v7918_v30, %v4019_v12  ;;  %v4021_v28 = vpop.f32.mrb[67].mxu0  ;;  %v8223_v12 = vld [vmem:[#allocation16_spill] sm:$0xff] }
 0x78e   : > { %v4208_v31 = vadd.f32 %v4176_v3, %v8211_v11 }
 0x78f   : > { %v4024_v43 = vpop.f32.mrb[68].mxu0 }
 0x790   : > { %4240 = vst.msk [vmem:[%s7925_s10 + $0x8] sm:$0xff] %vm1677_vm10, %v4208_v31  ;;  %v4177_v46 = vmul.f32 %v7918_v30, %v4024_v43  ;;  %v4026_v51 = vpop.f32.mrb[69].mxu0  ;;  %v8224_v43 = vld [vmem:[#allocation17_spill] sm:$0xff] }
 0x792   : > { %v4209_v2 = vadd.f32 %v4177_v46, %v8212_v23 }
 0x793   : > { %v4029_v56 = vpop.f32.mrb[70].mxu0 }
 0x794   : > { %4241 = vst.msk [vmem:[%s7925_s10 + $0x10] sm:$0xff] %vm1677_vm10, %v4209_v2  ;;  %v4178_v33 = vmul.f32 %v7918_v30, %v4029_v56  ;;  %v4031_v9 = vpop.f32.mrb[71].mxu0  ;;  %v8225_v56 = vld [vmem:[#allocation18_spill] sm:$0xff] }
 0x796   : > { %v4210_v21 = vadd.f32 %v4178_v33, %v8213_v16 }
 0x797   : > { %v4034_v37 = vpop.f32.mrb[72].mxu0 }
 0x798   : > { %4242 = vst.msk [vmem:[%s7925_s10 + $0x18] sm:$0xff] %vm1677_vm10, %v4210_v21  ;;  %v4179_v34 = vmul.f32 %v7918_v30, %v4034_v37  ;;  %v4036_v8 = vpop.f32.mrb[73].mxu0  ;;  %v8226_v37 = vld [vmem:[#allocation19_spill] sm:$0xff] }
 0x79a   : > { %v4211_v50 = vadd.f32 %v4179_v34, %v8214_v60 }
 0x79b   : > { %v4039_v6 = vpop.f32.mrb[74].mxu0 }
 0x79c   : > { %4243 = vst.msk [vmem:[%s7925_s10 + $0x20] sm:$0xff] %vm1677_vm10, %v4211_v50  ;;  %v4180_v39 = vmul.f32 %v7918_v30, %v4039_v6  ;;  %v4041_v29 = vpop.f32.mrb[75].mxu0  ;;  %v8227_v6 = vld [vmem:[#allocation20_spill] sm:$0xff] }
 0x79e   : > { %v4212_v57 = vadd.f32 %v4180_v39, %v8215_v47 }
 0x79f   : > { %v4044_v24 = vpop.f32.mrb[76].mxu0 }
 0x7a0   : > { %4244 = vst.msk [vmem:[%s7925_s10 + $0x28] sm:$0xff] %vm1677_vm10, %v4212_v57  ;;  %v4181_v18 = vmul.f32 %v7918_v30, %v4044_v24  ;;  %v4046_v15 = vpop.f32.mrb[77].mxu0  ;;  %v8228_v24 = vld [vmem:[#allocation21_spill] sm:$0xff] }
 0x7a2   : > { %v4213_v36 = vadd.f32 %v4181_v18, %v8216_v54 }
 0x7a3   : > { %v4049_v14 = vpop.f32.mrb[78].mxu0 }
 0x7a4   : > { %4245 = vst.msk [vmem:[%s7925_s10 + $0x30] sm:$0xff] %vm1677_vm10, %v4213_v36  ;;  %v4182_v40 = vmul.f32 %v7918_v30, %v4049_v14  ;;  %v4051_v25 = vpop.f32.mrb[79].mxu0  ;;  %v8229_v14 = vld [vmem:[#allocation22_spill] sm:$0xff] }
 0x7a6   : > { %v4214_v52 = vadd.f32 %v4182_v40, %v8217_v19 }
 0x7a7   : > { %v4054_v53 = vpop.f32.mrb[80].mxu0 }
 0x7a8   : > { %4246 = vst.msk [vmem:[%s7925_s10 + $0x38] sm:$0xff] %vm1677_vm10, %v4214_v52  ;;  %v4183_v17 = vmul.f32 %v7918_v30, %v4054_v53  ;;  %v4056_v55 = vpop.f32.mrb[81].mxu0  ;;  %v8230_v53 = vld [vmem:[#allocation23_spill] sm:$0xff] }
 0x7aa   : > { %v4215_v26 = vadd.f32 %v4183_v17, %v8218_v42 }
 0x7ab   : > { %v4059_v7 = vpop.f32.mrb[82].mxu0 }
 0x7ac   : > { %4247 = vst.msk [vmem:[%s7925_s10 + $0x40] sm:$0xff] %vm1677_vm10, %v4215_v26  ;;  %v4184_v44 = vmul.f32 %v7918_v30, %v4059_v7  ;;  %v4061_v5 = vpop.f32.mrb[83].mxu0  ;;  %v8231_v7 = vld [vmem:[#allocation24_spill] sm:$0xff] }
 0x7ae   : > { %v4216_v20 = vadd.f32 %v4184_v44, %v8219_v62 }
 0x7af   : > { %v4064_v49 = vpop.f32.mrb[84].mxu0 }
 0x7b0   : > { %4248 = vst.msk [vmem:[%s7925_s10 + $0x48] sm:$0xff] %vm1677_vm10, %v4216_v20  ;;  %v4185_v63 = vmul.f32 %v7918_v30, %v4064_v49  ;;  %v4066_v10 = vpop.f32.mrb[85].mxu0  ;;  %v8232_v49 = vld [vmem:[#allocation25_spill] sm:$0xff] }
 0x7b2   : > { %v4217_v38 = vadd.f32 %v4185_v63, %v8220_v41 }
 0x7b3   : > { %v4069_v32 = vpop.f32.mrb[86].mxu0 }
 0x7b4   : > { %4249 = vst.msk [vmem:[%s7925_s10 + $0x50] sm:$0xff] %vm1677_vm10, %v4217_v38  ;;  %v4186_v61 = vmul.f32 %v7918_v30, %v4069_v32  ;;  %v4071_v45 = vpop.f32.mrb[87].mxu0  ;;  %v8233_v32 = vld [vmem:[#allocation26_spill] sm:$0xff] }
 0x7b6   : > { %v4218_v48 = vadd.f32 %v4186_v61, %v8221_v58 }
 0x7b7   : > { %v4074_v1 = vpop.f32.mrb[88].mxu0 }
 0x7b8   : > { %4250 = vst.msk [vmem:[%s7925_s10 + $0x58] sm:$0xff] %vm1677_vm10, %v4218_v48  ;;  %v4187_v0 = vmul.f32 %v7918_v30, %v4074_v1  ;;  %v4076_v27 = vpop.f32.mrb[89].mxu0  ;;  %v8234_v1 = vld [vmem:[#allocation27_spill] sm:$0xff] }
 0x7ba   : > { %v4219_v4 = vadd.f32 %v4187_v0, %v8222_v35 }
 0x7bb   : > { %v4079_v22 = vpop.f32.mrb[90].mxu0 }
 0x7bc   : > { %4251 = vst.msk [vmem:[%s7925_s10 + $0x60] sm:$0xff] %vm1677_vm10, %v4219_v4  ;;  %v4188_v59 = vmul.f32 %v7918_v30, %v4079_v22  ;;  %v4081_v13 = vpop.f32.mrb[91].mxu0  ;;  %v8235_v22 = vld [vmem:[#allocation28_spill] sm:$0xff] }
 0x7be   : > { %v4220_v3 = vadd.f32 %v4188_v59, %v8223_v12 }
 0x7bf   : > { %v4084_v28 = vpop.f32.mrb[92].mxu0 }
 0x7c0   : > { %4252 = vst.msk [vmem:[%s7925_s10 + $0x68] sm:$0xff] %vm1677_vm10, %v4220_v3  ;;  %v4189_v11 = vmul.f32 %v7918_v30, %v4084_v28  ;;  %v4086_v31 = vpop.f32.mrb[93].mxu0  ;;  %v8236_v28 = vld [vmem:[#allocation29_spill] sm:$0xff] }
 0x7c2   : > { %v4221_v46 = vadd.f32 %v4189_v11, %v8224_v43 }
 0x7c3   : > { %v4089_v51 = vpop.f32.mrb[94].mxu0 }
 0x7c4   : > { %4253 = vst.msk [vmem:[%s7925_s10 + $0x70] sm:$0xff] %vm1677_vm10, %v4221_v46  ;;  %v4190_v23 = vmul.f32 %v7918_v30, %v4089_v51  ;;  %v4091_v2 = vpop.f32.mrb[95].mxu0  ;;  %v8237_v51 = vld [vmem:[#allocation30_spill] sm:$0xff] }
 0x7c6   : > { %v4222_v33 = vadd.f32 %v4190_v23, %v8225_v56 }
 0x7c7   : > { %v4094_v9 = vpop.f32.mrb[96].mxu0 }
 0x7c8   : > { %4254 = vst.msk [vmem:[%s7925_s10 + $0x78] sm:$0xff] %vm1677_vm10, %v4222_v33  ;;  %v4191_v16 = vmul.f32 %v7918_v30, %v4094_v9  ;;  %v4096_v21 = vpop.f32.mrb[97].mxu0  ;;  %v8238_v9 = vld [vmem:[#allocation31_spill] sm:$0xff] }
 0x7ca   : > { %v4223_v34 = vadd.f32 %v4191_v16, %v8226_v37 }
 0x7cb   : > { %v4099_v8 = vpop.f32.mrb[98].mxu0 }
 0x7cc   : > { %4255 = vst.msk [vmem:[%s7925_s10 + $0x80] sm:$0xff] %vm1677_vm10, %v4223_v34  ;;  %v4192_v60 = vmul.f32 %v7918_v30, %v4099_v8  ;;  %v4101_v50 = vpop.f32.mrb[99].mxu0  ;;  %v8239_v8 = vld [vmem:[#allocation32_spill] sm:$0xff] }
 0x7ce   : > { %v4224_v39 = vadd.f32 %v4192_v60, %v8227_v6 }
 0x7cf   : > { %v4104_v29 = vpop.f32.mrb[100].mxu0 }
 0x7d0   : > { %4256 = vst.msk [vmem:[%s7925_s10 + $0x88] sm:$0xff] %vm1677_vm10, %v4224_v39  ;;  %v4193_v47 = vmul.f32 %v7918_v30, %v4104_v29  ;;  %v4106_v57 = vpop.f32.mrb[101].mxu0  ;;  %v8240_v29 = vld [vmem:[#allocation33_spill] sm:$0xff] }
 0x7d2   : > { %v4225_v18 = vadd.f32 %v4193_v47, %v8228_v24 }
 0x7d3   : > { %v4109_v15 = vpop.f32.mrb[102].mxu0 }
 0x7d4   : > { %4257 = vst.msk [vmem:[%s7925_s10 + $0x90] sm:$0xff] %vm1677_vm10, %v4225_v18  ;;  %v4194_v54 = vmul.f32 %v7918_v30, %v4109_v15  ;;  %v4111_v36 = vpop.f32.mrb[103].mxu0  ;;  %v8241_v15 = vld [vmem:[#allocation34_spill] sm:$0xff] }
 0x7d6   : > { %v4226_v40 = vadd.f32 %v4194_v54, %v8229_v14 }
 0x7d7   : > { %v4114_v25 = vpop.f32.mrb[104].mxu0 }
 0x7d8   : > { %4258 = vst.msk [vmem:[%s7925_s10 + $0x98] sm:$0xff] %vm1677_vm10, %v4226_v40  ;;  %v4195_v19 = vmul.f32 %v7918_v30, %v4114_v25  ;;  %v4116_v52 = vpop.f32.mrb[105].mxu0 }
 0x7da   : > { %v4227_v17 = vadd.f32 %v4195_v19, %v8230_v53 }
 0x7db   : > { %v4119_v55 = vpop.f32.mrb[106].mxu0 }
 0x7dc   : > { %4259 = vst.msk [vmem:[%s7925_s10 + $0xa0] sm:$0xff] %vm1677_vm10, %v4227_v17  ;;  %v4196_v42 = vmul.f32 %v7918_v30, %v4119_v55  ;;  %v4121_v26 = vpop.f32.mrb[107].mxu0 }
 0x7de   : > { %v4228_v44 = vadd.f32 %v4196_v42, %v8231_v7 }
 0x7df   : > { %v4124_v5 = vpop.f32.mrb[108].mxu0 }
 0x7e0   : > { %4260 = vst.msk [vmem:[%s7925_s10 + $0xa8] sm:$0xff] %vm1677_vm10, %v4228_v44  ;;  %v4197_v62 = vmul.f32 %v7918_v30, %v4124_v5  ;;  %v4126_v20 = vpop.f32.mrb[109].mxu0 }
 0x7e2   : > { %v4229_v63 = vadd.f32 %v4197_v62, %v8232_v49 }
 0x7e3   : > { %v4129_v10 = vpop.f32.mrb[110].mxu0 }
 0x7e4   : > { %4261 = vst.msk [vmem:[%s7925_s10 + $0xb0] sm:$0xff] %vm1677_vm10, %v4229_v63  ;;  %v4198_v41 = vmul.f32 %v7918_v30, %v4129_v10  ;;  %v4131_v38 = vpop.f32.mrb[111].mxu0 }
 0x7e6   : > { %v4230_v61 = vadd.f32 %v4198_v41, %v8233_v32 }
 0x7e7   : > { %v4134_v45 = vpop.f32.mrb[112].mxu0 }
 0x7e8   : > { %4262 = vst.msk [vmem:[%s7925_s10 + $0xb8] sm:$0xff] %vm1677_vm10, %v4230_v61  ;;  %v4199_v58 = vmul.f32 %v7918_v30, %v4134_v45  ;;  %v4136_v48 = vpop.f32.mrb[113].mxu0 }
 0x7ea   : > { %v4231_v0 = vadd.f32 %v4199_v58, %v8234_v1 }
 0x7eb   : > { %v4139_v27 = vpop.f32.mrb[114].mxu0 }
 0x7ec   : > { %4263 = vst.msk [vmem:[%s7925_s10 + $0xc0] sm:$0xff] %vm1677_vm10, %v4231_v0  ;;  %v4200_v35 = vmul.f32 %v7918_v30, %v4139_v27  ;;  %v4141_v4 = vpop.f32.mrb[115].mxu0 }
 0x7ee   : > { %v4232_v59 = vadd.f32 %v4200_v35, %v8235_v22 }
 0x7ef   : > { %v4144_v13 = vpop.f32.mrb[116].mxu0 }
 0x7f0   : > { %4264 = vst.msk [vmem:[%s7925_s10 + $0xc8] sm:$0xff] %vm1677_vm10, %v4232_v59  ;;  %v4201_v12 = vmul.f32 %v7918_v30, %v4144_v13  ;;  %v4146_v3 = vpop.f32.mrb[117].mxu0 }
 0x7f2   : > { %v4233_v11 = vadd.f32 %v4201_v12, %v8236_v28 }
 0x7f3   : > { %v4149_v31 = vpop.f32.mrb[118].mxu0 }
 0x7f4   : > { %4265 = vst.msk [vmem:[%s7925_s10 + $0xd0] sm:$0xff] %vm1677_vm10, %v4233_v11  ;;  %v4202_v43 = vmul.f32 %v7918_v30, %v4149_v31  ;;  %v4151_v46 = vpop.f32.mrb[119].mxu0 }
 0x7f6   : > { %v4234_v23 = vadd.f32 %v4202_v43, %v8237_v51 }
 0x7f7   : > { %v4154_v2 = vpop.f32.mrb[120].mxu0 }
 0x7f8   : > { %4266 = vst.msk [vmem:[%s7925_s10 + $0xd8] sm:$0xff] %vm1677_vm10, %v4234_v23  ;;  %v4203_v56 = vmul.f32 %v7918_v30, %v4154_v2  ;;  %v4156_v33 = vpop.f32.mrb[121].mxu0 }
 0x7fa   : > { %v4235_v16 = vadd.f32 %v4203_v56, %v8238_v9 }
 0x7fb   : > { %v4159_v21 = vpop.f32.mrb[122].mxu0 }
 0x7fc   : > { %4267 = vst.msk [vmem:[%s7925_s10 + $0xe0] sm:$0xff] %vm1677_vm10, %v4235_v16  ;;  %v4204_v37 = vmul.f32 %v7918_v30, %v4159_v21  ;;  %v4161_v34 = vpop.f32.mrb[123].mxu0 }
 0x7fe   : > { %v4236_v60 = vadd.f32 %v4204_v37, %v8239_v8 }
 0x7ff   : > { %v4164_v50 = vpop.f32.mrb[124].mxu0 }
 0x800   : > { %4268 = vst.msk [vmem:[%s7925_s10 + $0xe8] sm:$0xff] %vm1677_vm10, %v4236_v60  ;;  %v4205_v6 = vmul.f32 %v7918_v30, %v4164_v50  ;;  %v4166_v39 = vpop.f32.mrb[125].mxu0 }
 0x802   : > { %v4237_v47 = vadd.f32 %v4205_v6, %v8240_v29 }
 0x803   : > { %v4169_v57 = vpop.f32.mrb[126].mxu0 }
 0x804   : > { %4269 = vst.msk [vmem:[%s7925_s10 + $0xf0] sm:$0xff] %vm1677_vm10, %v4237_v47  ;;  %v4206_v24 = vmul.f32 %v7918_v30, %v4169_v57  ;;  %v4171_v18 = vpop.f32.mrb[127].mxu0 }
 0x806   : > { %v4238_v54 = vadd.f32 %v4206_v24, %v8241_v15 }
 0x808   : > { %4270 = vst.msk [vmem:[%s7925_s10 + $0xf8] sm:$0xff] %vm1677_vm10, %v4238_v54 }
 0x809 PF: > { %s22_s19 = sadd.s32 1, %s5348_s19  }
 0x80a   : > { %p19_p4 = scmp.ge.s32.totalorder %s22_s19, 4  }
 0x80c   :  { %21 = sbr.rel (!%p19_p4) target bundleno = 2 (0x2), region = 94 }

</bundles_post_ra>
